<compile_context>
chip_gen: v6e
topology: v6e:2x2x1
jax: 0.10.0
libtpu: 0.0.40
codegen_flags: <defaults>
</compile_context>

<pallas_src>
import jax
import jax.numpy as jnp
from jax.experimental import pallas as pl
from jax.experimental.pallas import tpu as pltpu


def _round_up(x, m):
    return (x + m - 1) // m * m


def _bilinear_mixture_kernel(a_ref, uw_ref, vt_ref, ub_ref, vbt_ref,
                             logits_ref, mhat_ref):
    """One (tm, tn) tile of the (user, item) score plane.

    a_ref      [nb, C]      SMEM  mixture coefficients (scalar reads)
    uw_ref     [nb*tm, D]   VMEM  precomputed U @ W_b, basis blocks stacked on rows
    vt_ref     [D, tn]      VMEM  v_hidden^T (pre-transposed in the wrapper)
    ub_ref     [tm, C]      VMEM  gathered user bias u_bias[u]
    vbt_ref    [C, tn]      VMEM  gathered item bias v_bias[v], transposed
    logits_ref [C, tm, tn]        per-class logits (PyTorch outputs.permute(2,0,1))
    mhat_ref   [tm, tn]           expected rating sum_r r * softmax_r(logits)
    """
    nb, num_classes = a_ref.shape
    tm = ub_ref.shape[0]

    uw = uw_ref[...]
    vt = vt_ref[...]
    ub = ub_ref[...]          # [tm, C]  f32
    vbt = vbt_ref[...]        # [C, tn]  f32

    # All nb bilinear basis scores in ONE MXU matmul:
    #   s[b*tm:(b+1)*tm, :] = (U @ W_b) @ V^T      (f32 accumulation)
    s = jnp.dot(uw, vt, preferred_element_type=jnp.float32)   # [nb*tm, tn]

    def class_logits(c):
        lc = ub[:, c:c + 1] + vbt[c:c + 1, :]                  # [tm,1] + [1,tn]
        for b in range(nb):
            lc = lc + a_ref[b, c] * s[b * tm:(b + 1) * tm, :]  # SMEM scalar * tile
        return lc

    # Online (streaming) softmax over the class axis, fused with the
    # ratings-weighted numerator -> no [C, tm, tn] stacked intermediates.
    lc = class_logits(0)
    logits_ref[0] = lc.astype(logits_ref.dtype)
    m_run = lc
    l_run = jnp.ones_like(lc)            # exp(lc - m_run) == 1
    num_run = jnp.ones_like(lc)          # rating 1 * exp(lc - m_run)
    for c in range(1, num_classes):
        lc = class_logits(c)
        logits_ref[c] = lc.astype(logits_ref.dtype)
        m_new = jnp.maximum(m_run, lc)
        alpha = jnp.exp(m_run - m_new)
        p = jnp.exp(lc - m_new)
        l_run = alpha * l_run + p
        num_run = alpha * num_run + jnp.float32(c + 1) * p
        m_run = m_new

    # EUP reciprocal + multiply instead of a VPU divide.
    mhat_ref[...] = num_run * pl.reciprocal(l_run, approx=True)


def bilinear_mixture(u_hidden, v_hidden, weight, a, u_bias_g, v_bias_g, *,
                     tm=256, tn=512, compute_dtype=jnp.bfloat16,
                     logits_dtype=jnp.float32):
    """u_bias_g / v_bias_g are the already-gathered biases u_bias[u], v_bias[v].

    Returns (logits [C, NU, NV], m_hat [NU, NV]) matching the PyTorch forward
    (eval-mode dropout).
    """
    NU, D = u_hidden.shape
    NV = v_hidden.shape[0]
    nb = weight.shape[0]
    C = a.shape[1]
    f32 = jnp.float32
    hp = jax.lax.Precision.HIGHEST

    # Clamp tiles for small problems, keep layout-friendly multiples
    # (16 sublanes covers bf16 packing, 128 lanes for the item axis).
    tm = _round_up(min(tm, _round_up(NU, 16)), 16)
    tn = _round_up(min(tn, _round_up(NV, 128)), 128)
    NU_p = _round_up(NU, tm)
    NV_p = _round_up(NV, tn)
    n_row_tiles = NU_p // tm
    n_col_tiles = NV_p // tn

    uh = u_hidden.astype(compute_dtype)
    vh = v_hidden.astype(compute_dtype)
    w = weight.astype(compute_dtype)

    # Hoist the first bilinear matmul (U @ W_b) out of the kernel: otherwise it
    # is recomputed for every column tile and `weight` occupies VMEM buffers.
    uw = jnp.einsum('ud,bde->bue', uh, w,
                    preferred_element_type=f32,
                    precision=hp).astype(compute_dtype)        # [nb, NU, D]

    # Pad to tile multiples (padded rows/cols are sliced off at the end).
    if NU_p != NU:
        uw = jnp.pad(uw, ((0, 0), (0, NU_p - NU), (0, 0)))
        u_bias_g = jnp.pad(u_bias_g, ((0, NU_p - NU), (0, 0)))
    if NV_p != NV:
        vh = jnp.pad(vh, ((0, NV_p - NV), (0, 0)))
        v_bias_g = jnp.pad(v_bias_g, ((0, NV_p - NV), (0, 0)))

    # Interleave the nb basis row-blocks per row tile so each grid step reads a
    # contiguous [nb*tm, D] slab and does a single fused MXU matmul.
    uw_tiled = uw.reshape(nb, n_row_tiles, tm, D)
    uw_tiled = jnp.transpose(uw_tiled, (1, 0, 2, 3)).reshape(n_row_tiles * nb * tm, D)

    vt = vh.T                          # [D, NV_p]  lane-dense item axis
    ub = u_bias_g.astype(f32)          # [NU_p, C]
    vbt = v_bias_g.astype(f32).T       # [C, NV_p]
    a_f32 = a.astype(f32)

    logits_p, mhat_p = pl.pallas_call(
        _bilinear_mixture_kernel,
        out_shape=(jax.ShapeDtypeStruct((C, NU_p, NV_p), logits_dtype),
                   jax.ShapeDtypeStruct((NU_p, NV_p), jnp.float32)),
        grid_spec=pltpu.PrefetchScalarGridSpec(
            num_scalar_prefetch=0,
            grid=(n_row_tiles, n_col_tiles),
            in_specs=[
                pl.BlockSpec(memory_space=pltpu.MemorySpace.SMEM),    # a  [nb, C]
                pl.BlockSpec((nb * tm, D), lambda i, j: (i, 0)),      # U@W (interleaved)
                pl.BlockSpec((D, tn), lambda i, j: (0, j)),           # v_hidden^T
                pl.BlockSpec((tm, C), lambda i, j: (i, 0)),           # u_bias[u]
                pl.BlockSpec((C, tn), lambda i, j: (0, j)),           # v_bias[v]^T
            ],
            out_specs=[
                pl.BlockSpec((C, tm, tn), lambda i, j: (0, i, j)),    # logits
                pl.BlockSpec((tm, tn), lambda i, j: (i, j)),          # m_hat
            ],
        ),
        compiler_params=pltpu.CompilerParams(
            dimension_semantics=("parallel", "parallel"),
            vmem_limit_bytes=48 * 1024 * 1024),
    )(a_f32, uw_tiled, vt, ub, vbt)

    return logits_p[:, :NU, :NV], mhat_p[:NU, :NV]


def _xavier_normal(key, shape):
    # Deterministic stand-in for nn.init.xavier_normal_ (exact fan math irrelevant here).
    fan_in, fan_out = shape[-2], shape[-1]
    std = (2.0 / (fan_in + fan_out)) ** 0.5
    return std * jax.random.normal(key, shape, dtype=jnp.float32)


if __name__ == "__main__":
    num_users, num_items, num_classes, input_dim, nb = 40, 300, 5, 32, 2

    key = jax.random.PRNGKey(0)
    k = jax.random.split(key, 6)
    u_hidden = jax.random.normal(k[0], (num_users, input_dim), jnp.float32)
    v_hidden = jax.random.normal(k[1], (num_items, input_dim), jnp.float32)
    weight = _xavier_normal(k[2], (nb, input_dim, input_dim))
    a = _xavier_normal(k[3], (nb, num_classes))
    u_bias = _xavier_normal(k[4], (num_users, num_classes))
    v_bias = _xavier_normal(k[5], (num_items, num_classes))
    u = jnp.arange(num_users)
    v = jnp.arange(num_items)

    # Pure-JAX reference (mirrors the PyTorch forward, eval-mode dropout).
    hp = jax.lax.Precision.HIGHEST
    uw_ref = jnp.einsum('ud,bde->bue', u_hidden, weight, precision=hp)
    basis = jnp.einsum('bud,vd->uvb', uw_ref, v_hidden, precision=hp)
    out_ref = jnp.einsum('uvb,bc->uvc', basis, a, precision=hp)
    out_ref = out_ref + u_bias[u][:, None, :] + v_bias[v][None, :, :]
    out_ref = jnp.transpose(out_ref, (2, 0, 1))                       # [C, NU, NV]
    sm = jax.nn.softmax(out_ref, axis=0)
    ratings = jnp.arange(1, num_classes + 1, dtype=jnp.float32).reshape(-1, 1, 1)
    m_ref = jnp.sum(ratings * sm, axis=0)

    # f32 path (tiles clamp to the padded problem; exercises row/col padding).
    logits, m_hat = bilinear_mixture(u_hidden, v_hidden, weight, a,
                                     u_bias[u], v_bias[v],
                                     compute_dtype=jnp.float32)
    jax.block_until_ready((logits, m_hat))
    assert logits.shape == (num_classes, num_users, num_items)
    assert m_hat.shape == (num_users, num_items)
    assert jnp.allclose(logits, out_ref, atol=2e-3, rtol=2e-3), "f32 logits mismatch"
    # m_hat tolerance accounts for pl.reciprocal(approx=True) in the epilogue.
    assert jnp.allclose(m_hat, m_ref, atol=5e-2, rtol=2e-2), "f32 m_hat mismatch"

    # bf16 MXU path with small explicit tiles (exercises the multi-tile grid /
    # index maps).  Loose tolerances reflect bf16 operand rounding.
    logits_bf, m_hat_bf = bilinear_mixture(u_hidden, v_hidden, weight, a,
                                           u_bias[u], v_bias[v],
                                           compute_dtype=jnp.bfloat16,
                                           tm=16, tn=128)
    jax.block_until_ready((logits_bf, m_hat_bf))
    assert jnp.allclose(logits_bf, out_ref, atol=0.5, rtol=0.05), "bf16 logits mismatch"
    assert jnp.allclose(m_hat_bf, m_ref, atol=0.5, rtol=0.1), "bf16 m_hat mismatch"

    print("KERNEL_OK")
</pallas_src>

<mosaic_0001>
module attributes {stable_mosaic.version = 11 : i64} {
  func.func @_bilinear_mixture_kernel(%arg0: i32, %arg1: i32, %arg2: memref<2x5xf32, #tpu.memory_space<smem>>, %arg3: memref<96x32xf32, #tpu.memory_space<vmem>>, %arg4: memref<32x384xf32, #tpu.memory_space<vmem>>, %arg5: memref<48x5xf32, #tpu.memory_space<vmem>>, %arg6: memref<5x384xf32, #tpu.memory_space<vmem>>, %arg7: memref<5x48x384xf32, #tpu.memory_space<vmem>>, %arg8: memref<48x384xf32, #tpu.memory_space<vmem>>) attributes {dimension_semantics = [#tpu.dimension_semantics<parallel>, #tpu.dimension_semantics<parallel>], iteration_bounds = array<i64: 1, 1>, scalar_prefetch = 0 : i64, scratch_operands = 0 : i64, tpu.core_type = #tpu.core_type<tc>, window_params = [{transform_indices = @transform_0, window_bounds = array<i64: 2, 5>}, {transform_indices = @transform_1, window_bounds = array<i64: 96, 32>}, {transform_indices = @transform_2, window_bounds = array<i64: 32, 384>}, {transform_indices = @transform_3, window_bounds = array<i64: 48, 5>}, {transform_indices = @transform_4, window_bounds = array<i64: 5, 384>}, {transform_indices = @transform_5, window_bounds = array<i64: 5, 48, 384>}, {transform_indices = @transform_6, window_bounds = array<i64: 48, 384>}]} {
    %c0 = arith.constant 0 : index
    %c0_0 = arith.constant 0 : index
    %0 = vector.load %arg3[%c0, %c0_0] : memref<96x32xf32, #tpu.memory_space<vmem>>, vector<96x32xf32>
    %c0_1 = arith.constant 0 : index
    %c0_2 = arith.constant 0 : index
    %1 = vector.load %arg4[%c0_1, %c0_2] : memref<32x384xf32, #tpu.memory_space<vmem>>, vector<32x384xf32>
    %c0_3 = arith.constant 0 : index
    %c0_4 = arith.constant 0 : index
    %2 = vector.load %arg5[%c0_3, %c0_4] : memref<48x5xf32, #tpu.memory_space<vmem>>, vector<48x5xf32>
    %c0_5 = arith.constant 0 : index
    %c0_6 = arith.constant 0 : index
    %3 = vector.load %arg6[%c0_5, %c0_6] : memref<5x384xf32, #tpu.memory_space<vmem>>, vector<5x384xf32>
    %cst = arith.constant dense<0.000000e+00> : vector<96x384xf32>
    %4 = tpu.matmul %0, %1, %cst {dimension_numbers = #tpu.dot_dimension_numbers<[1], [0], [0], [1], [0, 0, 1, 1], [], []>} : vector<96x32xf32>, vector<32x384xf32>, vector<96x384xf32> -> vector<96x384xf32>
    %5 = vector.extract_strided_slice %2 {offsets = [0, 0], sizes = [48, 1], strides = [1, 1]} : vector<48x5xf32> to vector<48x1xf32>
    %6 = vector.extract_strided_slice %3 {offsets = [0, 0], sizes = [1, 384], strides = [1, 1]} : vector<5x384xf32> to vector<1x384xf32>
    %7 = vector.broadcast %5 : vector<48x1xf32> to vector<48x384xf32>
    %8 = vector.broadcast %6 : vector<1x384xf32> to vector<48x384xf32>
    %9 = arith.addf %7, %8 : vector<48x384xf32>
    %c0_7 = arith.constant 0 : index
    %c0_8 = arith.constant 0 : index
    %10 = memref.load %arg2[%c0_7, %c0_8] : memref<2x5xf32, #tpu.memory_space<smem>>
    %11 = vector.extract_strided_slice %4 {offsets = [0, 0], sizes = [48, 384], strides = [1, 1]} : vector<96x384xf32> to vector<48x384xf32>
    %12 = vector.broadcast %10 : f32 to vector<48x384xf32>
    %13 = arith.mulf %12, %11 : vector<48x384xf32>
    %14 = arith.addf %9, %13 : vector<48x384xf32>
    %c1 = arith.constant 1 : index
    %c0_9 = arith.constant 0 : index
    %15 = memref.load %arg2[%c1, %c0_9] : memref<2x5xf32, #tpu.memory_space<smem>>
    %16 = vector.extract_strided_slice %4 {offsets = [48, 0], sizes = [48, 384], strides = [1, 1]} : vector<96x384xf32> to vector<48x384xf32>
    %17 = vector.broadcast %15 : f32 to vector<48x384xf32>
    %18 = arith.mulf %17, %16 : vector<48x384xf32>
    %19 = arith.addf %14, %18 : vector<48x384xf32>
    %c0_10 = arith.constant 0 : index
    %c0_11 = arith.constant 0 : index
    %c0_12 = arith.constant 0 : index
    %20 = vector.load %arg7[%c0_10, %c0_11, %c0_12] : memref<5x48x384xf32, #tpu.memory_space<vmem>>, vector<1x48x384xf32>
    %21 = vector.shape_cast %20 : vector<1x48x384xf32> to vector<48x384xf32>
    %22 = vector.shape_cast %19 : vector<48x384xf32> to vector<1x48x384xf32>
    tpu.vector_store %arg7[%c0_10, %c0_11, %c0_12], %22 {strides = array<i32>} : memref<5x48x384xf32, #tpu.memory_space<vmem>>, vector<1x48x384xf32>,
    %cst_13 = arith.constant 1.000000e+00 : f32
    %23 = vector.broadcast %cst_13 : f32 to vector<48x384xf32>
    %cst_14 = arith.constant 1.000000e+00 : f32
    %24 = vector.broadcast %cst_14 : f32 to vector<48x384xf32>
    %25 = vector.extract_strided_slice %2 {offsets = [0, 1], sizes = [48, 1], strides = [1, 1]} : vector<48x5xf32> to vector<48x1xf32>
    %26 = vector.extract_strided_slice %3 {offsets = [1, 0], sizes = [1, 384], strides = [1, 1]} : vector<5x384xf32> to vector<1x384xf32>
    %27 = vector.broadcast %25 : vector<48x1xf32> to vector<48x384xf32>
    %28 = vector.broadcast %26 : vector<1x384xf32> to vector<48x384xf32>
    %29 = arith.addf %27, %28 : vector<48x384xf32>
    %c0_15 = arith.constant 0 : index
    %c1_16 = arith.constant 1 : index
    %30 = memref.load %arg2[%c0_15, %c1_16] : memref<2x5xf32, #tpu.memory_space<smem>>
    %31 = vector.extract_strided_slice %4 {offsets = [0, 0], sizes = [48, 384], strides = [1, 1]} : vector<96x384xf32> to vector<48x384xf32>
    %32 = vector.broadcast %30 : f32 to vector<48x384xf32>
    %33 = arith.mulf %32, %31 : vector<48x384xf32>
    %34 = arith.addf %29, %33 : vector<48x384xf32>
    %c1_17 = arith.constant 1 : index
    %c1_18 = arith.constant 1 : index
    %35 = memref.load %arg2[%c1_17, %c1_18] : memref<2x5xf32, #tpu.memory_space<smem>>
    %36 = vector.extract_strided_slice %4 {offsets = [48, 0], sizes = [48, 384], strides = [1, 1]} : vector<96x384xf32> to vector<48x384xf32>
    %37 = vector.broadcast %35 : f32 to vector<48x384xf32>
    %38 = arith.mulf %37, %36 : vector<48x384xf32>
    %39 = arith.addf %34, %38 : vector<48x384xf32>
    %c1_19 = arith.constant 1 : index
    %c0_20 = arith.constant 0 : index
    %c0_21 = arith.constant 0 : index
    %40 = vector.load %arg7[%c1_19, %c0_20, %c0_21] : memref<5x48x384xf32, #tpu.memory_space<vmem>>, vector<1x48x384xf32>
    %41 = vector.shape_cast %40 : vector<1x48x384xf32> to vector<48x384xf32>
    %42 = vector.shape_cast %39 : vector<48x384xf32> to vector<1x48x384xf32>
    tpu.vector_store %arg7[%c1_19, %c0_20, %c0_21], %42 {strides = array<i32>} : memref<5x48x384xf32, #tpu.memory_space<vmem>>, vector<1x48x384xf32>,
    %43 = arith.maximumf %19, %39 : vector<48x384xf32>
    %44 = arith.subf %19, %43 : vector<48x384xf32>
    %45 = math.exp %44 : vector<48x384xf32>
    %46 = arith.subf %39, %43 : vector<48x384xf32>
    %47 = math.exp %46 : vector<48x384xf32>
    %48 = arith.mulf %45, %23 : vector<48x384xf32>
    %49 = arith.addf %48, %47 : vector<48x384xf32>
    %50 = arith.mulf %45, %24 : vector<48x384xf32>
    %cst_22 = arith.constant 2.000000e+00 : f32
    %51 = vector.broadcast %cst_22 : f32 to vector<48x384xf32>
    %52 = arith.mulf %51, %47 : vector<48x384xf32>
    %53 = arith.addf %50, %52 : vector<48x384xf32>
    %54 = vector.extract_strided_slice %2 {offsets = [0, 2], sizes = [48, 1], strides = [1, 1]} : vector<48x5xf32> to vector<48x1xf32>
    %55 = vector.extract_strided_slice %3 {offsets = [2, 0], sizes = [1, 384], strides = [1, 1]} : vector<5x384xf32> to vector<1x384xf32>
    %56 = vector.broadcast %54 : vector<48x1xf32> to vector<48x384xf32>
    %57 = vector.broadcast %55 : vector<1x384xf32> to vector<48x384xf32>
    %58 = arith.addf %56, %57 : vector<48x384xf32>
    %c0_23 = arith.constant 0 : index
    %c2 = arith.constant 2 : index
    %59 = memref.load %arg2[%c0_23, %c2] : memref<2x5xf32, #tpu.memory_space<smem>>
    %60 = vector.extract_strided_slice %4 {offsets = [0, 0], sizes = [48, 384], strides = [1, 1]} : vector<96x384xf32> to vector<48x384xf32>
    %61 = vector.broadcast %59 : f32 to vector<48x384xf32>
    %62 = arith.mulf %61, %60 : vector<48x384xf32>
    %63 = arith.addf %58, %62 : vector<48x384xf32>
    %c1_24 = arith.constant 1 : index
    %c2_25 = arith.constant 2 : index
    %64 = memref.load %arg2[%c1_24, %c2_25] : memref<2x5xf32, #tpu.memory_space<smem>>
    %65 = vector.extract_strided_slice %4 {offsets = [48, 0], sizes = [48, 384], strides = [1, 1]} : vector<96x384xf32> to vector<48x384xf32>
    %66 = vector.broadcast %64 : f32 to vector<48x384xf32>
    %67 = arith.mulf %66, %65 : vector<48x384xf32>
    %68 = arith.addf %63, %67 : vector<48x384xf32>
    %c2_26 = arith.constant 2 : index
    %c0_27 = arith.constant 0 : index
    %c0_28 = arith.constant 0 : index
    %69 = vector.load %arg7[%c2_26, %c0_27, %c0_28] : memref<5x48x384xf32, #tpu.memory_space<vmem>>, vector<1x48x384xf32>
    %70 = vector.shape_cast %69 : vector<1x48x384xf32> to vector<48x384xf32>
    %71 = vector.shape_cast %68 : vector<48x384xf32> to vector<1x48x384xf32>
    tpu.vector_store %arg7[%c2_26, %c0_27, %c0_28], %71 {strides = array<i32>} : memref<5x48x384xf32, #tpu.memory_space<vmem>>, vector<1x48x384xf32>,
    %72 = arith.maximumf %43, %68 : vector<48x384xf32>
    %73 = arith.subf %43, %72 : vector<48x384xf32>
    %74 = math.exp %73 : vector<48x384xf32>
    %75 = arith.subf %68, %72 : vector<48x384xf32>
    %76 = math.exp %75 : vector<48x384xf32>
    %77 = arith.mulf %74, %49 : vector<48x384xf32>
    %78 = arith.addf %77, %76 : vector<48x384xf32>
    %79 = arith.mulf %74, %53 : vector<48x384xf32>
    %cst_29 = arith.constant 3.000000e+00 : f32
    %80 = vector.broadcast %cst_29 : f32 to vector<48x384xf32>
    %81 = arith.mulf %80, %76 : vector<48x384xf32>
    %82 = arith.addf %79, %81 : vector<48x384xf32>
    %83 = vector.extract_strided_slice %2 {offsets = [0, 3], sizes = [48, 1], strides = [1, 1]} : vector<48x5xf32> to vector<48x1xf32>
    %84 = vector.extract_strided_slice %3 {offsets = [3, 0], sizes = [1, 384], strides = [1, 1]} : vector<5x384xf32> to vector<1x384xf32>
    %85 = vector.broadcast %83 : vector<48x1xf32> to vector<48x384xf32>
    %86 = vector.broadcast %84 : vector<1x384xf32> to vector<48x384xf32>
    %87 = arith.addf %85, %86 : vector<48x384xf32>
    %c0_30 = arith.constant 0 : index
    %c3 = arith.constant 3 : index
    %88 = memref.load %arg2[%c0_30, %c3] : memref<2x5xf32, #tpu.memory_space<smem>>
    %89 = vector.extract_strided_slice %4 {offsets = [0, 0], sizes = [48, 384], strides = [1, 1]} : vector<96x384xf32> to vector<48x384xf32>
    %90 = vector.broadcast %88 : f32 to vector<48x384xf32>
    %91 = arith.mulf %90, %89 : vector<48x384xf32>
    %92 = arith.addf %87, %91 : vector<48x384xf32>
    %c1_31 = arith.constant 1 : index
    %c3_32 = arith.constant 3 : index
    %93 = memref.load %arg2[%c1_31, %c3_32] : memref<2x5xf32, #tpu.memory_space<smem>>
    %94 = vector.extract_strided_slice %4 {offsets = [48, 0], sizes = [48, 384], strides = [1, 1]} : vector<96x384xf32> to vector<48x384xf32>
    %95 = vector.broadcast %93 : f32 to vector<48x384xf32>
    %96 = arith.mulf %95, %94 : vector<48x384xf32>
    %97 = arith.addf %92, %96 : vector<48x384xf32>
    %c3_33 = arith.constant 3 : index
    %c0_34 = arith.constant 0 : index
    %c0_35 = arith.constant 0 : index
    %98 = vector.load %arg7[%c3_33, %c0_34, %c0_35] : memref<5x48x384xf32, #tpu.memory_space<vmem>>, vector<1x48x384xf32>
    %99 = vector.shape_cast %98 : vector<1x48x384xf32> to vector<48x384xf32>
    %100 = vector.shape_cast %97 : vector<48x384xf32> to vector<1x48x384xf32>
    tpu.vector_store %arg7[%c3_33, %c0_34, %c0_35], %100 {strides = array<i32>} : memref<5x48x384xf32, #tpu.memory_space<vmem>>, vector<1x48x384xf32>,
    %101 = arith.maximumf %72, %97 : vector<48x384xf32>
    %102 = arith.subf %72, %101 : vector<48x384xf32>
    %103 = math.exp %102 : vector<48x384xf32>
    %104 = arith.subf %97, %101 : vector<48x384xf32>
    %105 = math.exp %104 : vector<48x384xf32>
    %106 = arith.mulf %103, %78 : vector<48x384xf32>
    %107 = arith.addf %106, %105 : vector<48x384xf32>
    %108 = arith.mulf %103, %82 : vector<48x384xf32>
    %cst_36 = arith.constant 4.000000e+00 : f32
    %109 = vector.broadcast %cst_36 : f32 to vector<48x384xf32>
    %110 = arith.mulf %109, %105 : vector<48x384xf32>
    %111 = arith.addf %108, %110 : vector<48x384xf32>
    %112 = vector.extract_strided_slice %2 {offsets = [0, 4], sizes = [48, 1], strides = [1, 1]} : vector<48x5xf32> to vector<48x1xf32>
    %113 = vector.extract_strided_slice %3 {offsets = [4, 0], sizes = [1, 384], strides = [1, 1]} : vector<5x384xf32> to vector<1x384xf32>
    %114 = vector.broadcast %112 : vector<48x1xf32> to vector<48x384xf32>
    %115 = vector.broadcast %113 : vector<1x384xf32> to vector<48x384xf32>
    %116 = arith.addf %114, %115 : vector<48x384xf32>
    %c0_37 = arith.constant 0 : index
    %c4 = arith.constant 4 : index
    %117 = memref.load %arg2[%c0_37, %c4] : memref<2x5xf32, #tpu.memory_space<smem>>
    %118 = vector.extract_strided_slice %4 {offsets = [0, 0], sizes = [48, 384], strides = [1, 1]} : vector<96x384xf32> to vector<48x384xf32>
    %119 = vector.broadcast %117 : f32 to vector<48x384xf32>
    %120 = arith.mulf %119, %118 : vector<48x384xf32>
    %121 = arith.addf %116, %120 : vector<48x384xf32>
    %c1_38 = arith.constant 1 : index
    %c4_39 = arith.constant 4 : index
    %122 = memref.load %arg2[%c1_38, %c4_39] : memref<2x5xf32, #tpu.memory_space<smem>>
    %123 = vector.extract_strided_slice %4 {offsets = [48, 0], sizes = [48, 384], strides = [1, 1]} : vector<96x384xf32> to vector<48x384xf32>
    %124 = vector.broadcast %122 : f32 to vector<48x384xf32>
    %125 = arith.mulf %124, %123 : vector<48x384xf32>
    %126 = arith.addf %121, %125 : vector<48x384xf32>
    %c4_40 = arith.constant 4 : index
    %c0_41 = arith.constant 0 : index
    %c0_42 = arith.constant 0 : index
    %127 = vector.load %arg7[%c4_40, %c0_41, %c0_42] : memref<5x48x384xf32, #tpu.memory_space<vmem>>, vector<1x48x384xf32>
    %128 = vector.shape_cast %127 : vector<1x48x384xf32> to vector<48x384xf32>
    %129 = vector.shape_cast %126 : vector<48x384xf32> to vector<1x48x384xf32>
    tpu.vector_store %arg7[%c4_40, %c0_41, %c0_42], %129 {strides = array<i32>} : memref<5x48x384xf32, #tpu.memory_space<vmem>>, vector<1x48x384xf32>,
    %130 = arith.maximumf %101, %126 : vector<48x384xf32>
    %131 = arith.subf %101, %130 : vector<48x384xf32>
    %132 = math.exp %131 : vector<48x384xf32>
    %133 = arith.subf %126, %130 : vector<48x384xf32>
    %134 = math.exp %133 : vector<48x384xf32>
    %135 = arith.mulf %132, %107 : vector<48x384xf32>
    %136 = arith.addf %135, %134 : vector<48x384xf32>
    %137 = arith.mulf %132, %111 : vector<48x384xf32>
    %cst_43 = arith.constant 5.000000e+00 : f32
    %138 = vector.broadcast %cst_43 : f32 to vector<48x384xf32>
    %139 = arith.mulf %138, %134 : vector<48x384xf32>
    %140 = arith.addf %137, %139 : vector<48x384xf32>
    %141 = tpu.reciprocal %136 {approx = true} : vector<48x384xf32> -> vector<48x384xf32>
    %142 = arith.mulf %140, %141 : vector<48x384xf32>
    %c0_44 = arith.constant 0 : index
    %c0_45 = arith.constant 0 : index
    %143 = vector.load %arg8[%c0_44, %c0_45] : memref<48x384xf32, #tpu.memory_space<vmem>>, vector<48x384xf32>
    tpu.vector_store %arg8[%c0_44, %c0_45], %142 {strides = array<i32>} : memref<48x384xf32, #tpu.memory_space<vmem>>, vector<48x384xf32>,
    return
  }
  func.func @transform_0(%arg0: i32, %arg1: i32) -> (i32, i32) {
    %c0_i32 = arith.constant 0 : i32
    %c0_i32_0 = arith.constant 0 : i32
    %c0_i32_1 = arith.constant 0 : i32
    return %c0_i32, %c0_i32_0 : i32, i32
  }
  func.func @transform_1(%arg0: i32, %arg1: i32) -> (i32, i32) {
    %c0_i32 = arith.constant 0 : i32
    %c0_i32_0 = arith.constant 0 : i32
    return %arg0, %c0_i32 : i32, i32
  }
  func.func @transform_2(%arg0: i32, %arg1: i32) -> (i32, i32) {
    %c0_i32 = arith.constant 0 : i32
    %c0_i32_0 = arith.constant 0 : i32
    return %c0_i32, %arg1 : i32, i32
  }
  func.func @transform_3(%arg0: i32, %arg1: i32) -> (i32, i32) {
    %c0_i32 = arith.constant 0 : i32
    %c0_i32_0 = arith.constant 0 : i32
    return %arg0, %c0_i32 : i32, i32
  }
  func.func @transform_4(%arg0: i32, %arg1: i32) -> (i32, i32) {
    %c0_i32 = arith.constant 0 : i32
    %c0_i32_0 = arith.constant 0 : i32
    return %c0_i32, %arg1 : i32, i32
  }
  func.func @transform_5(%arg0: i32, %arg1: i32) -> (i32, i32, i32) {
    %c0_i32 = arith.constant 0 : i32
    %c0_i32_0 = arith.constant 0 : i32
    return %c0_i32, %arg0, %arg1 : i32, i32, i32
  }
  func.func @transform_6(%arg0: i32, %arg1: i32) -> (i32, i32) {
    %c0_i32 = arith.constant 0 : i32
    return %arg0, %arg1 : i32, i32
  }
}

</mosaic_0001>

<bundles_post_ra>
// kernel: tpu_custom_call.1
= control target key start
LH: loop header
LB: loop body
LE: loop exit
PB: predicated region body
PF: predicated region fallthrough
CT: control target
= control target key end

     0   :  { %12 = vsyncpa [#allocation4], 0  ;;  %s3785_s0 = inlined_call_operand.vmem [shape: f32[2,5], index: 0, kind: input, shape index: {}]   ;;  %s3786_s1 = inlined_call_operand.vmem [shape: f32[96,32], index: 1, kind: input, shape index: {}]   ;;  %s3787_s2 = inlined_call_operand.vmem [shape: f32[32,384], index: 2, kind: input, shape index: {}]   ;;  %s3788_s3 = inlined_call_operand.vmem [shape: f32[48,5], index: 3, kind: input, shape index: {}]   ;;  %s3789_s4 = inlined_call_operand.vmem [shape: f32[5,384], index: 4, kind: input, shape index: {}]   ;;  %s3790_s5 = inlined_call_operand.hbm [shape: f32[5,48,384], index: 5, kind: output, shape index: {0}]   ;;  %s3791_s6 = inlined_call_operand.hbm [shape: f32[48,384], index: 6, kind: output, shape index: {1}]  }
   0x1   :  { %13 = vsyncpa [#allocation3], 0 }
   0x2   :  { %14 = vsyncpa [#allocation7], 0  ;;  %s21_s23 = sshll.u32 %s3785_s0, 4  ;;  %s22_s23 = int_to_ptr.vmem [resolvable:$true] %s21_s23 }
   0x3   :  { %s2462_s24 = scalar_lea.vmem %s22_s23, 32  ;;  %p2467_p1 = scmp.lt.s32.totalorder %s22_s23, %s22_s23 }
   0x4   :  { %p2463_p0 = scmp.ne.s32.totalorder %s22_s23, %s2462_s24  ;;  %p2468_p2 = scmp.lt.s32.totalorder %s2462_s24, %s2462_s24 }
   0x6   :  { %p2469_p3 = por %p2468_p2, %p2467_p1 }
   0x8   :  { %p2470_p4 = pnand %p2469_p3, %p2463_p0 }
   0xa   :  { %2473 = shalt.err (!%p2470_p4)
}
   0xb   :  { %s2520_s25 = smov [#allocation2]  }
   0xc   :  { %24 = dma.vmem_to_smem %s22_s23, 32, %s2520_s25, [#allocation4]  }
   0xd   :  { %2514 = dma.done.wait [#allocation4], 32  }
   0xe   :  { %2515 = vsyncadd [#allocation4], 4294967264 }
   0xf   :  { %36 = sfence }
  0x10   :  { %v59_v0 = vld [vmem:[%s3787_s2 + $0x50] sm:$0xff]  ;;  %v58_v1 = vld [vmem:[%s3787_s2 + $0x48] sm:$0xff]  ;;  %v56_v2 = vld [vmem:[%s3787_s2 + $0x38] sm:$0xff]  ;;  %vm70_vm0 = vcmask 261120   ;;  %v2521_v11 = vmov 0.0   ;;  %v2522_v16 = vmov 0   ;;  %v399_v36 = vlaneseq }
  0x11   :  { %131 = vmatprep.subr.mxu0 %v59_v0  ;;  %2109 = vmatprep.subr.mxu1 %v59_v0  ;;  %v55_v3 = vld [vmem:[%s3787_s2 + $0x30] sm:$0xff]  ;;  %v53_v4 = vld [vmem:[%s3787_s2 + $0x20] sm:$0xff]  ;;  %v52_v5 = vld [vmem:[%s3787_s2 + $0x18] sm:$0xff]  ;;  %v2523_v29 = vmov 1   ;;  %v2524_v33 = vmov 2   ;;  %v2525_v34 = vmov 3  }
  0x12   :  { %132 = vmatpush1.msra.mxu0 %v58_v1  ;;  %2113 = vmatpush1.msra.mxu1 %v58_v1  ;;  %v50_v6 = vld [vmem:[%s3787_s2 + $0x8] sm:$0xff]  ;;  %v49_v7 = vld [vmem:[%s3787_s2] sm:$0xff]  ;;  %v60_v10 = vld [vmem:[%s3787_s2 + $0x58] sm:$0xff]  ;;  %v2526_v35 = vmov 4   ;;  %v2731_v37 = vshrl.u32 %v399_v36, 7  ;;  %s2899_s14 = sld [smem:[#allocation2 + $0x1]] }
  0x13   :  { %133 = vmatprep.subr.mxu0 %v56_v2  ;;  %2110 = vmatprep.subr.mxu1 %v56_v2  ;;  %v37_v8 = vld [vmem:[%s3786_s1] sm:$0xff]  ;;  %v2599_v9 = vld [vmem:[%s3786_s1 + $0x48] sm:$0xff]  ;;  %v2619_v14 = vld [vmem:[%s3786_s1 + $0x50] sm:$0xff]  ;;  %s2061_s15 = sld [smem:[#allocation2 + $0x2]]  ;;  %s2527_s22 = smov [#allocation5]  }
  0x14   :  { %134 = vmatpush1.msra.mxu0 %v55_v3  ;;  %2114 = vmatpush1.msra.mxu1 %v55_v3  ;;  %v57_v12 = vld [vmem:[%s3787_s2 + $0x40] sm:$0xff]  ;;  %v38_v13 = vld [vmem:[%s3786_s1 + $0x8] sm:$0xff]  ;;  %v2631_v17 = vld [vmem:[%s3788_s3 + $0x10] sm:$0xff]  ;;  %v401_v38 = vsub.s32 0, %v2731_v37  ;;  %v549_v51 = vsub.s32 1, %v2731_v37  ;;  %s2063_s16 = sld [smem:[#allocation2 + $0x3]] }
  0x15   :  { %135 = vmatprep.subr.mxu0 %v53_v4  ;;  %2111 = vmatprep.subr.mxu1 %v53_v4  ;;  %v54_v15 = vld [vmem:[%s3787_s2 + $0x28] sm:$0xff]  ;;  %v39_v18 = vld [vmem:[%s3786_s1 + $0x10] sm:$0xff]  ;;  %v48_v19 = vld [vmem:[%s3786_s1 + $0x58] sm:$0xff]  ;;  %s2058_s17 = sld [smem:[#allocation2 + $0x80]]  ;;  %s2006_s23 = sshll.u32 %s2527_s22, 4  ;;  %s2007_s23 = int_to_ptr.vmem [resolvable:$true] %s2006_s23 }
  0x16   :  { %136 = vmatpush1.msra.mxu0 %v52_v5  ;;  %2115 = vmatpush1.msra.mxu1 %v52_v5  ;;  %v51_v20 = vld [vmem:[%s3787_s2 + $0x10] sm:$0xff]  ;;  %v2650_v21 = vld [vmem:[%s3788_s3 + $0x18] sm:$0xff]  ;;  %v2661_v23 = vld [vmem:[%s3788_s3] sm:$0xff]  ;;  %s2060_s2 = sld [smem:[#allocation2 + $0x81]]  ;;  %s2474_s24 = scalar_lea.vmem %s2007_s23, 11520 }
  0x17   :  { %137 = vmatprep.subr.mxu0 %v50_v6  ;;  %2112 = vmatprep.subr.mxu1 %v50_v6  ;;  %v40_v22 = vld [vmem:[%s3786_s1 + $0x18] sm:$0xff]  ;;  %v2668_v24 = vld [vmem:[%s3788_s3 + $0x28] sm:$0xff]  ;;  %v41_v25 = vld [vmem:[%s3786_s1 + $0x20] sm:$0xff]  ;;  %s2062_s18 = sld [smem:[#allocation2 + $0x82]]  ;;  %p2475_p5 = scmp.ne.s32.totalorder %s2007_s23, %s2474_s24 }
  0x18   :  { %138 = vmatpush1.msra.mxu0 %v49_v7  ;;  %2116 = vmatpush1.msra.mxu1 %v49_v7  ;;  %v42_v26 = vld [vmem:[%s3786_s1 + $0x28] sm:$0xff]  ;;  %v43_v28 = vld [vmem:[%s3786_s1 + $0x30] sm:$0xff]  ;;  %v65_v30 = vld [vmem:[%s3788_s3 + $0x20] sm:$0xff]  ;;  %s2064_s19 = sld [smem:[#allocation2 + $0x83]]  ;;  %p2479_p6 = scmp.lt.s32.totalorder %s2007_s23, %s2007_s23 }
  0x19   :  { %171 = vmatprep.mubr.f32.mxu0 %v2521_v11  ;;  %225 = vmatprep.mubr.f32.mxu1 %v2521_v11  ;;  %v62_v27 = vld [vmem:[%s3788_s3 + $0x8] sm:$0xff]  ;;  %v44_v31 = vld [vmem:[%s3786_s1 + $0x38] sm:$0xff]  ;;  %v45_v32 = vld [vmem:[%s3786_s1 + $0x40] sm:$0xff]  ;;  %s2066_s20 = sld [smem:[#allocation2 + $0x84]]  ;;  %p2480_p7 = scmp.lt.s32.totalorder %s2474_s24, %s2474_s24 }
  0x1a   :  { %2034 = vmatmul.mubr.msk.f32.vlgmr.msra.gmra.mxu0 %vm70_vm0, %v37_v8  ;;  %2043 = vmatmul.mubr.msk.f32.vlgmr.msra.gmra.mxu1 %vm70_vm0, %v2599_v9  ;;  %v2737_v39 = vld [vmem:[%s3789_s4] sm:$0x1f]  ;;  %v2742_v40 = vld [vmem:[%s3789_s4 + $0x8] sm:$0x1f]  ;;  %v2747_v41 = vld [vmem:[%s3789_s4 + $0x10] sm:$0x1f] }
  0x1b   :  { %2083 = vmatprep.subr.mxu1 %v60_v10  ;;  %177 = vmatprep.mubr.f32.mxu0 %v2521_v11  ;;  %v2750_v42 = vrot.slane %v2737_v39, %v401_v38  ;;  %v2753_v43 = vrot.slane %v2742_v40, %v401_v38  ;;  %v410_v44 = vrot.slane %v2747_v41, %v401_v38  ;;  %s2897_s4 = sld [smem:[#allocation2]]  ;;  %p2481_p8 = por %p2480_p7, %p2479_p6 }
  0x1c   :  { %2084 = vmatpush3.msra.mxu1 %v60_v10  ;;  %231 = vmatprep.mubr.f32.mxu1 %v2521_v11  ;;  %v2787_v60 = vrot.slane %v2737_v39, %v549_v51  ;;  %v2790_v61 = vrot.slane %v2742_v40, %v549_v51  ;;  %v558_v63 = vrot.slane %v2747_v41, %v549_v51  ;;  %s2065_s21 = sld [smem:[#allocation2 + $0x4]] }
  0x1d   :  { %2085 = vmatprep.subr.mxu1 %v57_v12  ;;  %2129 = vset.pattern.permute.xlu1 %v2522_v16  ;;  %p2482_p9 = pnand %p2481_p8, %p2475_p5 }
  0x1e   :  { %2035 = vmatmul.mubr.msk.f32.gmra.mxu0 %vm70_vm0, %v38_v13  ;;  %2044 = vmatmul.mubr.msk.f32.gmra.mxu1 %vm70_vm0, %v2619_v14 }
  0x1f   :  { %2086 = vmatpush3.msra.mxu1 %v57_v12  ;;  %183 = vmatprep.mubr.f32.mxu0 %v2521_v11 }
  0x20   :  { %2087 = vmatprep.subr.mxu1 %v54_v15  ;;  %237 = vmatprep.mubr.f32.mxu1 %v2521_v11 }
  0x21   :  { %2088 = vmatpush3.msra.mxu1 %v54_v15  ;;  %381 = vperm.xlu1 %2129, %v2631_v17  }
  0x22   :  { %2036 = vmatmul.mubr.msk.f32.gmra.mxu0 %vm70_vm0, %v39_v18  ;;  %2045 = vmatmul.mubr.msk.f32.gmra.mxu1 %vm70_vm0, %v48_v19 }
  0x23   :  { %2089 = vmatprep.subr.mxu1 %v51_v20  ;;  %189 = vmatprep.mubr.f32.mxu0 %v2521_v11 }
  0x24   :  { %2090 = vmatpush3.msra.mxu1 %v51_v20  ;;  %2091 = vmatprep.mubr.msk.f32.mxu1 %vm70_vm0, %v37_v8 }
  0x25   :  { %386 = vperm.xlu1 %2129, %v2650_v21   ;;  %2128 = vset.pattern.permute.xlu0 %v2522_v16 }
  0x26   :  { %2037 = vmatmul.mubr.msk.f32.gmra.mxu0 %vm70_vm0, %v40_v22  ;;  %2092 = vmatmul.mubr.msk.f32.vlgmr.msra.gmra.mxu1 %vm70_vm0, %v38_v13 }
  0x27   :  { %195 = vmatprep.mubr.f32.mxu0 %v2521_v11  ;;  %2094 = vmatprep.mubr.msk.f32.mxu1 %vm70_vm0, %v39_v18 }
  0x28   :  { %371 = vperm.xlu0 %2128, %v2661_v23  }
  0x29   :  { %396 = vperm.xlu1 %2129, %v2668_v24  }
  0x2a   :  { %2038 = vmatmul.mubr.msk.f32.gmra.mxu0 %vm70_vm0, %v41_v25  ;;  %2095 = vmatmul.mubr.msk.f32.gmra.mxu1 %vm70_vm0, %v40_v22 }
  0x2b   :  { %201 = vmatprep.mubr.f32.mxu0 %v2521_v11  ;;  %2097 = vmatprep.mubr.msk.f32.mxu1 %vm70_vm0, %v41_v25 }
  0x2c   :  { %376 = vperm.xlu0 %2128, %v62_v27  }
  0x2d   :  { %2131 = vset.pattern.permute.xlu1 %v2523_v29 }
  0x2e   :  { %2039 = vmatmul.mubr.msk.f32.gmra.mxu0 %vm70_vm0, %v42_v26  ;;  %2098 = vmatmul.mubr.msk.f32.gmra.mxu1 %vm70_vm0, %v42_v26 }
  0x2f   :  { %207 = vmatprep.mubr.f32.mxu0 %v2521_v11  ;;  %2100 = vmatprep.mubr.msk.f32.mxu1 %vm70_vm0, %v43_v28 }
  0x30   :  { %528 = vperm.xlu1 %2131, %v62_v27   ;;  %391 = vperm.xlu0 %2128, %v65_v30  }
  0x32   :  { %2040 = vmatmul.mubr.msk.f32.gmra.mxu0 %vm70_vm0, %v43_v28  ;;  %2101 = vmatmul.mubr.msk.f32.gmra.mxu1 %vm70_vm0, %v44_v31 }
  0x33   :  { %213 = vmatprep.mubr.f32.mxu0 %v2521_v11  ;;  %2103 = vmatprep.mubr.msk.f32.mxu1 %vm70_vm0, %v45_v32 }
  0x34   :  { %532 = vperm.xlu1 %2131, %v2631_v17   ;;  %2130 = vset.pattern.permute.xlu0 %v2523_v29 }
  0x35   :  { %524 = vperm.xlu0 %2130, %v2661_v23  }
  0x36   :  { %2041 = vmatmul.mubr.msk.f32.gmra.mxu0 %vm70_vm0, %v44_v31  ;;  %2104 = vmatmul.mubr.msk.f32.gmra.mxu1 %vm70_vm0, %v2599_v9 }
  0x37   :  { %219 = vmatprep.mubr.f32.mxu0 %v2521_v11  ;;  %2106 = vmatprep.mubr.msk.f32.mxu1 %vm70_vm0, %v2619_v14  ;;  %v878_v14 = vsub.s32 2, %v2731_v37 }
  0x38   :  { %540 = vperm.xlu1 %2131, %v65_v30  }
  0x39   :  { %536 = vperm.xlu0 %2130, %v2650_v21   ;;  %v2842_v22 = vrot.slane %v2742_v40, %v878_v14 }
  0x3a   :  { %2042 = vmatmul.mubr.msk.f32.gmra.mxu0 %vm70_vm0, %v45_v32  ;;  %2107 = vmatmul.mubr.msk.f32.gmra.mxu1 %vm70_vm0, %v48_v19 }
  0x3c   :  { %2132 = vset.pattern.permute.xlu1 %v2524_v33 }
  0x3d   :  { %853 = vperm.xlu1 %2132, %v2661_v23   ;;  %544 = vperm.xlu0 %2130, %v2668_v24  }
  0x41   :  { %861 = vperm.xlu1 %2132, %v2631_v17   ;;  %2133 = vset.pattern.permute.xlu0 %v2524_v33 }
  0x42   :  { %857 = vperm.xlu0 %2133, %v62_v27  }
  0x45   :  { %865 = vperm.xlu1 %2132, %v2650_v21  }
  0x46   :  { %869 = vperm.xlu0 %2133, %v65_v30  }
  0x49   :  { %873 = vperm.xlu1 %2132, %v2668_v24  }
  0x4a   :  { %2134 = vset.pattern.permute.xlu0 %v2525_v34 }
  0x4b   :  { %1218 = vperm.xlu0 %2134, %v2661_v23  }
  0x4d   :  { %2135 = vset.pattern.permute.xlu1 %v2525_v34 }
  0x4e   :  { %1222 = vperm.xlu1 %2135, %v62_v27  }
  0x4f   :  { %1230 = vperm.xlu0 %2134, %v2650_v21  }
  0x52   :  { %1226 = vperm.xlu1 %2135, %v2631_v17  }
  0x53   :  { %1238 = vperm.xlu0 %2134, %v2668_v24  }
  0x56   :  { %1234 = vperm.xlu1 %2135, %v65_v30  }
  0x57   :  { %2137 = vset.pattern.permute.xlu0 %v2526_v35 }
  0x58   :  { %1587 = vperm.xlu0 %2137, %v62_v27  }
  0x5a   :  { %2136 = vset.pattern.permute.xlu1 %v2526_v35 }
  0x5b   :  { %1583 = vperm.xlu1 %2136, %v2661_v23   ;;  %v887_v23 = vrot.slane %v2747_v41, %v878_v14 }
  0x5c   :  { %1599 = vperm.xlu0 %2137, %v65_v30  }
  0x5f   :  { %1591 = vperm.xlu1 %2136, %v2631_v17  }
  0x63   :  { %1595 = vperm.xlu1 %2136, %v2650_v21   ;;  %v2839_v21 = vrot.slane %v2737_v39, %v878_v14 }
  0x67   :  { %1603 = vperm.xlu1 %2136, %v2668_v24  }
  0x9c   :  { %v382_v45 = vpop.permute.xlu1 %381 }
  0x9d   :  { %v2757_v46 = vadd.f32 %v2750_v42, %v382_v45  ;;  %v2760_v47 = vadd.f32 %v2753_v43, %v382_v45  ;;  %v2762_v48 = vadd.f32 %v410_v44, %v382_v45 }
  0x9f   :  { %3802 = vst [vmem:[#allocation11_spill] sm:$0xff] %v2760_v47  ;;  %3803 = vst [vmem:[#allocation12_spill] sm:$0xff] %v2762_v48 }
  0xa0   :  { %v2764_v49 = vpop.permute.xlu1 %386 }
  0xa1   :  { %v2767_v50 = vadd.f32 %v410_v44, %v2764_v49 }
  0xa3   :  { %3804 = vst [vmem:[#allocation13_spill] sm:$0xff] %v2767_v50  ;;  %v372_v52 = vpop.permute.xlu0 %371  ;;  %v2981_v50 = vadd.f32 %v2753_v43, %v2764_v49 }
  0xa4   :  { %v397_v53 = vpop.permute.xlu1 %396  ;;  %v2771_v54 = vadd.f32 %v2750_v42, %v372_v52  ;;  %v2774_v55 = vadd.f32 %v2753_v43, %v372_v52  ;;  %v2776_v56 = vadd.f32 %v410_v44, %v372_v52  ;;  %v1243_v52 = vsub.s32 3, %v2731_v37 }
  0xa5   :  { %v2779_v57 = vadd.f32 %v2750_v42, %v397_v53  ;;  %v2782_v58 = vadd.f32 %v2753_v43, %v397_v53  ;;  %v2784_v59 = vadd.f32 %v410_v44, %v397_v53  ;;  %3838 = vst [vmem:[#allocation47_spill] sm:$0xff] %v2981_v50 }
  0xa6   :  { %3805 = vst [vmem:[#allocation14_spill] sm:$0xff] %v2776_v56 }
  0xa7   :  { %3806 = vst [vmem:[#allocation15_spill] sm:$0xff] %v2779_v57  ;;  %3807 = vst [vmem:[#allocation16_spill] sm:$0xff] %v2782_v58  ;;  %v377_v62 = vpop.permute.xlu0 %376  ;;  %v2943_v57 = vstv %s2897_s4 }
  0xa8   :  { %3808 = vst [vmem:[#allocation17_spill] sm:$0xff] %v2784_v59  ;;  %v2794_v0 = vadd.f32 %v2750_v42, %v377_v62  ;;  %v2797_v1 = vadd.f32 %v2753_v43, %v377_v62  ;;  %v2799_v2 = vadd.f32 %v410_v44, %v377_v62 }
  0xab   :  { %v529_v3 = vpop.permute.xlu1 %528  ;;  %v2801_v4 = vpop.permute.xlu0 %391 }
  0xac   :  { %v2804_v5 = vadd.f32 %v2787_v60, %v529_v3  ;;  %v2807_v6 = vadd.f32 %v2790_v61, %v529_v3  ;;  %v2809_v7 = vadd.f32 %v558_v63, %v529_v3  ;;  %v2812_v8 = vadd.f32 %v410_v44, %v2801_v4 }
  0xae   :  { %3809 = vst [vmem:[#allocation18_spill] sm:$0xff] %v2812_v8 }
  0xaf   :  { %v533_v9 = vpop.permute.xlu1 %532 }
  0xb0   :  { %v2815_v10 = vadd.f32 %v2787_v60, %v533_v9  ;;  %v2818_v11 = vadd.f32 %v2790_v61, %v533_v9  ;;  %v2820_v12 = vadd.f32 %v558_v63, %v533_v9  ;;  %v525_v13 = vpop.permute.xlu0 %524  ;;  %v2892_v9 = vrot.slane %v2737_v39, %v1243_v52 }
  0xb1   :  { %v2824_v15 = vadd.f32 %v2787_v60, %v525_v13  ;;  %v2827_v16 = vadd.f32 %v2790_v61, %v525_v13  ;;  %v2829_v17 = vadd.f32 %v558_v63, %v525_v13  ;;  %v2895_v13 = vrot.slane %v2742_v40, %v1243_v52 }
  0xb2   :  { %3810 = vst [vmem:[#allocation19_spill] sm:$0xff] %v2818_v11  ;;  %3811 = vst [vmem:[#allocation20_spill] sm:$0xff] %v2820_v12  ;;  %v2948_v12 = vstv %s2061_s15 }
  0xb3   :  { %3812 = vst [vmem:[#allocation21_spill] sm:$0xff] %v2829_v17  ;;  %v2831_v18 = vpop.permute.xlu1 %540 }
  0xb4   :  { %v2834_v19 = vadd.f32 %v558_v63, %v2831_v18  ;;  %v2836_v20 = vpop.permute.xlu0 %536 }
  0xb5   :  { %v2846_v24 = vadd.f32 %v558_v63, %v2836_v20 }
  0xb6   :  { %3813 = vst [vmem:[#allocation22_spill] sm:$0xff] %v2834_v19 }
  0xb7   :  { %3814 = vst [vmem:[#allocation23_spill] sm:$0xff] %v2846_v24  ;;  %v2975_v24 = vstv %s2066_s20 }
  0xb8   :  { %v854_v25 = vpop.permute.xlu1 %853  ;;  %v545_v26 = vpop.permute.xlu0 %544  ;;  %3837 = vst [vmem:[#allocation46_spill] sm:$0xff] %v2975_v24 }
  0xb9   :  { %v2849_v27 = vadd.f32 %v2839_v21, %v854_v25  ;;  %v2852_v28 = vadd.f32 %v2842_v22, %v854_v25  ;;  %v2854_v29 = vadd.f32 %v887_v23, %v854_v25  ;;  %v2857_v30 = vadd.f32 %v2787_v60, %v545_v26 }
  0xba   :  { %v2860_v31 = vadd.f32 %v2790_v61, %v545_v26  ;;  %v2862_v32 = vadd.f32 %v558_v63, %v545_v26 }
  0xbb   :  { %3815 = vst [vmem:[#allocation24_spill] sm:$0xff] %v2854_v29  ;;  %3816 = vst [vmem:[#allocation25_spill] sm:$0xff] %v2857_v30  ;;  %v3005_v29 = vadd.f32 %v2790_v61, %v2836_v20 }
  0xbc   :  { %3817 = vst [vmem:[#allocation26_spill] sm:$0xff] %v2860_v31  ;;  %3818 = vst [vmem:[#allocation27_spill] sm:$0xff] %v2862_v32  ;;  %v862_v33 = vpop.permute.xlu1 %861  ;;  %v1608_v32 = vsub.s32 4, %v2731_v37 }
  0xbd   :  { %v2865_v34 = vadd.f32 %v2839_v21, %v862_v33  ;;  %v2868_v35 = vadd.f32 %v2842_v22, %v862_v33  ;;  %v2870_v36 = vadd.f32 %v887_v23, %v862_v33  ;;  %v858_v38 = vpop.permute.xlu0 %857  ;;  %3843 = vst [vmem:[#allocation52_spill] sm:$0xff] %v3005_v29 }
  0xbe   :  { %v2873_v44 = vadd.f32 %v2839_v21, %v858_v38  ;;  %v2876_v45 = vadd.f32 %v2842_v22, %v858_v38  ;;  %v2878_v51 = vadd.f32 %v887_v23, %v858_v38  ;;  %v1252_v38 = vrot.slane %v2747_v41, %v1243_v52 }
  0xbf   :  { %3819 = vst [vmem:[#allocation28_spill] sm:$0xff] %v2868_v35  ;;  %3820 = vst [vmem:[#allocation29_spill] sm:$0xff] %v2870_v36  ;;  %v2946_v36 = vstv %s2899_s14  ;;  %v2957_v37 = vrot.slane %v2737_v39, %v1608_v32  ;;  %v2977_v39 = vstv %s2065_s21 }
  0xc0   :  { %v2881_v53 = vpop.permute.xlu1 %865 }
  0xc1   :  { %v2884_v62 = vadd.f32 %v887_v23, %v2881_v53  ;;  %v2886_v63 = vpop.permute.xlu0 %869 }
  0xc2   :  { %v2889_v3 = vadd.f32 %v887_v23, %v2886_v63 }
  0xc3   :  { %3821 = vst [vmem:[#allocation30_spill] sm:$0xff] %v2884_v62 }
  0xc4   :  { %3822 = vst [vmem:[#allocation31_spill] sm:$0xff] %v2889_v3  ;;  %v874_v14 = vpop.permute.xlu1 %873 }
  0xc5   :  { %v2902_v25 = vadd.f32 %v2839_v21, %v874_v14  ;;  %v2905_v26 = vadd.f32 %v2842_v22, %v874_v14  ;;  %v2907_v33 = vadd.f32 %v887_v23, %v874_v14 }
  0xc6   :  { %v1219_v3 = vpop.permute.xlu0 %1218 }
  0xc7   :  { %3823 = vst [vmem:[#allocation32_spill] sm:$0xff] %v2902_v25  ;;  %3824 = vst [vmem:[#allocation33_spill] sm:$0xff] %v2905_v26  ;;  %v2911_v19 = vadd.f32 %v2892_v9, %v1219_v3  ;;  %v2914_v8 = vadd.f32 %v2895_v13, %v1219_v3  ;;  %v2916_v35 = vadd.f32 %v1252_v38, %v1219_v3 }
  0xc8   :  { %3825 = vst [vmem:[#allocation34_spill] sm:$0xff] %v2907_v33 }
  0xc9   :  { %3826 = vst [vmem:[#allocation35_spill] sm:$0xff] %v2916_v35  ;;  %v1223_v11 = vpop.permute.xlu1 %1222  ;;  %v2997_v35 = vadd.f32 %v2790_v61, %v2831_v18 }
  0xca   :  { %v2919_v23 = vadd.f32 %v2892_v9, %v1223_v11  ;;  %v2922_v52 = vadd.f32 %v2895_v13, %v1223_v11  ;;  %v2924_v14 = vadd.f32 %v1252_v38, %v1223_v11  ;;  %v1231_v47 = vpop.permute.xlu0 %1230 }
  0xcb   :  { %v2926_v26 = vadd.f32 %v1252_v38, %v1231_v47  ;;  %3842 = vst [vmem:[#allocation51_spill] sm:$0xff] %v2997_v35  ;;  %v3024_v61 = vadd.f32 %v2892_v9, %v1231_v47 }
  0xcd   :  { %3827 = vst [vmem:[#allocation36_spill] sm:$0xff] %v2926_v26  ;;  %v1227_v3 = vpop.permute.xlu1 %1226  ;;  %v2967_v26 = vrot.slane %v2747_v41, %v1608_v32  ;;  %v2989_v41 = vadd.f32 %v2750_v42, %v2801_v4 }
  0xce   :  { %v2929_v31 = vadd.f32 %v2892_v9, %v1227_v3  ;;  %v2932_v58 = vadd.f32 %v2895_v13, %v1227_v3  ;;  %v2934_v33 = vadd.f32 %v1252_v38, %v1227_v3  ;;  %v1239_v11 = vpop.permute.xlu0 %1238  ;;  %v2954_v3 = vstv %s2058_s17 }
  0xcf   :  { %v2938_v59 = vadd.f32 %v2895_v13, %v1239_v11  ;;  %v2940_v25 = vadd.f32 %v1252_v38, %v1239_v11  ;;  %3833 = vst [vmem:[#allocation42_spill] sm:$0xff] %v2954_v3  ;;  %3840 = vst [vmem:[#allocation49_spill] sm:$0xff] %v2989_v41 }
  0xd0   :  { %3828 = vst [vmem:[#allocation37_spill] sm:$0xff] %v2932_v58  ;;  %3829 = vst [vmem:[#allocation38_spill] sm:$0xff] %v2934_v33  ;;  %v2952_v58 = vstv %s2063_s16  ;;  %v2959_v33 = vstv %s2060_s2 }
  0xd1   :  { %3830 = vst [vmem:[#allocation39_spill] sm:$0xff] %v2938_v59  ;;  %3831 = vst [vmem:[#allocation40_spill] sm:$0xff] %v2940_v25  ;;  %v1235_v30 = vpop.permute.xlu1 %1234  ;;  %v2961_v59 = vstv %s2062_s18  ;;  %v2964_v25 = vrot.slane %v2742_v40, %v1608_v32  ;;  %v2985_v40 = vadd.f32 %v2787_v60, %v2831_v18  ;;  %v2993_v32 = vadd.f32 %v2753_v43, %v2801_v4 }
  0xd2   :  { %v2950_v48 = vadd.f32 %v1252_v38, %v1235_v30  ;;  %3834 = vst [vmem:[#allocation43_spill] sm:$0xff] %v2959_v33  ;;  %3835 = vst [vmem:[#allocation44_spill] sm:$0xff] %v2961_v59  ;;  %v2971_v38 = vadd.f32 %v2750_v42, %v2764_v49  ;;  %v3001_v49 = vadd.f32 %v2787_v60, %v2836_v20 }
  0xd3   :  { %v1588_v62 = vpop.permute.xlu0 %1587  ;;  %3839 = vst [vmem:[#allocation48_spill] sm:$0xff] %v2985_v40  ;;  %3841 = vst [vmem:[#allocation50_spill] sm:$0xff] %v2993_v32  ;;  %v3009_v42 = vadd.f32 %v2839_v21, %v2881_v53  ;;  %v3013_v43 = vadd.f32 %v2842_v22, %v2881_v53  ;;  %v3017_v4 = vadd.f32 %v2839_v21, %v2886_v63 }
  0xd4   :  { %3832 = vst [vmem:[#allocation41_spill] sm:$0xff] %v2950_v48  ;;  %v2973_v48 = vstv %s2064_s19  ;;  %v3021_v60 = vadd.f32 %v2842_v22, %v2886_v63  ;;  %v3027_v20 = vadd.f32 %v2892_v9, %v1235_v30  ;;  %v3030_v35 = vadd.f32 %v2895_v13, %v1235_v30 }
  0xd5   :  { %3836 = vst [vmem:[#allocation45_spill] sm:$0xff] %v2973_v48  ;;  %3844 = vst [vmem:[#allocation53_spill] sm:$0xff] %v3013_v43  ;;  %v3033_v53 = vadd.f32 %v2895_v13, %v1231_v47  ;;  %v3036_v21 = vadd.f32 %v2892_v9, %v1239_v11  ;;  %v3040_v22 = vadd.f32 %v2957_v37, %v1588_v62 }
  0xd6   :  { %v1584_v40 = vpop.permute.xlu1 %1583  ;;  %3845 = vst [vmem:[#allocation54_spill] sm:$0xff] %v3017_v4  ;;  %3846 = vst [vmem:[#allocation55_spill] sm:$0xff] %v3021_v60  ;;  %v3043_v63 = vadd.f32 %v2964_v25, %v1588_v62  ;;  %v3046_v60 = vadd.f32 %v2967_v26, %v1588_v62 }
  0xd7   :  { %v1600_v18 = vpop.permute.xlu0 %1599  ;;  %3847 = vst [vmem:[#allocation56_spill] sm:$0xff] %v3027_v20  ;;  %3848 = vst [vmem:[#allocation57_spill] sm:$0xff] %v3030_v35  ;;  %v1618_v32 = vadd.f32 %v2957_v37, %v1584_v40  ;;  %v1619_v35 = vadd.f32 %v2964_v25, %v1584_v40  ;;  %v3050_v47 = vadd.f32 %v2967_v26, %v1584_v40 }
  0xd8   :  { %3849 = vst [vmem:[#allocation58_spill] sm:$0xff] %v3033_v53  ;;  %3850 = vst [vmem:[#allocation59_spill] sm:$0xff] %v3036_v21  ;;  %v3053_v9 = vadd.f32 %v2957_v37, %v1600_v18  ;;  %v3056_v13 = vadd.f32 %v2964_v25, %v1600_v18 }
  0xd9   :  { %3851 = vst [vmem:[#allocation60_spill] sm:$0xff] %v3046_v60  ;;  %3852 = vst [vmem:[#allocation61_spill] sm:$0xff] %v3050_v47 }
  0xda   :  { %v173_v20 = vpop.f32.mrf.mxu0  ;;  %v227_v30 = vpop.f32.mrf.mxu1  ;;  %3853 = vst [vmem:[#allocation62_spill] sm:$0xff] %v3053_v9  ;;  %3854 = vst [vmem:[#allocation63_spill] sm:$0xff] %v3056_v13  ;;  %v3072_v13 = vadd.f32 %v2967_v26, %v1600_v18 }
  0xdb   :  { %v431_v11 = vmul.f32 %v2943_v57, %v173_v20  ;;  %v579_v21 = vmul.f32 %v2946_v36, %v173_v20  ;;  %v908_v62 = vmul.f32 %v2948_v12, %v173_v20  ;;  %v1273_v4 = vmul.f32 %v2952_v58, %v173_v20 }
  0xdc   :  { %v3063_v41 = vmul.f32 %v2954_v3, %v227_v30  ;;  %v3066_v40 = vmul.f32 %v2959_v33, %v227_v30  ;;  %v3069_v47 = vmul.f32 %v2961_v59, %v227_v30  ;;  %v175_v9 = vpop.f32.mrf.mxu0  ;;  %v229_v17 = vpop.f32.mrf.mxu1  ;;  %3855 = vst [vmem:[#allocation64_spill] sm:$0xff] %v3072_v13  ;;  %v3087_v29 = vmul.f32 %v2973_v48, %v227_v30 }
  0xdd   :  { %v3075_v56 = vadd.f32 %v431_v11, %v2771_v54  ;;  %v3078_v60 = vadd.f32 %v579_v21, %v2824_v15  ;;  %v3081_v53 = vadd.f32 %v908_v62, %v2849_v27  ;;  %v3084_v43 = vadd.f32 %v1273_v4, %v2911_v19 }
  0xde   :  { %v1638_v50 = vmul.f32 %v2977_v39, %v173_v20  ;;  %v432_v18 = vmul.f32 %v2943_v57, %v175_v9  ;;  %v580_v13 = vmul.f32 %v2946_v36, %v175_v9  ;;  %v179_v54 = vpop.f32.mrf.mxu0  ;;  %v3093_v11 = vmul.f32 %v2975_v24, %v227_v30 }
  0xdf   :  { %3856 = vst [vmem:[#allocation65_spill] sm:$0xff] %v3075_v56  ;;  %3857 = vst [vmem:[#allocation66_spill] sm:$0xff] %v3078_v60  ;;  %v909_v15 = vmul.f32 %v2948_v12, %v175_v9  ;;  %v1274_v27 = vmul.f32 %v2952_v58, %v175_v9  ;;  %v1639_v19 = vmul.f32 %v2977_v39, %v175_v9 }
  0xe0   :  { %3858 = vst [vmem:[#allocation67_spill] sm:$0xff] %v3081_v53  ;;  %3859 = vst [vmem:[#allocation68_spill] sm:$0xff] %v3084_v43  ;;  %v3098_v4 = vadd.f32 %v1638_v50, %v1618_v32  ;;  %v3101_v21 = vadd.f32 %v432_v18, %v2774_v55  ;;  %v3104_v20 = vadd.f32 %v580_v13, %v2827_v16  ;;  %v233_v43 = vpop.f32.mrf.mxu1 }
  0xe1   :  { %v3107_v62 = vmul.f32 %v2954_v3, %v229_v17  ;;  %v3110_v30 = vadd.f32 %v909_v15, %v2852_v28  ;;  %v3113_v53 = vadd.f32 %v1274_v27, %v2914_v8  ;;  %v3115_v60 = vadd.f32 %v1639_v19, %v1619_v35  ;;  %v181_v28 = vpop.f32.mrf.mxu0 }
  0xe2   :  { %3860 = vst [vmem:[#allocation69_spill] sm:$0xff] %v3098_v4  ;;  %3861 = vst [vmem:[#allocation70_spill] sm:$0xff] %v3101_v21  ;;  %v3118_v50 = vmul.f32 %v2959_v33, %v229_v17  ;;  %v3121_v55 = vmul.f32 %v2961_v59, %v229_v17  ;;  %v3124_v16 = vmul.f32 %v2973_v48, %v229_v17 }
  0xe3   :  { %3862 = vst [vmem:[#allocation71_spill] sm:$0xff] %v3104_v20  ;;  %3863 = vst [vmem:[#allocation72_spill] sm:$0xff] %v3110_v30  ;;  %v434_v32 = vmul.f32 %v2943_v57, %v179_v54  ;;  %v582_v9 = vmul.f32 %v2946_v36, %v179_v54  ;;  %v3129_v13 = vmul.f32 %v2975_v24, %v229_v17  ;;  %v235_v17 = vpop.f32.mrf.mxu1 }
  0xe4   :  { %3864 = vst [vmem:[#allocation73_spill] sm:$0xff] %v3113_v53  ;;  %3865 = vst [vmem:[#allocation74_spill] sm:$0xff] %v3115_v60  ;;  %v911_v8 = vmul.f32 %v2948_v12, %v179_v54  ;;  %v1276_v35 = vmul.f32 %v2952_v58, %v179_v54  ;;  %v3134_v18 = vmul.f32 %v2954_v3, %v233_v43 }
  0xe5   :  { %v3137_v15 = vadd.f32 %v434_v32, %v2794_v0  ;;  %v3140_v27 = vadd.f32 %v582_v9, %v2804_v5  ;;  %v3143_v19 = vmul.f32 %v2959_v33, %v233_v43  ;;  %v3146_v60 = vmul.f32 %v2961_v59, %v233_v43 }
  0xe6   :  { %v3149_v53 = vadd.f32 %v911_v8, %v2873_v44  ;;  %v3152_v30 = vadd.f32 %v1276_v35, %v2919_v23  ;;  %v3155_v20 = vmul.f32 %v2973_v48, %v233_v43  ;;  %v1641_v0 = vmul.f32 %v2977_v39, %v179_v54  ;;  %v1592_v54 = vpop.permute.xlu1 %1591 }
  0xe7   :  { %3866 = vst [vmem:[#allocation75_spill] sm:$0xff] %v3137_v15  ;;  %3867 = vst [vmem:[#allocation76_spill] sm:$0xff] %v3140_v27  ;;  %v435_v5 = vmul.f32 %v2943_v57, %v181_v28  ;;  %v583_v32 = vmul.f32 %v2946_v36, %v181_v28  ;;  %v912_v9 = vmul.f32 %v2948_v12, %v181_v28  ;;  %v185_v15 = vpop.f32.mrf.mxu0 }
  0xe8   :  { %3868 = vst [vmem:[#allocation77_spill] sm:$0xff] %v3149_v53  ;;  %3869 = vst [vmem:[#allocation78_spill] sm:$0xff] %v3152_v30  ;;  %v1277_v27 = vmul.f32 %v2952_v58, %v181_v28  ;;  %v3163_v44 = vmul.f32 %v2975_v24, %v233_v43  ;;  %v3166_v23 = vadd.f32 %v1641_v0, %v3040_v22  ;;  %v239_v22 = vpop.f32.mrf.mxu1 }
  0xe9   :  { %v1642_v8 = vmul.f32 %v2977_v39, %v181_v28  ;;  %v3170_v35 = vmul.f32 %v2954_v3, %v235_v17  ;;  %v3173_v30 = vadd.f32 %v435_v5, %v2797_v1  ;;  %v3176_v53 = vadd.f32 %v583_v32, %v2807_v6 }
  0xea   :  { %3870 = vst [vmem:[#allocation79_spill] sm:$0xff] %v3166_v23  ;;  %v3179_v21 = vadd.f32 %v912_v9, %v2876_v45  ;;  %v3182_v43 = vadd.f32 %v1277_v27, %v2922_v52  ;;  %v3188_v28 = vmul.f32 %v2959_v33, %v235_v17  ;;  %v3191_v23 = vmul.f32 %v2961_v59, %v235_v17  ;;  %v187_v27 = vpop.f32.mrf.mxu0 }
  0xeb   :  { %3871 = vst [vmem:[#allocation80_spill] sm:$0xff] %v3173_v30  ;;  %3872 = vst [vmem:[#allocation81_spill] sm:$0xff] %v3176_v53  ;;  %v3185_v0 = vadd.f32 %v1642_v8, %v3043_v63  ;;  %v3194_v1 = vmul.f32 %v2973_v48, %v235_v17  ;;  %v3197_v6 = vmul.f32 %v2975_v24, %v235_v17 }
  0xec   :  { %3873 = vst [vmem:[#allocation82_spill] sm:$0xff] %v3179_v21  ;;  %3874 = vst [vmem:[#allocation83_spill] sm:$0xff] %v3182_v43  ;;  %v1624_v45 = vadd.f32 %v2957_v37, %v1592_v54  ;;  %v3201_v52 = vadd.f32 %v2964_v25, %v1592_v54  ;;  %v437_v63 = vmul.f32 %v2943_v57, %v185_v15  ;;  %v241_v21 = vpop.f32.mrf.mxu1 }
  0xed   :  { %3875 = vst [vmem:[#allocation84_spill] sm:$0xff] %v3185_v0  ;;  %v585_v5 = vmul.f32 %v2946_v36, %v185_v15  ;;  %v914_v32 = vmul.f32 %v2948_v12, %v185_v15  ;;  %v1279_v9 = vmul.f32 %v2952_v58, %v185_v15  ;;  %v1644_v8 = vmul.f32 %v2977_v39, %v185_v15 }
  0xee   :  { %3876 = vst [vmem:[#allocation85_spill] sm:$0xff] %v3201_v52  ;;  %v3209_v0 = vadd.f32 %v2967_v26, %v1592_v54  ;;  %v3212_v17 = vadd.f32 %v437_v63, %v2757_v46  ;;  %v3215_v43 = vmul.f32 %v2954_v3, %v239_v22  ;;  %v3218_v52 = vmul.f32 %v2959_v33, %v239_v22 }
  0xef   :  { %v3221_v53 = vadd.f32 %v585_v5, %v2815_v10  ;;  %v3224_v30 = vadd.f32 %v914_v32, %v2865_v34  ;;  %v3227_v15 = vadd.f32 %v1279_v9, %v2929_v31  ;;  %v3229_v54 = vadd.f32 %v1644_v8, %v1624_v45  ;;  %v1596_v5 = vpop.permute.xlu1 %1595  ;;  %v191_v34 = vpop.f32.mrf.mxu0 }
  0xf0   :  { %3877 = vst [vmem:[#allocation86_spill] sm:$0xff] %v3212_v17  ;;  %v3232_v46 = vmul.f32 %v2961_v59, %v239_v22  ;;  %v3235_v63 = vmul.f32 %v2973_v48, %v239_v22  ;;  %v3238_v17 = vmul.f32 %v2975_v24, %v239_v22  ;;  %v3241_v10 = vmul.f32 %v2943_v57, %v187_v27 }
  0xf1   :  { %3878 = vst [vmem:[#allocation87_spill] sm:$0xff] %v3221_v53  ;;  %3879 = vst [vmem:[#allocation88_spill] sm:$0xff] %v3224_v30  ;;  %v3244_v32 = vmul.f32 %v2946_v36, %v187_v27  ;;  %v3247_v31 = vmul.f32 %v2948_v12, %v187_v27  ;;  %v3250_v45 = vmul.f32 %v2952_v58, %v187_v27 }
  0xf2   :  { %3880 = vst [vmem:[#allocation89_spill] sm:$0xff] %v3227_v15  ;;  %3881 = vst [vmem:[#allocation90_spill] sm:$0xff] %v3229_v54  ;;  %v3253_v9 = vmul.f32 %v2977_v39, %v187_v27  ;;  %v3256_v22 = vmul.f32 %v2954_v3, %v241_v21  ;;  %v3259_v8 = vmul.f32 %v2959_v33, %v241_v21  ;;  %v2093_v54 = vpop.f32.mrf.mxu1 }
  0xf3   :  { %3882 = vst [vmem:[#allocation91_spill] sm:$0xff] %v3241_v10  ;;  %3883 = vst [vmem:[#allocation92_spill] sm:$0xff] %v3244_v32  ;;  %v3262_v10 = vmul.f32 %v2961_v59, %v241_v21  ;;  %v3265_v32 = vmul.f32 %v2973_v48, %v241_v21  ;;  %v1628_v27 = vadd.f32 %v2964_v25, %v1596_v5 }
  0xf4   :  { %3884 = vst [vmem:[#allocation93_spill] sm:$0xff] %v3247_v31  ;;  %3885 = vst [vmem:[#allocation94_spill] sm:$0xff] %v3250_v45  ;;  %v3268_v31 = vmul.f32 %v2975_v24, %v241_v21  ;;  %v1627_v45 = vadd.f32 %v2957_v37, %v1596_v5  ;;  %v588_v15 = vmul.f32 %v2946_v36, %v191_v34 }
  0xf5   :  { %3886 = vst [vmem:[#allocation95_spill] sm:$0xff] %v3253_v9  ;;  %3887 = vst [vmem:[#allocation96_spill] sm:$0xff] %v3259_v8  ;;  %v440_v9 = vmul.f32 %v2943_v57, %v191_v34  ;;  %v917_v30 = vmul.f32 %v2948_v12, %v191_v34  ;;  %v1282_v53 = vmul.f32 %v2952_v58, %v191_v34 }
  0xf6   :  { %3888 = vst [vmem:[#allocation97_spill] sm:$0xff] %v3262_v10  ;;  %3889 = vst [vmem:[#allocation98_spill] sm:$0xff] %v3265_v32  ;;  %v1647_v4 = vmul.f32 %v2977_v39, %v191_v34  ;;  %v436_v59 = vmul.f32 %v2093_v54, %v2943_v57  ;;  %v584_v21 = vmul.f32 %v2093_v54, %v2946_v36  ;;  %v193_v32 = vpop.f32.mrf.mxu0 }
  0xf7   :  { %3890 = vst [vmem:[#allocation99_spill] sm:$0xff] %v3268_v31  ;;  %v458_v48 = vadd.f32 %v440_v9, %v2971_v38  ;;  %v913_v24 = vmul.f32 %v2093_v54, %v2948_v12  ;;  %v606_v56 = vadd.f32 %v588_v15, %v3001_v49  ;;  %v935_v33 = vadd.f32 %v917_v30, %v3009_v42  ;;  %v3896_v15 = vld [vmem:[#allocation53_spill] sm:$0xff] }
  0xf8   :  { %v1300_v3 = vadd.f32 %v1282_v53, %v3024_v61  ;;  %v1665_v31 = vadd.f32 %v1647_v4, %v1627_v45  ;;  %v3285_v10 = vadd.f32 %v2967_v26, %v1596_v5  ;;  %v3289_v38 = vadd.f32 %v436_v59, %v2799_v2 }
  0xf9   :  { %v496_v34 = vadd.f32 %v3063_v41, %v458_v48  ;;  %v3292_v9 = vadd.f32 %v584_v21, %v2809_v7  ;;  %v644_v8 = vadd.f32 %v3066_v40, %v606_v56  ;;  %v973_v49 = vadd.f32 %v3069_v47, %v935_v33  ;;  %v3895_v47 = vld [vmem:[#allocation52_spill] sm:$0xff]  ;;  %v3897_v21 = vld [vmem:[#allocation58_spill] sm:$0xff] }
  0xfa   :  { %v1338_v42 = vadd.f32 %v3087_v29, %v1300_v3  ;;  %v3298_v61 = vadd.f32 %v3093_v11, %v1665_v31  ;;  %v3301_v53 = vadd.f32 %v913_v24, %v2878_v51  ;;  %v1278_v48 = vmul.f32 %v2093_v54, %v2952_v58  ;;  %v3894_v3 = vld [vmem:[#allocation47_spill] sm:$0xff] }
  0xfb   :  { %3891 = vst [vmem:[#allocation100_spill] sm:$0xff] %v3292_v9  ;;  %514 = vst [vmem:[#allocation5 + $0x48] sm:$0xff] %v496_v34  ;;  %v441_v59 = vmul.f32 %v2943_v57, %v193_v32  ;;  %v589_v2 = vmul.f32 %v2946_v36, %v193_v32  ;;  %v681_v7 = vmax.f32 %v496_v34, %v644_v8 }
  0xfc   :  { %3892 = vst [vmem:[#allocation101_spill] sm:$0xff] %v3301_v53  ;;  %663 = vst [vmem:[#allocation5 + $0xd8] sm:$0xff] %v644_v8  ;;  %v918_v56 = vmul.f32 %v2948_v12, %v193_v32  ;;  %v1283_v29 = vmul.f32 %v2952_v58, %v193_v32  ;;  %v1648_v33 = vmul.f32 %v2977_v39, %v193_v32 }
  0xfd   :  { %992 = vst [vmem:[#allocation5 + $0x168] sm:$0xff] %v973_v49  ;;  %1357 = vst [vmem:[#allocation5 + $0x1f8] sm:$0xff] %v1338_v42  ;;  %v3311_v24 = vadd.f32 %v1278_v48, %v2924_v14  ;;  %v1643_v51 = vmul.f32 %v2093_v54, %v2977_v39  ;;  %v459_v41 = vadd.f32 %v441_v59, %v3894_v3 }
  0xfe   :  { %1722 = vst [vmem:[#allocation5 + $0x288] sm:$0xff] %v3298_v61  ;;  %v607_v40 = vadd.f32 %v589_v2, %v3895_v47  ;;  %v699_v11 = vsub.f32 %v496_v34, %v681_v7  ;;  %v753_v4 = vsub.f32 %v644_v8, %v681_v7  ;;  %v1010_v30 = vmax.f32 %v681_v7, %v973_v49 }
  0xff   :  { %3893 = vst [vmem:[#allocation102_spill] sm:$0xff] %v3311_v24  ;;  %v936_v5 = vadd.f32 %v918_v56, %v3896_v15  ;;  %v497_v31 = vadd.f32 %v3107_v62, %v459_v41  ;;  %v1301_v32 = vadd.f32 %v1283_v29, %v3897_v21  ;;  %v1666_v53 = vadd.f32 %v1648_v33, %v1628_v27 }
 0x100   :  { %v645_v45 = vadd.f32 %v3118_v50, %v607_v40  ;;  %v726_v14 = vmul.f32 1.442695, %v699_v11  ;;  %v780_v48 = vmul.f32 1.442695, %v753_v4  ;;  %v1028_v24 = vsub.f32 %v681_v7, %v1010_v30 }
 0x101   :  { %v1082_v54 = vsub.f32 %v973_v49, %v1010_v30  ;;  %v1375_v9 = vmax.f32 %v1010_v30, %v1338_v42  ;;  %515 = vst [vmem:[#allocation5 + $0x50] sm:$0xff] %v497_v31  ;;  %v974_v8 = vadd.f32 %v3121_v55, %v936_v5  ;;  %v1339_v34 = vadd.f32 %v3124_v16, %v1301_v32 }
 0x102   :  { %664 = vst [vmem:[#allocation5 + $0xe0] sm:$0xff] %v645_v45  ;;  %v682_v59 = vmax.f32 %v497_v31, %v645_v45  ;;  %2138 = vpow2.f32 %v726_v14  ;;  %v1055_v2 = vmul.f32 1.442695, %v1028_v24  ;;  %v1704_v50 = vadd.f32 %v3129_v13, %v1666_v53  ;;  %v310_v24 = vpop.f32.mrf.mxu1  ;;  %v3898_v13 = vld [vmem:[#allocation60_spill] sm:$0xff]  ;;  %v3899_v14 = vld [vmem:[#allocation14_spill] sm:$0xff] }
 0x103   :  { %v1109_v62 = vmul.f32 1.442695, %v1082_v54  ;;  %2140 = vpow2.f32 %v780_v48  ;;  %v1393_v56 = vsub.f32 %v1010_v30, %v1375_v9  ;;  %v1447_v27 = vsub.f32 %v1338_v42, %v1375_v9  ;;  %993 = vst [vmem:[#allocation5 + $0x170] sm:$0xff] %v974_v8  ;;  %1358 = vst [vmem:[#allocation5 + $0x200] sm:$0xff] %v1339_v34 }
 0x104   :  { %v1740_v29 = vmax.f32 %v1375_v9, %v3298_v61  ;;  %2142 = vpow2.f32 %v1055_v2  ;;  %v700_v49 = vsub.f32 %v497_v31, %v682_v59  ;;  %v754_v7 = vsub.f32 %v645_v45, %v682_v59  ;;  %1723 = vst [vmem:[#allocation5 + $0x290] sm:$0xff] %v1704_v50 }
 0x105   :  { %v1011_v33 = vmax.f32 %v682_v59, %v974_v8  ;;  %2144 = vpow2.f32 %v1109_v62  ;;  %v1420_v55 = vmul.f32 1.442695, %v1393_v56  ;;  %v1474_v16 = vmul.f32 1.442695, %v1447_v27  ;;  %v3900_v56 = vld [vmem:[#allocation21_spill] sm:$0xff] }
 0x106   :  { %v1758_v3 = vsub.f32 %v1375_v9, %v1740_v29  ;;  %v1812_v41 = vsub.f32 %v3298_v61, %v1740_v29  ;;  %v3326_v53 = vadd.f32 %v1643_v51, %v3898_v13  ;;  %v728_v42 = vmul.f32 1.442695, %v700_v49 }
 0x107   :  { %v1029_v47 = vsub.f32 %v682_v59, %v1011_v33  ;;  %2146 = vpow2.f32 %v1420_v55  ;;  %v1083_v11 = vsub.f32 %v974_v8, %v1011_v33  ;;  %v1376_v4 = vmax.f32 %v1011_v33, %v1339_v34  ;;  %v197_v59 = vpop.f32.mrf.mxu0 }
 0x108   :  { %v1785_v40 = vmul.f32 1.442695, %v1758_v3  ;;  %2148 = vpow2.f32 %v1474_v16  ;;  %v1839_v30 = vmul.f32 1.442695, %v1812_v41  ;;  %v782_v15 = vmul.f32 1.442695, %v754_v7 }
 0x109   :  { %v433_v5 = vmul.f32 %v2943_v57, %v310_v24  ;;  %v1057_v31 = vmul.f32 1.442695, %v1029_v47  ;;  %v1394_v9 = vsub.f32 %v1011_v33, %v1376_v4  ;;  %v1448_v45 = vsub.f32 %v1339_v34, %v1376_v4  ;;  %v3901_v7 = vld [vmem:[#allocation24_spill] sm:$0xff]  ;;  %v3902_v41 = vld [vmem:[#allocation35_spill] sm:$0xff]  ;;  %v3903_v47 = vld [vmem:[#allocation49_spill] sm:$0xff] }
 0x10a   :  { %2150 = vpow2.f32 %v1785_v40  ;;  %v1111_v61 = vmul.f32 1.442695, %v1083_v11  ;;  %v1741_v21 = vmax.f32 %v1376_v4, %v1704_v50  ;;  %v581_v51 = vmul.f32 %v2946_v36, %v310_v24 }
 0x10b   :  { %2152 = vpow2.f32 %v1839_v30  ;;  %v1422_v32 = vmul.f32 1.442695, %v1394_v9  ;;  %v3331_v48 = vadd.f32 %v433_v5, %v3899_v14  ;;  %v910_v54 = vmul.f32 %v2948_v12, %v310_v24  ;;  %v3904_v5 = vld [vmem:[#allocation61_spill] sm:$0xff]  ;;  %v3906_v9 = vld [vmem:[#allocation48_spill] sm:$0xff] }
 0x10c   :  { %2154 = vpow2.f32 %v728_v42  ;;  %v1476_v8 = vmul.f32 1.442695, %v1448_v45  ;;  %v1759_v2 = vsub.f32 %v1376_v4, %v1741_v21  ;;  %v1813_v62 = vsub.f32 %v1704_v50, %v1741_v21 }
 0x10d   :  { %2156 = vpow2.f32 %v782_v15  ;;  %v3335_v34 = vadd.f32 %v581_v51, %v3900_v56  ;;  %v1275_v27 = vmul.f32 %v2952_v58, %v310_v24  ;;  %v1640_v29 = vmul.f32 %v2977_v39, %v310_v24 }
 0x10e   :  { %2158 = vpow2.f32 %v1057_v31  ;;  %v1787_v49 = vmul.f32 1.442695, %v1759_v2  ;;  %v3340_v33 = vadd.f32 %v910_v54, %v3901_v7  ;;  %v443_v55 = vmul.f32 %v2943_v57, %v197_v59  ;;  %v3908_v54 = vld [vmem:[#allocation56_spill] sm:$0xff] }
 0x10f   :  { %2160 = vpow2.f32 %v1111_v61  ;;  %v2139_v16 = vpop.eup %2138  ;;  %v1841_v3 = vmul.f32 1.442695, %v1813_v62  ;;  %v3344_v50 = vadd.f32 %v1275_v27, %v3902_v41  ;;  %v591_v13 = vmul.f32 %v2946_v36, %v197_v59  ;;  %v3354_v61 = vpop.f32.mrf.mxu1 }
 0x110   :  { %2162 = vpow2.f32 %v1422_v32  ;;  %v2141_v42 = vpop.eup %2140  ;;  %v461_v40 = vadd.f32 %v443_v55, %v3903_v47  ;;  %v920_v24 = vmul.f32 %v2948_v12, %v197_v59  ;;  %v1285_v11 = vmul.f32 %v2952_v58, %v197_v59  ;;  %v3907_v32 = vld [vmem:[#allocation54_spill] sm:$0xff] }
 0x111   :  { %2164 = vpow2.f32 %v1476_v8  ;;  %v2143_v4 = vpop.eup %2142  ;;  %v807_v30 = vadd.f32 %v2141_v42, %v2139_v16  ;;  %v825_v15 = vmul.f32 2.0, %v2141_v42  ;;  %v3351_v31 = vadd.f32 %v1640_v29, %v3904_v5 }
 0x112   :  { %v609_v45 = vadd.f32 %v591_v13, %v3906_v9  ;;  %v2145_v21 = vpop.eup %2144  ;;  %2166 = vpow2.f32 %v1787_v49  ;;  %v499_v51 = vadd.f32 %v3134_v18, %v461_v40  ;;  %v938_v14 = vadd.f32 %v920_v24, %v3907_v32  ;;  %v3912_v32 = vld [vmem:[#allocation23_spill] sm:$0xff] }
 0x113   :  { %3905 = vst [vmem:[#allocation47_spill] sm:$0xff] %v3351_v31  ;;  %v1303_v8 = vadd.f32 %v1285_v11, %v3908_v54  ;;  %v843_v2 = vadd.f32 %v2139_v16, %v825_v15  ;;  %v1136_v62 = vmul.f32 %v2143_v4, %v807_v30  ;;  %v1190_v56 = vmul.f32 3.0, %v2145_v21 }
 0x114   :  { %v647_v27 = vadd.f32 %v3143_v19, %v609_v45  ;;  %v2147_v7 = vpop.eup %2146  ;;  %517 = vst [vmem:[#allocation5 + $0x60] sm:$0xff] %v499_v51  ;;  %v976_v29 = vadd.f32 %v3146_v60, %v938_v14  ;;  %v1650_v49 = vmul.f32 %v2977_v39, %v197_v59  ;;  %v442_v18 = vmul.f32 %v3354_v61, %v2943_v57  ;;  %v3909_v60 = vld [vmem:[#allocation62_spill] sm:$0xff]  ;;  %v3910_v59 = vld [vmem:[#allocation13_spill] sm:$0xff] }
 0x115   :  { %v3362_v55 = vadd.f32 %v3155_v20, %v1303_v8  ;;  %v2149_v41 = vpop.eup %2148  ;;  %v1154_v13 = vadd.f32 %v2145_v21, %v1136_v62  ;;  %v1172_v42 = vmul.f32 %v2143_v4, %v843_v2  ;;  %v590_v19 = vmul.f32 %v3354_v61, %v2946_v36 }
 0x116   :  { %666 = vst [vmem:[#allocation5 + $0xf0] sm:$0xff] %v647_v27  ;;  %v684_v16 = vmax.f32 %v499_v51, %v647_v27  ;;  %v1555_v40 = vmul.f32 4.0, %v2149_v41  ;;  %2168 = vpow2.f32 %v1841_v3  ;;  %995 = vst [vmem:[#allocation5 + $0x180] sm:$0xff] %v976_v29  ;;  %v1668_v20 = vadd.f32 %v1650_v49, %v3909_v60 }
 0x117   :  { %v2151_v47 = vpop.eup %2150  ;;  %1360 = vst [vmem:[#allocation5 + $0x210] sm:$0xff] %v3362_v55  ;;  %v3372_v24 = vadd.f32 %v442_v18, %v3910_v59  ;;  %v1208_v30 = vadd.f32 %v1190_v56, %v1172_v42  ;;  %v1501_v15 = vmul.f32 %v2147_v7, %v1154_v13  ;;  %v3376_v14 = vadd.f32 %v590_v19, %v3912_v32 }
 0x118   :  { %v2153_v11 = vpop.eup %2152  ;;  %v702_v4 = vsub.f32 %v499_v51, %v684_v16  ;;  %v756_v5 = vsub.f32 %v647_v27, %v684_v16  ;;  %v1013_v45 = vmax.f32 %v684_v16, %v976_v29  ;;  %v1706_v21 = vadd.f32 %v3163_v44, %v1668_v20 }
 0x119   :  { %3911 = vst [vmem:[#allocation52_spill] sm:$0xff] %v3372_v24  ;;  %v2155_v9 = vpop.eup %2154  ;;  %3913 = vst [vmem:[#allocation53_spill] sm:$0xff] %v3376_v14  ;;  %v919_v3 = vmul.f32 %v3354_v61, %v2948_v12  ;;  %v1519_v8 = vadd.f32 %v2149_v41, %v1501_v15  ;;  %v1537_v2 = vmul.f32 %v2147_v7, %v1208_v30  ;;  %v1920_v59 = vmul.f32 5.0, %v2153_v11 }
 0x11a   :  { %v2157_v54 = vpop.eup %2156  ;;  %v732_v62 = vmul.f32 1.442695, %v702_v4  ;;  %v786_v49 = vmul.f32 1.442695, %v756_v5  ;;  %v1031_v51 = vsub.f32 %v684_v16, %v1013_v45  ;;  %v1085_v27 = vsub.f32 %v976_v29, %v1013_v45  ;;  %1725 = vst [vmem:[#allocation5 + $0x2a0] sm:$0xff] %v1706_v21 }
 0x11b   :  { %v2159_v18 = vpop.eup %2158  ;;  %v808_v56 = vadd.f32 %v2157_v54, %v2155_v9  ;;  %v826_v13 = vmul.f32 2.0, %v2157_v54  ;;  %v1573_v60 = vadd.f32 %v1555_v40, %v1537_v2  ;;  %v1866_v44 = vmul.f32 %v2151_v47, %v1519_v8 }
 0x11c   :  { %v2161_v42 = vpop.eup %2160  ;;  %2170 = vpow2.f32 %v732_v62  ;;  %v1378_v19 = vmax.f32 %v1013_v45, %v3362_v55  ;;  %v1061_v15 = vmul.f32 1.442695, %v1031_v51  ;;  %v1115_v4 = vmul.f32 1.442695, %v1085_v27 }
 0x11d   :  { %v2163_v20 = vpop.eup %2162  ;;  %v844_v32 = vadd.f32 %v2155_v9, %v826_v13  ;;  %v1137_v14 = vmul.f32 %v2159_v18, %v808_v56  ;;  %2172 = vpow2.f32 %v786_v49  ;;  %v1884_v41 = vadd.f32 %v2153_v11, %v1866_v44 }
 0x11e   :  { %v2165_v7 = vpop.eup %2164  ;;  %v1902_v30 = vmul.f32 %v2151_v47, %v1573_v60  ;;  %v1191_v29 = vmul.f32 3.0, %v2161_v42  ;;  %v1396_v54 = vsub.f32 %v1013_v45, %v1378_v19  ;;  %v1450_v8 = vsub.f32 %v3362_v55, %v1378_v19  ;;  %v199_v45 = vpop.f32.mrf.mxu0 }
 0x11f   :  { %v1155_v5 = vadd.f32 %v2161_v42, %v1137_v14  ;;  %v1173_v16 = vmul.f32 %v2159_v18, %v844_v32  ;;  %v2167_v24 = vpop.eup %2166  ;;  %2174 = vrcp.f32 %v1884_v41  ;;  %v1556_v40 = vmul.f32 4.0, %v2165_v7  ;;  %v3914_v18 = vld [vmem:[#allocation30_spill] sm:$0xff]  ;;  %v320_v32 = vpop.f32.mrf.mxu1 }
 0x120   :  { %v1743_v2 = vmax.f32 %v1378_v19, %v1706_v21  ;;  %v1938_v62 = vadd.f32 %v1920_v59, %v1902_v30  ;;  %2176 = vpow2.f32 %v1061_v15  ;;  %v1426_v49 = vmul.f32 1.442695, %v1396_v54 }
 0x121   :  { %v1209_v31 = vadd.f32 %v1191_v29, %v1173_v16  ;;  %v1502_v9 = vmul.f32 %v2163_v20, %v1155_v5  ;;  %2178 = vpow2.f32 %v1115_v4  ;;  %v1480_v11 = vmul.f32 1.442695, %v1450_v8 }
 0x122   :  { %v1761_v47 = vsub.f32 %v1378_v19, %v1743_v2  ;;  %v1815_v14 = vsub.f32 %v1706_v21, %v1743_v2  ;;  %v3383_v51 = vadd.f32 %v919_v3, %v3914_v18  ;;  %2180 = vpow2.f32 %v1426_v49  ;;  %v3918_v49 = vld [vmem:[#allocation55_spill] sm:$0xff] }
 0x123   :  { %v1520_v56 = vadd.f32 %v2165_v7, %v1502_v9  ;;  %v1538_v13 = vmul.f32 %v2163_v20, %v1209_v31  ;;  %v2169_v27 = vpop.eup %2168  ;;  %v1284_v55 = vmul.f32 %v3354_v61, %v2952_v58  ;;  %v1649_v60 = vmul.f32 %v3354_v61, %v2977_v39  ;;  %v3915_v31 = vld [vmem:[#allocation36_spill] sm:$0xff]  ;;  %v3916_v61 = vld [vmem:[#allocation50_spill] sm:$0xff] }
 0x124   :  { %v1791_v42 = vmul.f32 1.442695, %v1761_v47  ;;  %2182 = vpow2.f32 %v1480_v11  ;;  %v1845_v19 = vmul.f32 1.442695, %v1815_v14  ;;  %v444_v20 = vmul.f32 %v2943_v57, %v199_v45  ;;  %v3919_v47 = vld [vmem:[#allocation57_spill] sm:$0xff] }
 0x125   :  { %v1574_v44 = vadd.f32 %v1556_v40, %v1538_v13  ;;  %v1867_v59 = vmul.f32 %v2167_v24, %v1520_v56  ;;  %v3390_v21 = vadd.f32 %v1284_v55, %v3915_v31  ;;  %v3393_v3 = vadd.f32 %v1649_v60, %v3285_v10  ;;  %v3917_v10 = vld [vmem:[#allocation51_spill] sm:$0xff] }
 0x126   :  { %2184 = vpow2.f32 %v1791_v42  ;;  %v1921_v41 = vmul.f32 5.0, %v2169_v27  ;;  %v592_v30 = vmul.f32 %v2946_v36, %v199_v45  ;;  %v462_v15 = vadd.f32 %v444_v20, %v3916_v61  ;;  %v3920_v13 = vld [vmem:[#allocation63_spill] sm:$0xff]  ;;  %v3921_v42 = vld [vmem:[#allocation12_spill] sm:$0xff] }
 0x127   :  { %v1885_v7 = vadd.f32 %v2169_v27, %v1867_v59  ;;  %2186 = vpow2.f32 %v1845_v19  ;;  %v921_v4 = vmul.f32 %v2948_v12, %v199_v45  ;;  %v1286_v5 = vmul.f32 %v2952_v58, %v199_v45 }
 0x128   :  { %v1651_v16 = vmul.f32 %v2977_v39, %v199_v45  ;;  %v1903_v54 = vmul.f32 %v2167_v24, %v1574_v44  ;;  %v610_v40 = vadd.f32 %v592_v30, %v3917_v10  ;;  %v439_v8 = vmul.f32 %v2943_v57, %v320_v32 }
 0x129   :  { %v2171_v29 = vpop.eup %2170  ;;  %2188 = vrcp.f32 %v1885_v7  ;;  %v500_v9 = vadd.f32 %v3170_v35, %v462_v15  ;;  %v939_v11 = vadd.f32 %v921_v4, %v3918_v49  ;;  %v1304_v56 = vadd.f32 %v1286_v5, %v3919_v47 }
 0x12a   :  { %v2173_v2 = vpop.eup %2172  ;;  %v1669_v14 = vadd.f32 %v1651_v16, %v3920_v13  ;;  %v648_v45 = vadd.f32 %v3188_v28, %v610_v40  ;;  %v3409_v24 = vadd.f32 %v439_v8, %v3921_v42  ;;  %v587_v44 = vmul.f32 %v2946_v36, %v320_v32 }
 0x12b   :  { %v810_v18 = vadd.f32 %v2173_v2, %v2171_v29  ;;  %v828_v27 = vmul.f32 2.0, %v2173_v2  ;;  %518 = vst [vmem:[#allocation5 + $0x68] sm:$0xff] %v500_v9  ;;  %v977_v55 = vadd.f32 %v3191_v23, %v939_v11  ;;  %v3413_v60 = vadd.f32 %v3194_v1, %v1304_v56  ;;  %v3922_v23 = vld [vmem:[#allocation20_spill] sm:$0xff]  ;;  %v1604_v2 = vpop.permute.xlu1 %1603 }
 0x12c   :  { %v3416_v35 = vadd.f32 %v3197_v6, %v1669_v14  ;;  %v2175_v59 = vpop.eup %2174  ;;  %667 = vst [vmem:[#allocation5 + $0xf8] sm:$0xff] %v648_v45  ;;  %v685_v31 = vmax.f32 %v500_v9, %v648_v45  ;;  %v916_v28 = vmul.f32 %v2948_v12, %v320_v32  ;;  %v1281_v20 = vmul.f32 %v2952_v58, %v320_v32 }
 0x12d   :  { %v846_v19 = vadd.f32 %v2171_v29, %v828_v27  ;;  %v2177_v7 = vpop.eup %2176  ;;  %v1974_v30 = vmul.f32 %v2175_v59, %v1938_v62  ;;  %v1939_v61 = vadd.f32 %v1921_v41, %v1903_v54  ;;  %996 = vst [vmem:[#allocation5 + $0x188] sm:$0xff] %v977_v55  ;;  %1361 = vst [vmem:[#allocation5 + $0x218] sm:$0xff] %v3413_v60  ;;  %v3923_v62 = vld [vmem:[#allocation29_spill] sm:$0xff]  ;;  %v3924_v54 = vld [vmem:[#allocation38_spill] sm:$0xff] }
 0x12e   :  { %1726 = vst [vmem:[#allocation5 + $0x2a8] sm:$0xff] %v3416_v35  ;;  %v3424_v1 = vadd.f32 %v587_v44, %v3922_v23  ;;  %v1646_v6 = vmul.f32 %v2977_v39, %v320_v32  ;;  %v2179_v15 = vpop.eup %2178  ;;  %v1139_v4 = vmul.f32 %v2177_v7, %v810_v18  ;;  %v703_v16 = vsub.f32 %v500_v9, %v685_v31 }
 0x12f   :  { %v1175_v5 = vmul.f32 %v2177_v7, %v846_v19  ;;  %v757_v29 = vsub.f32 %v648_v45, %v685_v31  ;;  %1992 = vst [vmem:[#allocation6 + $0x48] sm:$0xff] %v1974_v30  ;;  %v1193_v10 = vmul.f32 3.0, %v2179_v15  ;;  %v1014_v40 = vmax.f32 %v685_v31, %v977_v55  ;;  %v2181_v49 = vpop.eup %2180 }
 0x130   :  { %v3428_v41 = vadd.f32 %v916_v28, %v3923_v62  ;;  %v3431_v8 = vadd.f32 %v1281_v20, %v3924_v54  ;;  %v1157_v11 = vadd.f32 %v2179_v15, %v1139_v4  ;;  %v734_v47 = vmul.f32 1.442695, %v703_v16 }
 0x131   :  { %v788_v56 = vmul.f32 1.442695, %v757_v29  ;;  %v3434_v32 = vadd.f32 %v1646_v6, %v3209_v0  ;;  %v2183_v13 = vpop.eup %2182  ;;  %v1211_v9 = vadd.f32 %v1193_v10, %v1175_v5  ;;  %v1032_v14 = vsub.f32 %v685_v31, %v1014_v40  ;;  %v203_v5 = vpop.f32.mrf.mxu0 }
 0x132   :  { %v1086_v18 = vsub.f32 %v977_v55, %v1014_v40  ;;  %v1379_v27 = vmax.f32 %v1014_v40, %v3413_v60  ;;  %v1504_v42 = vmul.f32 %v2181_v49, %v1157_v11  ;;  %v1558_v44 = vmul.f32 4.0, %v2183_v13  ;;  %v2099_v11 = vpop.f32.mrf.mxu1 }
 0x133   :  { %v2185_v45 = vpop.eup %2184  ;;  %2190 = vpow2.f32 %v734_v47  ;;  %v1633_v59 = vadd.f32 %v2957_v37, %v1604_v2  ;;  %v1540_v28 = vmul.f32 %v2181_v49, %v1211_v9  ;;  %v1063_v20 = vmul.f32 1.442695, %v1032_v14  ;;  %v3926_v14 = vld [vmem:[#allocation25_spill] sm:$0xff] }
 0x134   :  { %v2187_v19 = vpop.eup %2186  ;;  %2192 = vpow2.f32 %v788_v56  ;;  %v1117_v7 = vmul.f32 1.442695, %v1086_v18  ;;  %v1522_v30 = vadd.f32 %v2183_v13, %v1504_v42  ;;  %v1397_v0 = vsub.f32 %v1014_v40, %v1379_v27  ;;  %v3925_v13 = vld [vmem:[#allocation15_spill] sm:$0xff] }
 0x135   :  { %v1451_v23 = vsub.f32 %v3413_v60, %v1379_v27  ;;  %v3440_v31 = vadd.f32 %v2964_v25, %v1604_v2  ;;  %v1576_v6 = vadd.f32 %v1558_v44, %v1540_v28  ;;  %v1923_v15 = vmul.f32 5.0, %v2187_v19 }
 0x136   :  { %v2189_v55 = vpop.eup %2188  ;;  %2194 = vpow2.f32 %v1063_v20  ;;  %v1744_v4 = vmax.f32 %v1379_v27, %v3416_v35  ;;  %v1869_v16 = vmul.f32 %v2185_v45, %v1522_v30  ;;  %v1428_v29 = vmul.f32 1.442695, %v1397_v0  ;;  %v3928_v20 = vld [vmem:[#allocation59_spill] sm:$0xff] }
 0x137   :  { %v1975_v37 = vmul.f32 %v2189_v55, %v1939_v61  ;;  %2196 = vpow2.f32 %v1117_v7  ;;  %v1905_v10 = vmul.f32 %v2185_v45, %v1576_v6  ;;  %v1482_v62 = vmul.f32 1.442695, %v1451_v23 }
 0x138   :  { %v1762_v54 = vsub.f32 %v1379_v27, %v1744_v4  ;;  %v1816_v40 = vsub.f32 %v3416_v35, %v1744_v4  ;;  %v1887_v60 = vadd.f32 %v2187_v19, %v1869_v16  ;;  %2198 = vpow2.f32 %v1428_v29 }
 0x139   :  { %1993 = vst [vmem:[#allocation6 + $0x50] sm:$0xff] %v1975_v37  ;;  %v446_v25 = vmul.f32 %v2943_v57, %v203_v5  ;;  %v594_v49 = vmul.f32 %v2946_v36, %v203_v5  ;;  %2200 = vpow2.f32 %v1482_v62  ;;  %v3447_v61 = vadd.f32 %v2967_v26, %v1604_v2  ;;  %v3927_v2 = vld [vmem:[#allocation32_spill] sm:$0xff] }
 0x13a   :  { %v1793_v47 = vmul.f32 1.442695, %v1762_v54  ;;  %v1847_v56 = vmul.f32 1.442695, %v1816_v40  ;;  %2202 = vrcp.f32 %v1887_v60  ;;  %v923_v35 = vmul.f32 %v2948_v12, %v203_v5  ;;  %v3476_v40 = vpop.f32.mrf.mxu0 }
 0x13b   :  { %v464_v9 = vadd.f32 %v446_v25, %v3925_v13  ;;  %v612_v18 = vadd.f32 %v594_v49, %v3926_v14  ;;  %v3452_v27 = vadd.f32 %v1923_v15, %v1905_v10  ;;  %v1288_v45 = vmul.f32 %v2952_v58, %v203_v5  ;;  %v3932_v49 = vld [vmem:[#allocation40_spill] sm:$0xff] }
 0x13c   :  { %v1653_v42 = vmul.f32 %v2977_v39, %v203_v5  ;;  %v448_v44 = vmul.f32 %v2099_v11, %v2943_v57  ;;  %2204 = vpow2.f32 %v1847_v56  ;;  %v941_v28 = vadd.f32 %v923_v35, %v3927_v2  ;;  %v3929_v5 = vld [vmem:[#allocation17_spill] sm:$0xff] }
 0x13d   :  { %v502_v19 = vadd.f32 %v3215_v43, %v464_v9  ;;  %v650_v26 = vadd.f32 %v3218_v52, %v612_v18  ;;  %2206 = vpow2.f32 %v1793_v47  ;;  %v1306_v7 = vadd.f32 %v1288_v45, %v3928_v20 }
 0x13e   :  { %v1671_v30 = vadd.f32 %v1653_v42, %v1633_v59  ;;  %v596_v0 = vmul.f32 %v2099_v11, %v2946_v36  ;;  %v979_v55 = vadd.f32 %v3232_v46, %v941_v28  ;;  %v925_v6 = vmul.f32 %v2099_v11, %v2948_v12  ;;  %v3930_v59 = vld [vmem:[#allocation27_spill] sm:$0xff] }
 0x13f   :  { %520 = vst [vmem:[#allocation5 + $0x78] sm:$0xff] %v502_v19  ;;  %669 = vst [vmem:[#allocation5 + $0x108] sm:$0xff] %v650_v26  ;;  %v687_v23 = vmax.f32 %v502_v19, %v650_v26  ;;  %v1290_v15 = vmul.f32 %v2099_v11, %v2952_v58  ;;  %v1344_v52 = vadd.f32 %v3235_v63, %v1306_v7 }
 0x140   :  { %v2191_v43 = vpop.eup %2190  ;;  %v3467_v4 = vadd.f32 %v3238_v17, %v1671_v30  ;;  %v3470_v37 = vadd.f32 %v448_v44, %v3929_v5  ;;  %v3473_v16 = vadd.f32 %v596_v0, %v3930_v59  ;;  %998 = vst [vmem:[#allocation5 + $0x198] sm:$0xff] %v979_v55  ;;  %v1655_v54 = vmul.f32 %v2099_v11, %v2977_v39  ;;  %v3931_v17 = vld [vmem:[#allocation34_spill] sm:$0xff] }
 0x141   :  { %v2193_v29 = vpop.eup %2192  ;;  %v705_v10 = vsub.f32 %v502_v19, %v687_v23  ;;  %v759_v62 = vsub.f32 %v650_v26, %v687_v23  ;;  %v1016_v46 = vmax.f32 %v687_v23, %v979_v55  ;;  %1363 = vst [vmem:[#allocation5 + $0x228] sm:$0xff] %v1344_v52  ;;  %v3480_v25 = vadd.f32 %v925_v6, %v3931_v17  ;;  %v3933_v6 = vld [vmem:[#allocation16_spill] sm:$0xff] }
 0x142   :  { %v811_v60 = vadd.f32 %v2193_v29, %v2191_v43  ;;  %v829_v63 = vmul.f32 2.0, %v2193_v29  ;;  %1728 = vst [vmem:[#allocation5 + $0x2b8] sm:$0xff] %v3467_v4  ;;  %v3483_v47 = vadd.f32 %v1290_v15, %v3932_v49  ;;  %v447_v44 = vmul.f32 %v2943_v57, %v3476_v40 }
 0x143   :  { %v2195_v56 = vpop.eup %2194  ;;  %v738_v13 = vmul.f32 1.442695, %v705_v10  ;;  %v792_v9 = vmul.f32 1.442695, %v759_v62  ;;  %v1034_v14 = vsub.f32 %v687_v23, %v1016_v46  ;;  %v1088_v18 = vsub.f32 %v979_v55, %v1016_v46 }
 0x144   :  { %v2197_v35 = vpop.eup %2196  ;;  %v847_v11 = vadd.f32 %v2191_v43, %v829_v63  ;;  %v1140_v45 = vmul.f32 %v2195_v56, %v811_v60  ;;  %v1381_v42 = vmax.f32 %v1016_v46, %v1344_v52  ;;  %v465_v15 = vadd.f32 %v447_v44, %v3933_v6 }
 0x145   :  { %v1194_v19 = vmul.f32 3.0, %v2197_v35  ;;  %2208 = vpow2.f32 %v738_v13  ;;  %v1067_v26 = vmul.f32 1.442695, %v1034_v14  ;;  %v1121_v2 = vmul.f32 1.442695, %v1088_v18  ;;  %v2199_v28 = vpop.eup %2198 }
 0x146   :  { %v1158_v20 = vadd.f32 %v2197_v35, %v1140_v45  ;;  %v1176_v7 = vmul.f32 %v2195_v56, %v847_v11  ;;  %2210 = vpow2.f32 %v792_v9  ;;  %v1399_v30 = vsub.f32 %v1016_v46, %v1381_v42  ;;  %v2201_v0 = vpop.eup %2200 }
 0x147   :  { %2212 = vpow2.f32 %v1067_v26  ;;  %v1453_v23 = vsub.f32 %v1344_v52, %v1381_v42  ;;  %v1746_v55 = vmax.f32 %v1381_v42, %v3467_v4  ;;  %v2203_v43 = vpop.eup %2202  ;;  %v1559_v29 = vmul.f32 4.0, %v2201_v0 }
 0x148   :  { %v1212_v5 = vadd.f32 %v1194_v19, %v1176_v7  ;;  %v1505_v59 = vmul.f32 %v2199_v28, %v1158_v20  ;;  %2214 = vpow2.f32 %v1121_v2  ;;  %v1977_v10 = vmul.f32 %v2203_v43, %v3452_v27  ;;  %v3502_v19 = vpop.f32.mrf.mxu1  ;;  %v3935_v2 = vld [vmem:[#allocation96_spill] sm:$0xff]  ;;  %v3936_v20 = vld [vmem:[#allocation33_spill] sm:$0xff] }
 0x149   :  { %v1432_v62 = vmul.f32 1.442695, %v1399_v30  ;;  %v1486_v60 = vmul.f32 1.442695, %v1453_v23  ;;  %v1764_v63 = vsub.f32 %v1381_v42, %v1746_v55  ;;  %v2205_v17 = vpop.eup %2204  ;;  %v1818_v56 = vsub.f32 %v3467_v4, %v1746_v55  ;;  %v3934_v42 = vld [vmem:[#allocation26_spill] sm:$0xff]  ;;  %v3937_v30 = vld [vmem:[#allocation39_spill] sm:$0xff]  ;;  %v3509_v23 = vpop.f32.mrf.mxu0 }
 0x14a   :  { %v1523_v49 = vadd.f32 %v2201_v0, %v1505_v59  ;;  %v1541_v46 = vmul.f32 %v2199_v28, %v1212_v5  ;;  %v503_v52 = vadd.f32 %v3256_v22, %v465_v15  ;;  %v2207_v13 = vpop.eup %2206  ;;  %1995 = vst [vmem:[#allocation6 + $0x60] sm:$0xff] %v1977_v10  ;;  %v3493_v14 = vadd.f32 %v1655_v54, %v3447_v61  ;;  %v3938_v43 = vld [vmem:[#allocation97_spill] sm:$0xff]  ;;  %v3939_v59 = vld [vmem:[#allocation98_spill] sm:$0xff] }
 0x14b   :  { %2216 = vpow2.f32 %v1432_v62  ;;  %v1797_v9 = vmul.f32 1.442695, %v1764_v63  ;;  %v595_v27 = vmul.f32 %v2946_v36, %v3476_v40  ;;  %v1851_v11 = vmul.f32 1.442695, %v1818_v56 }
 0x14c   :  { %v1577_v18 = vadd.f32 %v1559_v29, %v1541_v46  ;;  %v1870_v35 = vmul.f32 %v2207_v13, %v1523_v49  ;;  %2218 = vpow2.f32 %v1486_v60  ;;  %521 = vst [vmem:[#allocation5 + $0x80] sm:$0xff] %v503_v52  ;;  %v1924_v45 = vmul.f32 5.0, %v2205_v17  ;;  %v3940_v60 = vld [vmem:[#allocation99_spill] sm:$0xff] }
 0x14d   :  { %v613_v4 = vadd.f32 %v595_v27, %v3934_v42  ;;  %v924_v22 = vmul.f32 %v2948_v12, %v3476_v40  ;;  %v1289_v44 = vmul.f32 %v2952_v58, %v3476_v40  ;;  %2220 = vpow2.f32 %v1851_v11  ;;  %v3944_v11 = vld [vmem:[#allocation65_spill] sm:$0xff] }
 0x14e   :  { %v1888_v61 = vadd.f32 %v2205_v17, %v1870_v35  ;;  %v1906_v54 = vmul.f32 %v2207_v13, %v1577_v18  ;;  %v1654_v26 = vmul.f32 %v2977_v39, %v3476_v40  ;;  %2222 = vpow2.f32 %v1797_v9  ;;  %v3942_v17 = vld [vmem:[#allocation42_spill] sm:$0xff]  ;;  %v3943_v9 = vld [vmem:[#allocation43_spill] sm:$0xff] }
 0x14f   :  { %v651_v28 = vadd.f32 %v3935_v2, %v613_v4  ;;  %v942_v7 = vadd.f32 %v924_v22, %v3936_v20  ;;  %v1307_v0 = vadd.f32 %v1289_v44, %v3937_v30  ;;  %v3516_v15 = vmul.f32 %v2943_v57, %v3502_v19  ;;  %v3946_v30 = vld [vmem:[#allocation66_spill] sm:$0xff] }
 0x150   :  { %v3511_v55 = vadd.f32 %v1924_v45, %v1906_v54  ;;  %2224 = vrcp.f32 %v1888_v61  ;;  %v1672_v6 = vadd.f32 %v1654_v26, %v3440_v31  ;;  %v3522_v10 = vmul.f32 %v2946_v36, %v3502_v19 }
 0x151   :  { %670 = vst [vmem:[#allocation5 + $0x110] sm:$0xff] %v651_v28  ;;  %v688_v40 = vmax.f32 %v503_v52, %v651_v28  ;;  %v980_v5 = vadd.f32 %v3938_v43, %v942_v7  ;;  %v1345_v29 = vadd.f32 %v3939_v59, %v1307_v0  ;;  %v3527_v31 = vmul.f32 %v2948_v12, %v3502_v19 }
 0x152   :  { %v2209_v62 = vpop.eup %2208  ;;  %v1710_v63 = vadd.f32 %v3940_v60, %v1672_v6  ;;  %v3531_v57 = vmul.f32 %v2952_v58, %v3502_v19  ;;  %v469_v49 = vmul.f32 %v3942_v17, %v3509_v23  ;;  %v617_v27 = vmul.f32 %v3943_v9, %v3509_v23  ;;  %v3945_v58 = vld [vmem:[#allocation44_spill] sm:$0xff] }
 0x153   :  { %v2211_v46 = vpop.eup %2210  ;;  %v706_v56 = vsub.f32 %v503_v52, %v688_v40  ;;  %v760_v13 = vsub.f32 %v651_v28, %v688_v40  ;;  %999 = vst [vmem:[#allocation5 + $0x1a0] sm:$0xff] %v980_v5  ;;  %v1017_v36 = vmax.f32 %v688_v40, %v980_v5  ;;  %1364 = vst [vmem:[#allocation5 + $0x230] sm:$0xff] %v1345_v29 }
 0x154   :  { %3941 = vst [vmem:[#allocation58_spill] sm:$0xff] %v3531_v57  ;;  %v2213_v18 = vpop.eup %2212  ;;  %v813_v35 = vadd.f32 %v2211_v46, %v2209_v62  ;;  %v831_v12 = vmul.f32 2.0, %v2211_v46  ;;  %1729 = vst [vmem:[#allocation5 + $0x2c0] sm:$0xff] %v1710_v63  ;;  %v487_v45 = vadd.f32 %v469_v49, %v3944_v11  ;;  %v946_v42 = vmul.f32 %v3945_v58, %v3509_v23 }
 0x155   :  { %v2215_v4 = vpop.eup %2214  ;;  %v740_v22 = vmul.f32 1.442695, %v706_v56  ;;  %v794_v44 = vmul.f32 1.442695, %v760_v13  ;;  %v1035_v52 = vsub.f32 %v688_v40, %v1017_v36  ;;  %v1089_v61 = vsub.f32 %v980_v5, %v1017_v36 }
 0x156   :  { %v849_v54 = vadd.f32 %v2209_v62, %v831_v12  ;;  %v1142_v26 = vmul.f32 %v2213_v18, %v813_v35  ;;  %v1196_v2 = vmul.f32 3.0, %v2215_v4  ;;  %v1382_v28 = vmax.f32 %v1017_v36, %v1345_v29  ;;  %505 = vst [vmem:[#allocation5] sm:$0xff] %v487_v45 }
 0x157   :  { %2226 = vpow2.f32 %v740_v22  ;;  %v1069_v20 = vmul.f32 1.442695, %v1035_v52  ;;  %v1123_v7 = vmul.f32 1.442695, %v1089_v61  ;;  %v635_v0 = vadd.f32 %v617_v27, %v3946_v30 }
 0x158   :  { %v2217_v6 = vpop.eup %2216  ;;  %v1160_v43 = vadd.f32 %v2215_v4, %v1142_v26  ;;  %v1178_v59 = vmul.f32 %v2213_v18, %v849_v54  ;;  %2228 = vpow2.f32 %v794_v44  ;;  %v1400_v60 = vsub.f32 %v1017_v36, %v1382_v28 }
 0x159   :  { %v2219_v49 = vpop.eup %2218  ;;  %2230 = vpow2.f32 %v1069_v20  ;;  %v1454_v46 = vsub.f32 %v1345_v29, %v1382_v28  ;;  %v1747_v40 = vmax.f32 %v1382_v28, %v1710_v63  ;;  %654 = vst [vmem:[#allocation5 + $0x90] sm:$0xff] %v635_v0  ;;  %v672_v5 = vmax.f32 %v487_v45, %v635_v0 }
 0x15a   :  { %v1214_v62 = vadd.f32 %v1196_v2, %v1178_v59  ;;  %v1507_v56 = vmul.f32 %v2217_v6, %v1160_v43  ;;  %v1561_v13 = vmul.f32 4.0, %v2219_v49  ;;  %2232 = vpow2.f32 %v1123_v7  ;;  %v2221_v35 = vpop.eup %2220  ;;  %v2102_v7 = vpop.f32.mrf.mxu1 }
 0x15b   :  { %v1434_v12 = vmul.f32 1.442695, %v1400_v60  ;;  %v1488_v11 = vmul.f32 1.442695, %v1454_v46  ;;  %v1765_v22 = vsub.f32 %v1382_v28, %v1747_v40  ;;  %v1819_v27 = vsub.f32 %v1710_v63, %v1747_v40  ;;  %v2223_v52 = vpop.eup %2222  ;;  %v3947_v63 = vld [vmem:[#allocation67_spill] sm:$0xff] }
 0x15c   :  { %v1525_v4 = vadd.f32 %v2219_v49, %v1507_v56  ;;  %v1543_v18 = vmul.f32 %v2217_v6, %v1214_v62  ;;  %v1926_v44 = vmul.f32 5.0, %v2221_v35  ;;  %v690_v36 = vsub.f32 %v487_v45, %v672_v5  ;;  %v3948_v45 = vld [vmem:[#allocation45_spill] sm:$0xff]  ;;  %v3950_v56 = vld [vmem:[#allocation68_spill] sm:$0xff] }
 0x15d   :  { %v2225_v61 = vpop.eup %2224  ;;  %2234 = vpow2.f32 %v1434_v12  ;;  %v1799_v29 = vmul.f32 1.442695, %v1765_v22  ;;  %v1853_v54 = vmul.f32 1.442695, %v1819_v27  ;;  %v744_v26 = vsub.f32 %v635_v0, %v672_v5 }
 0x15e   :  { %v1978_v2 = vmul.f32 %v2225_v61, %v3511_v55  ;;  %v1579_v20 = vadd.f32 %v1561_v13, %v1543_v18  ;;  %v1872_v30 = vmul.f32 %v2223_v52, %v1525_v4  ;;  %2236 = vpow2.f32 %v1488_v11  ;;  %v3949_v55 = vld [vmem:[#allocation46_spill] sm:$0xff]  ;;  %v3951_v11 = vld [vmem:[#allocation69_spill] sm:$0xff] }
 0x15f   :  { %2238 = vpow2.f32 %v1799_v29  ;;  %v708_v43 = vmul.f32 1.442695, %v690_v36  ;;  %v762_v28 = vmul.f32 1.442695, %v744_v26  ;;  %v964_v59 = vadd.f32 %v946_v42, %v3947_v63 }
 0x160   :  { %1996 = vst [vmem:[#allocation6 + $0x68] sm:$0xff] %v1978_v2  ;;  %v1890_v6 = vadd.f32 %v2221_v35, %v1872_v30  ;;  %v1908_v60 = vmul.f32 %v2223_v52, %v1579_v20  ;;  %2240 = vpow2.f32 %v1853_v54  ;;  %v1311_v49 = vmul.f32 %v3948_v45, %v3509_v23 }
 0x161   :  { %2242 = vpow2.f32 %v708_v43  ;;  %983 = vst [vmem:[#allocation5 + $0x120] sm:$0xff] %v964_v59  ;;  %v1001_v0 = vmax.f32 %v672_v5, %v964_v59  ;;  %v1676_v46 = vmul.f32 %v3949_v55, %v3509_v23  ;;  %v474_v40 = vmul.f32 %v2102_v7, %v3942_v17  ;;  %v3952_v23 = vld [vmem:[#allocation100_spill] sm:$0xff] }
 0x162   :  { %v3548_v62 = vadd.f32 %v1926_v44, %v1908_v60  ;;  %2244 = vrcp.f32 %v1890_v6  ;;  %v1329_v42 = vadd.f32 %v1311_v49, %v3950_v56  ;;  %v622_v13 = vmul.f32 %v2102_v7, %v3943_v9 }
 0x163   :  { %2246 = vpow2.f32 %v762_v28  ;;  %v1019_v35 = vsub.f32 %v672_v5, %v1001_v0  ;;  %v1073_v12 = vsub.f32 %v964_v59, %v1001_v0  ;;  %v1694_v22 = vadd.f32 %v1676_v46, %v3951_v11  ;;  %v3953_v59 = vld [vmem:[#allocation101_spill] sm:$0xff] }
 0x164   :  { %v2227_v27 = vpop.eup %2226  ;;  %1348 = vst [vmem:[#allocation5 + $0x1b0] sm:$0xff] %v1329_v42  ;;  %v1366_v52 = vmax.f32 %v1001_v0, %v1329_v42  ;;  %v492_v4 = vadd.f32 %v474_v40, %v3289_v38  ;;  %v640_v18 = vadd.f32 %v622_v13, %v3952_v23  ;;  %v951_v44 = vmul.f32 %v2102_v7, %v3945_v58 }
 0x165   :  { %v2229_v36 = vpop.eup %2228  ;;  %v1037_v61 = vmul.f32 1.442695, %v1019_v35  ;;  %v1091_v29 = vmul.f32 1.442695, %v1073_v12  ;;  %1713 = vst [vmem:[#allocation5 + $0x240] sm:$0xff] %v1694_v22  ;;  %v1316_v54 = vmul.f32 %v2102_v7, %v3948_v45  ;;  %v3558_v5 = vmul.f32 %v2102_v7, %v3949_v55 }
 0x166   :  { %v2231_v26 = vpop.eup %2230  ;;  %v814_v2 = vadd.f32 %v2229_v36, %v2227_v27  ;;  %v832_v20 = vmul.f32 2.0, %v2229_v36  ;;  %v1384_v30 = vsub.f32 %v1001_v0, %v1366_v52  ;;  %v1438_v43 = vsub.f32 %v1329_v42, %v1366_v52  ;;  %510 = vst [vmem:[#allocation5 + $0x28] sm:$0xff] %v492_v4  ;;  %659 = vst [vmem:[#allocation5 + $0xb8] sm:$0xff] %v640_v18 }
 0x167   :  { %v2233_v38 = vpop.eup %2232  ;;  %2248 = vpow2.f32 %v1037_v61  ;;  %v1731_v28 = vmax.f32 %v1366_v52, %v1694_v22  ;;  %v677_v63 = vmax.f32 %v492_v4, %v640_v18  ;;  %v969_v6 = vadd.f32 %v951_v44, %v3953_v59 }
 0x168   :  { %v850_v60 = vadd.f32 %v2227_v27, %v832_v20  ;;  %v1143_v49 = vmul.f32 %v2231_v26, %v814_v2  ;;  %v1197_v46 = vmul.f32 3.0, %v2233_v38  ;;  %2250 = vpow2.f32 %v1091_v29 }
 0x169   :  { %v1402_v40 = vmul.f32 1.442695, %v1384_v30  ;;  %v1456_v7 = vmul.f32 1.442695, %v1438_v43  ;;  %v1749_v56 = vsub.f32 %v1366_v52, %v1731_v28  ;;  %v1803_v13 = vsub.f32 %v1694_v22, %v1731_v28  ;;  %988 = vst [vmem:[#allocation5 + $0x148] sm:$0xff] %v969_v6 }
 0x16a   :  { %v2235_v35 = vpop.eup %2234  ;;  %v1161_v0 = vadd.f32 %v2233_v38, %v1143_v49  ;;  %v1179_v42 = vmul.f32 %v2231_v26, %v850_v60  ;;  %v695_v12 = vsub.f32 %v492_v4, %v677_v63  ;;  %v749_v11 = vsub.f32 %v640_v18, %v677_v63  ;;  %v3954_v60 = vld [vmem:[#allocation102_spill] sm:$0xff] }
 0x16b   :  { %v2237_v23 = vpop.eup %2236  ;;  %2252 = vpow2.f32 %v1402_v40  ;;  %v1767_v36 = vmul.f32 1.442695, %v1749_v56  ;;  %v1821_v61 = vmul.f32 1.442695, %v1803_v13  ;;  %v1006_v57 = vmax.f32 %v677_v63, %v969_v6  ;;  %v3563_v13 = vpop.f32.mrf.mxu0 }
 0x16c   :  { %v2239_v44 = vpop.eup %2238  ;;  %v1215_v27 = vadd.f32 %v1197_v46, %v1179_v42  ;;  %v1508_v2 = vmul.f32 %v2235_v35, %v1161_v0  ;;  %v1562_v20 = vmul.f32 4.0, %v2237_v23  ;;  %2254 = vpow2.f32 %v1456_v7 }
 0x16d   :  { %v2241_v29 = vpop.eup %2240  ;;  %2256 = vpow2.f32 %v1767_v36  ;;  %v718_v52 = vmul.f32 1.442695, %v695_v12  ;;  %v772_v22 = vmul.f32 1.442695, %v749_v11  ;;  %v1024_v30 = vsub.f32 %v677_v63, %v1006_v57 }
 0x16e   :  { %v2243_v43 = vpop.eup %2242  ;;  %v1526_v38 = vadd.f32 %v2237_v23, %v1508_v2  ;;  %v1544_v26 = vmul.f32 %v2235_v35, %v1215_v27  ;;  %v1927_v4 = vmul.f32 5.0, %v2241_v29  ;;  %2258 = vpow2.f32 %v1821_v61 }
 0x16f   :  { %v2245_v18 = vpop.eup %2244  ;;  %2260 = vpow2.f32 %v718_v52  ;;  %v1047_v28 = vmul.f32 1.442695, %v1024_v30  ;;  %v1078_v59 = vsub.f32 %v969_v6, %v1006_v57  ;;  %v1334_v49 = vadd.f32 %v1316_v54, %v3954_v60 }
 0x170   :  { %v2247_v46 = vpop.eup %2246  ;;  %v1980_v40 = vmul.f32 %v2245_v18, %v3548_v62  ;;  %v1580_v7 = vadd.f32 %v1562_v20, %v1544_v26  ;;  %v1873_v56 = vmul.f32 %v2239_v44, %v1526_v38  ;;  %2262 = vpow2.f32 %v772_v22  ;;  %v3956_v38 = vld [vmem:[#allocation71_spill] sm:$0xff] }
 0x171   :  { %v798_v63 = vadd.f32 %v2247_v46, %v2243_v43  ;;  %v816_v0 = vmul.f32 2.0, %v2247_v46  ;;  %2264 = vpow2.f32 %v1047_v28  ;;  %v1101_v35 = vmul.f32 1.442695, %v1078_v59  ;;  %1353 = vst [vmem:[#allocation5 + $0x1d8] sm:$0xff] %v1334_v49 }
 0x172   :  { %1998 = vst [vmem:[#allocation6 + $0x78] sm:$0xff] %v1980_v40  ;;  %v1891_v42 = vadd.f32 %v2241_v29, %v1873_v56  ;;  %v1909_v12 = vmul.f32 %v2239_v44, %v1580_v7  ;;  %v1371_v11 = vmax.f32 %v1006_v57, %v1334_v49  ;;  %v1699_v54 = vadd.f32 %v3558_v5, %v3326_v53  ;;  %v3955_v53 = vld [vmem:[#allocation70_spill] sm:$0xff] }
 0x173   :  { %v834_v6 = vadd.f32 %v2243_v43, %v816_v0  ;;  %2266 = vpow2.f32 %v1101_v35  ;;  %v470_v62 = vmul.f32 %v3942_v17, %v3563_v13  ;;  %v618_v23 = vmul.f32 %v3943_v9, %v3563_v13 }
 0x174   :  { %v2249_v36 = vpop.eup %2248  ;;  %v3571_v61 = vadd.f32 %v1927_v4, %v1909_v12  ;;  %2268 = vrcp.f32 %v1891_v42  ;;  %v1389_v27 = vsub.f32 %v1006_v57, %v1371_v11  ;;  %v1443_v2 = vsub.f32 %v1334_v49, %v1371_v11  ;;  %1718 = vst [vmem:[#allocation5 + $0x268] sm:$0xff] %v1699_v54 }
 0x175   :  { %v2251_v44 = vpop.eup %2250  ;;  %v1127_v20 = vmul.f32 %v2249_v36, %v798_v63  ;;  %v1163_v29 = vmul.f32 %v2249_v36, %v834_v6  ;;  %v1736_v52 = vmax.f32 %v1371_v11, %v1699_v54  ;;  %v488_v5 = vadd.f32 %v470_v62, %v3955_v53  ;;  %v3957_v62 = vld [vmem:[#allocation72_spill] sm:$0xff]  ;;  %v3958_v36 = vld [vmem:[#allocation73_spill] sm:$0xff] }
 0x176   :  { %v1181_v22 = vmul.f32 3.0, %v2251_v44  ;;  %v1412_v30 = vmul.f32 1.442695, %v1389_v27  ;;  %v1466_v43 = vmul.f32 1.442695, %v1443_v2  ;;  %v636_v26 = vadd.f32 %v618_v23, %v3956_v38 }
 0x177   :  { %v1145_v18 = vadd.f32 %v2251_v44, %v1127_v20  ;;  %v1754_v28 = vsub.f32 %v1371_v11, %v1736_v52  ;;  %v1808_v59 = vsub.f32 %v1699_v54, %v1736_v52  ;;  %506 = vst [vmem:[#allocation5 + $0x8] sm:$0xff] %v488_v5  ;;  %v947_v57 = vmul.f32 %v3945_v58, %v3563_v13 }
 0x178   :  { %v2253_v4 = vpop.eup %2252  ;;  %v1199_v60 = vadd.f32 %v1181_v22, %v1163_v29  ;;  %2270 = vpow2.f32 %v1412_v30  ;;  %655 = vst [vmem:[#allocation5 + $0x98] sm:$0xff] %v636_v26  ;;  %v673_v49 = vmax.f32 %v488_v5, %v636_v26  ;;  %v1312_v46 = vmul.f32 %v3948_v45, %v3563_v13 }
 0x179   :  { %v2255_v40 = vpop.eup %2254  ;;  %v1492_v7 = vmul.f32 %v2253_v4, %v1145_v18  ;;  %2272 = vpow2.f32 %v1466_v43  ;;  %v1777_v56 = vmul.f32 1.442695, %v1754_v28  ;;  %v1831_v63 = vmul.f32 1.442695, %v1808_v59 }
 0x17a   :  { %v2257_v0 = vpop.eup %2256  ;;  %v1528_v35 = vmul.f32 %v2253_v4, %v1199_v60  ;;  %v1546_v42 = vmul.f32 4.0, %v2255_v40  ;;  %v691_v12 = vsub.f32 %v488_v5, %v673_v49  ;;  %v745_v11 = vsub.f32 %v636_v26, %v673_v49 }
 0x17b   :  { %v2259_v54 = vpop.eup %2258  ;;  %v1510_v6 = vadd.f32 %v2255_v40, %v1492_v7  ;;  %2274 = vpow2.f32 %v1777_v56  ;;  %v965_v23 = vadd.f32 %v947_v57, %v3957_v62  ;;  %v1330_v27 = vadd.f32 %v1312_v46, %v3958_v36  ;;  %v340_v56 = vpop.f32.mrf.mxu1 }
 0x17c   :  { %v2261_v2 = vpop.eup %2260  ;;  %v1564_v44 = vadd.f32 %v1546_v42, %v1528_v35  ;;  %v1911_v20 = vmul.f32 5.0, %v2259_v54  ;;  %2276 = vpow2.f32 %v1831_v63  ;;  %v710_v29 = vmul.f32 1.442695, %v691_v12 }
 0x17d   :  { %v2263_v52 = vpop.eup %2262  ;;  %v1857_v53 = vmul.f32 %v2257_v0, %v1510_v6  ;;  %v764_v22 = vmul.f32 1.442695, %v745_v11  ;;  %984 = vst [vmem:[#allocation5 + $0x128] sm:$0xff] %v965_v23  ;;  %v1002_v30 = vmax.f32 %v673_v49, %v965_v23  ;;  %1349 = vst [vmem:[#allocation5 + $0x1b8] sm:$0xff] %v1330_v27  ;;  %v1677_v5 = vmul.f32 %v3949_v55, %v3563_v13  ;;  %v3959_v6 = vld [vmem:[#allocation74_spill] sm:$0xff] }
 0x17e   :  { %v2265_v43 = vpop.eup %2264  ;;  %v1893_v38 = vmul.f32 %v2257_v0, %v1564_v44  ;;  %v803_v26 = vadd.f32 %v2263_v52, %v2261_v2  ;;  %v821_v18 = vmul.f32 2.0, %v2263_v52  ;;  %2278 = vpow2.f32 %v710_v29 }
 0x17f   :  { %v1875_v28 = vadd.f32 %v2259_v54, %v1857_v53  ;;  %2280 = vpow2.f32 %v764_v22  ;;  %v1020_v59 = vsub.f32 %v673_v49, %v1002_v30  ;;  %v1074_v57 = vsub.f32 %v965_v23, %v1002_v30 }
 0x180   :  { %v2267_v4 = vpop.eup %2266  ;;  %v3583_v60 = vadd.f32 %v1911_v20, %v1893_v38  ;;  %v839_v46 = vadd.f32 %v2261_v2, %v821_v18  ;;  %v1132_v40 = vmul.f32 %v2265_v43, %v803_v26  ;;  %v1367_v7 = vmax.f32 %v1002_v30, %v1330_v27 }
 0x181   :  { %v2269_v63 = vpop.eup %2268  ;;  %2282 = vrcp.f32 %v1875_v28  ;;  %v1186_v35 = vmul.f32 3.0, %v2267_v4  ;;  %v1039_v13 = vmul.f32 1.442695, %v1020_v59  ;;  %v1093_v42 = vmul.f32 1.442695, %v1074_v57 }
 0x182   :  { %v1981_v0 = vmul.f32 %v2269_v63, %v3571_v61  ;;  %v1150_v12 = vadd.f32 %v2267_v4, %v1132_v40  ;;  %v1168_v11 = vmul.f32 %v2265_v43, %v839_v46  ;;  %v1385_v54 = vsub.f32 %v1002_v30, %v1367_v7 }
 0x183   :  { %2284 = vpow2.f32 %v1039_v13  ;;  %v1439_v49 = vsub.f32 %v1330_v27, %v1367_v7  ;;  %v1695_v62 = vadd.f32 %v1677_v5, %v3959_v6  ;;  %v471_v23 = vmul.f32 %v3942_v17, %v340_v56 }
 0x184   :  { %1999 = vst [vmem:[#allocation6 + $0x80] sm:$0xff] %v1981_v0  ;;  %v1204_v36 = vadd.f32 %v1186_v35, %v1168_v11  ;;  %2286 = vpow2.f32 %v1093_v42  ;;  %v1404_v2 = vmul.f32 1.442695, %v1385_v54  ;;  %v619_v44 = vmul.f32 %v3943_v9, %v340_v56 }
 0x185   :  { %v2271_v20 = vpop.eup %2270  ;;  %v1458_v29 = vmul.f32 1.442695, %v1439_v49  ;;  %1714 = vst [vmem:[#allocation5 + $0x248] sm:$0xff] %v1695_v62  ;;  %v1732_v52 = vmax.f32 %v1367_v7, %v1695_v62  ;;  %v489_v61 = vadd.f32 %v471_v23, %v3331_v48  ;;  %v948_v53 = vmul.f32 %v3945_v58, %v340_v56 }
 0x186   :  { %v2273_v22 = vpop.eup %2272  ;;  %v1497_v27 = vmul.f32 %v2271_v20, %v1150_v12  ;;  %v1533_v30 = vmul.f32 %v2271_v20, %v1204_v36  ;;  %2288 = vpow2.f32 %v1404_v2  ;;  %v637_v5 = vadd.f32 %v619_v44, %v3335_v34 }
 0x187   :  { %v1551_v43 = vmul.f32 4.0, %v2273_v22  ;;  %2290 = vpow2.f32 %v1458_v29  ;;  %v1750_v38 = vsub.f32 %v1367_v7, %v1732_v52  ;;  %v1804_v26 = vsub.f32 %v1695_v62, %v1732_v52  ;;  %507 = vst [vmem:[#allocation5 + $0x10] sm:$0xff] %v489_v61  ;;  %v3960_v52 = vld [vmem:[#allocation47_spill] sm:$0xff] }
 0x188   :  { %v2275_v18 = vpop.eup %2274  ;;  %v1515_v28 = vadd.f32 %v2273_v22, %v1497_v27  ;;  %656 = vst [vmem:[#allocation5 + $0xa0] sm:$0xff] %v637_v5  ;;  %v674_v59 = vmax.f32 %v489_v61, %v637_v5  ;;  %v966_v57 = vadd.f32 %v948_v53, %v3340_v33  ;;  %v1313_v48 = vmul.f32 %v3948_v45, %v340_v56 }
 0x189   :  { %v2277_v4 = vpop.eup %2276  ;;  %v1569_v46 = vadd.f32 %v1551_v43, %v1533_v30  ;;  %v1769_v40 = vmul.f32 1.442695, %v1750_v38  ;;  %v1823_v63 = vmul.f32 1.442695, %v1804_v26  ;;  %v1678_v35 = vmul.f32 %v3949_v55, %v340_v56  ;;  %v215_v38 = vpop.f32.mrf.mxu0 }
 0x18a   :  { %v1862_v34 = vmul.f32 %v2275_v18, %v1515_v28  ;;  %v1916_v13 = vmul.f32 5.0, %v2277_v4  ;;  %v692_v42 = vsub.f32 %v489_v61, %v674_v59  ;;  %v746_v7 = vsub.f32 %v637_v5, %v674_v59  ;;  %985 = vst [vmem:[#allocation5 + $0x130] sm:$0xff] %v966_v57 }
 0x18b   :  { %v2279_v0 = vpop.eup %2278  ;;  %v1898_v12 = vmul.f32 %v2275_v18, %v1569_v46  ;;  %2292 = vpow2.f32 %v1769_v40  ;;  %v1003_v11 = vmax.f32 %v674_v59, %v966_v57  ;;  %v1331_v54 = vadd.f32 %v1313_v48, %v3344_v50 }
 0x18c   :  { %v2281_v33 = vpop.eup %2280  ;;  %v1880_v49 = vadd.f32 %v2277_v4, %v1862_v34  ;;  %2294 = vpow2.f32 %v1823_v63  ;;  %v712_v6 = vmul.f32 1.442695, %v692_v42  ;;  %v766_v62 = vmul.f32 1.442695, %v746_v7 }
 0x18d   :  { %v3596_v23 = vadd.f32 %v1916_v13, %v1898_v12  ;;  %v799_v36 = vadd.f32 %v2281_v33, %v2279_v0  ;;  %v817_v56 = vmul.f32 2.0, %v2281_v33  ;;  %v1021_v2 = vsub.f32 %v674_v59, %v1003_v11  ;;  %1350 = vst [vmem:[#allocation5 + $0x1c0] sm:$0xff] %v1331_v54 }
 0x18e   :  { %v2283_v44 = vpop.eup %2282  ;;  %2296 = vrcp.f32 %v1880_v49  ;;  %v1075_v20 = vsub.f32 %v966_v57, %v1003_v11  ;;  %v1368_v29 = vmax.f32 %v1003_v11, %v1331_v54  ;;  %v1696_v61 = vadd.f32 %v1678_v35, %v3960_v52  ;;  %v3961_v49 = vld [vmem:[#allocation75_spill] sm:$0xff] }
 0x18f   :  { %v1965_v53 = vmul.f32 %v2283_v44, %v3583_v60  ;;  %v835_v50 = vadd.f32 %v2279_v0, %v817_v56  ;;  %2298 = vpow2.f32 %v712_v6  ;;  %v1041_v22 = vmul.f32 1.442695, %v1021_v2  ;;  %v3605_v56 = vpop.f32.mrf.mxu1  ;;  %v3963_v44 = vld [vmem:[#allocation77_spill] sm:$0xff] }
 0x190   :  { %v2285_v27 = vpop.eup %2284  ;;  %2300 = vpow2.f32 %v766_v62  ;;  %v1095_v30 = vmul.f32 1.442695, %v1075_v20  ;;  %v1386_v5 = vsub.f32 %v1003_v11, %v1368_v29  ;;  %v1440_v43 = vsub.f32 %v1331_v54, %v1368_v29  ;;  %1715 = vst [vmem:[#allocation5 + $0x250] sm:$0xff] %v1696_v61  ;;  %v3962_v62 = vld [vmem:[#allocation76_spill] sm:$0xff] }
 0x191   :  { %v2287_v26 = vpop.eup %2286  ;;  %1983 = vst [vmem:[#allocation6] sm:$0xff] %v1965_v53  ;;  %v1128_v18 = vmul.f32 %v2285_v27, %v799_v36  ;;  %v1164_v28 = vmul.f32 %v2285_v27, %v835_v50  ;;  %2302 = vpow2.f32 %v1041_v22  ;;  %v1733_v59 = vmax.f32 %v1368_v29, %v1696_v61 }
 0x192   :  { %v1182_v57 = vmul.f32 3.0, %v2287_v26  ;;  %2304 = vpow2.f32 %v1095_v30  ;;  %v1406_v48 = vmul.f32 1.442695, %v1386_v5  ;;  %v1460_v60 = vmul.f32 1.442695, %v1440_v43  ;;  %v3964_v30 = vld [vmem:[#allocation78_spill] sm:$0xff] }
 0x193   :  { %v2289_v4 = vpop.eup %2288  ;;  %v1146_v46 = vadd.f32 %v2287_v26, %v1128_v18  ;;  %v1751_v40 = vsub.f32 %v1368_v29, %v1733_v59  ;;  %v1805_v63 = vsub.f32 %v1696_v61, %v1733_v59  ;;  %v472_v35 = vmul.f32 %v3942_v17, %v215_v38 }
 0x194   :  { %v2291_v34 = vpop.eup %2290  ;;  %v1200_v13 = vadd.f32 %v1182_v57, %v1164_v28  ;;  %2306 = vpow2.f32 %v1406_v48  ;;  %v620_v42 = vmul.f32 %v3943_v9, %v215_v38  ;;  %v949_v7 = vmul.f32 %v3945_v58, %v215_v38 }
 0x195   :  { %v1493_v0 = vmul.f32 %v2289_v4, %v1146_v46  ;;  %v1547_v12 = vmul.f32 4.0, %v2291_v34  ;;  %2308 = vpow2.f32 %v1460_v60  ;;  %v1771_v11 = vmul.f32 1.442695, %v1751_v40  ;;  %v3966_v40 = vld [vmem:[#allocation52_spill] sm:$0xff] }
 0x196   :  { %v1529_v54 = vmul.f32 %v2289_v4, %v1200_v13  ;;  %v1825_v33 = vmul.f32 1.442695, %v1805_v63  ;;  %v490_v6 = vadd.f32 %v472_v35, %v3961_v49  ;;  %v638_v36 = vadd.f32 %v620_v42, %v3962_v62  ;;  %v3967_v62 = vld [vmem:[#allocation53_spill] sm:$0xff] }
 0x197   :  { %v1511_v2 = vadd.f32 %v2291_v34, %v1493_v0  ;;  %2310 = vpow2.f32 %v1771_v11  ;;  %v967_v20 = vadd.f32 %v949_v7, %v3963_v44  ;;  %v1314_v29 = vmul.f32 %v3948_v45, %v215_v38 }
 0x198   :  { %v2293_v52 = vpop.eup %2292  ;;  %v1565_v61 = vadd.f32 %v1547_v12, %v1529_v54  ;;  %2312 = vpow2.f32 %v1825_v33  ;;  %508 = vst [vmem:[#allocation5 + $0x18] sm:$0xff] %v490_v6  ;;  %657 = vst [vmem:[#allocation5 + $0xa8] sm:$0xff] %v638_v36  ;;  %v675_v53 = vmax.f32 %v490_v6, %v638_v36  ;;  %v1679_v50 = vmul.f32 %v3949_v55, %v215_v38  ;;  %v3965_v38 = vld [vmem:[#allocation79_spill] sm:$0xff] }
 0x199   :  { %v2295_v22 = vpop.eup %2294  ;;  %v1858_v27 = vmul.f32 %v2293_v52, %v1511_v2  ;;  %986 = vst [vmem:[#allocation5 + $0x138] sm:$0xff] %v967_v20  ;;  %v1332_v5 = vadd.f32 %v1314_v29, %v3964_v30  ;;  %v480_v43 = vmul.f32 %v3605_v56, %v3942_v17  ;;  %v628_v26 = vmul.f32 %v3605_v56, %v3943_v9 }
 0x19a   :  { %v1894_v18 = vmul.f32 %v2293_v52, %v1565_v61  ;;  %v1912_v28 = vmul.f32 5.0, %v2295_v22  ;;  %v693_v59 = vsub.f32 %v490_v6, %v675_v53  ;;  %v747_v57 = vsub.f32 %v638_v36, %v675_v53 }
 0x19b   :  { %v2297_v48 = vpop.eup %2296  ;;  %v1876_v60 = vadd.f32 %v2295_v22, %v1858_v27  ;;  %v1004_v4 = vmax.f32 %v675_v53, %v967_v20  ;;  %1351 = vst [vmem:[#allocation5 + $0x1c8] sm:$0xff] %v1332_v5  ;;  %v1697_v46 = vadd.f32 %v1679_v50, %v3965_v38  ;;  %v498_v63 = vadd.f32 %v480_v43, %v3966_v40 }
 0x19c   :  { %v2299_v35 = vpop.eup %2298  ;;  %v1970_v34 = vmul.f32 %v2297_v48, %v3596_v23  ;;  %v3618_v13 = vadd.f32 %v1912_v28, %v1894_v18  ;;  %v714_v42 = vmul.f32 1.442695, %v693_v59  ;;  %v768_v7 = vmul.f32 1.442695, %v747_v57 }
 0x19d   :  { %v2301_v0 = vpop.eup %2300  ;;  %2314 = vrcp.f32 %v1876_v60  ;;  %v1022_v12 = vsub.f32 %v675_v53, %v1004_v4  ;;  %v1076_v11 = vsub.f32 %v967_v20, %v1004_v4  ;;  %v1369_v54 = vmax.f32 %v1004_v4, %v1332_v5  ;;  %1716 = vst [vmem:[#allocation5 + $0x258] sm:$0xff] %v1697_v46  ;;  %516 = vst [vmem:[#allocation5 + $0x58] sm:$0xff] %v498_v63 }
 0x19e   :  { %v2303_v33 = vpop.eup %2302  ;;  %1988 = vst [vmem:[#allocation6 + $0x28] sm:$0xff] %v1970_v34  ;;  %v800_v49 = vadd.f32 %v2301_v0, %v2299_v35  ;;  %v818_v6 = vmul.f32 2.0, %v2301_v0  ;;  %2316 = vpow2.f32 %v714_v42  ;;  %v646_v36 = vadd.f32 %v628_v26, %v3967_v62 }
 0x19f   :  { %v2305_v2 = vpop.eup %2304  ;;  %2318 = vpow2.f32 %v768_v7  ;;  %v1043_v23 = vmul.f32 1.442695, %v1022_v12  ;;  %v1097_v44 = vmul.f32 1.442695, %v1076_v11  ;;  %v1387_v29 = vsub.f32 %v1004_v4, %v1369_v54 }
 0x1a0   :  { %v836_v52 = vadd.f32 %v2299_v35, %v818_v6  ;;  %v1129_v61 = vmul.f32 %v2303_v33, %v800_v49  ;;  %v1183_v50 = vmul.f32 3.0, %v2305_v2  ;;  %v1441_v53 = vsub.f32 %v1332_v5, %v1369_v54  ;;  %665 = vst [vmem:[#allocation5 + $0xe8] sm:$0xff] %v646_v36  ;;  %v3623_v49 = vpop.f32.mrf.mxu0 }
 0x1a1   :  { %v2307_v20 = vpop.eup %2306  ;;  %2320 = vpow2.f32 %v1043_v23  ;;  %v1408_v22 = vmul.f32 1.442695, %v1387_v29  ;;  %v1734_v27 = vmax.f32 %v1369_v54, %v1697_v46  ;;  %v683_v30 = vmax.f32 %v498_v63, %v646_v36 }
 0x1a2   :  { %v2309_v43 = vpop.eup %2308  ;;  %v1147_v18 = vadd.f32 %v2305_v2, %v1129_v61  ;;  %v1165_v28 = vmul.f32 %v2303_v33, %v836_v52  ;;  %2322 = vpow2.f32 %v1097_v44  ;;  %v1462_v26 = vmul.f32 1.442695, %v1441_v53 }
 0x1a3   :  { %v1548_v59 = vmul.f32 4.0, %v2309_v43  ;;  %2324 = vpow2.f32 %v1408_v22  ;;  %v1752_v57 = vsub.f32 %v1369_v54, %v1734_v27  ;;  %v1806_v48 = vsub.f32 %v1697_v46, %v1734_v27 }
 0x1a4   :  { %v2311_v60 = vpop.eup %2310  ;;  %v1201_v4 = vadd.f32 %v1183_v50, %v1165_v28  ;;  %v1494_v38 = vmul.f32 %v2307_v20, %v1147_v18  ;;  %2326 = vpow2.f32 %v1462_v26  ;;  %v701_v5 = vsub.f32 %v498_v63, %v683_v30 }
 0x1a5   :  { %v2313_v40 = vpop.eup %2312  ;;  %v1773_v35 = vmul.f32 1.442695, %v1752_v57  ;;  %v1827_v34 = vmul.f32 1.442695, %v1806_v48  ;;  %v755_v42 = vsub.f32 %v646_v36, %v683_v30  ;;  %v957_v7 = vmul.f32 %v3605_v56, %v3945_v58 }
 0x1a6   :  { %v1512_v0 = vadd.f32 %v2309_v43, %v1494_v38  ;;  %v1530_v12 = vmul.f32 %v2307_v20, %v1201_v4  ;;  %v1913_v11 = vmul.f32 5.0, %v2313_v40  ;;  %v730_v33 = vmul.f32 1.442695, %v701_v5  ;;  %v3969_v4 = vld [vmem:[#allocation81_spill] sm:$0xff] }
 0x1a7   :  { %2328 = vpow2.f32 %v1773_v35  ;;  %v784_v46 = vmul.f32 1.442695, %v755_v42  ;;  %v975_v54 = vadd.f32 %v957_v7, %v3383_v51  ;;  %v1322_v63 = vmul.f32 %v3605_v56, %v3948_v45 }
 0x1a8   :  { %v1566_v6 = vadd.f32 %v1548_v59, %v1530_v12  ;;  %v1859_v62 = vmul.f32 %v2311_v60, %v1512_v0  ;;  %2330 = vpow2.f32 %v1827_v34  ;;  %v1687_v36 = vmul.f32 %v3605_v56, %v3949_v55 }
 0x1a9   :  { %2332 = vpow2.f32 %v730_v33  ;;  %994 = vst [vmem:[#allocation5 + $0x178] sm:$0xff] %v975_v54  ;;  %v1012_v2 = vmax.f32 %v683_v30, %v975_v54  ;;  %v1340_v23 = vadd.f32 %v1322_v63, %v3390_v21  ;;  %v473_v44 = vmul.f32 %v3942_v17, %v3623_v49  ;;  %v3968_v21 = vld [vmem:[#allocation80_spill] sm:$0xff] }
 0x1aa   :  { %v2315_v29 = vpop.eup %2314  ;;  %v1877_v52 = vadd.f32 %v2313_v40, %v1859_v62  ;;  %v1895_v51 = vmul.f32 %v2311_v60, %v1566_v6  ;;  %2334 = vpow2.f32 %v784_v46  ;;  %v1705_v61 = vadd.f32 %v1687_v36, %v3393_v3  ;;  %v3970_v36 = vld [vmem:[#allocation82_spill] sm:$0xff] }
 0x1ab   :  { %v2317_v50 = vpop.eup %2316  ;;  %v1966_v53 = vmul.f32 %v2315_v29, %v3618_v13  ;;  %v1030_v20 = vsub.f32 %v683_v30, %v1012_v2  ;;  %v1084_v22 = vsub.f32 %v975_v54, %v1012_v2  ;;  %1359 = vst [vmem:[#allocation5 + $0x208] sm:$0xff] %v1340_v23  ;;  %v1377_v56 = vmax.f32 %v1012_v2, %v1340_v23 }
 0x1ac   :  { %v2319_v27 = vpop.eup %2318  ;;  %v3635_v43 = vadd.f32 %v1913_v11, %v1895_v51  ;;  %2336 = vrcp.f32 %v1877_v52  ;;  %1724 = vst [vmem:[#allocation5 + $0x298] sm:$0xff] %v1705_v61  ;;  %v491_v18 = vadd.f32 %v473_v44, %v3968_v21  ;;  %v621_v28 = vmul.f32 %v3943_v9, %v3623_v49 }
 0x1ad   :  { %1984 = vst [vmem:[#allocation6 + $0x8] sm:$0xff] %v1966_v53  ;;  %v801_v26 = vadd.f32 %v2319_v27, %v2317_v50  ;;  %v819_v3 = vmul.f32 2.0, %v2319_v27  ;;  %v1059_v59 = vmul.f32 1.442695, %v1030_v20  ;;  %v1113_v57 = vmul.f32 1.442695, %v1084_v22 }
 0x1ae   :  { %v2321_v13 = vpop.eup %2320  ;;  %v1395_v30 = vsub.f32 %v1012_v2, %v1377_v56  ;;  %v1449_v48 = vsub.f32 %v1340_v23, %v1377_v56  ;;  %v1742_v60 = vmax.f32 %v1377_v56, %v1705_v61  ;;  %509 = vst [vmem:[#allocation5 + $0x20] sm:$0xff] %v491_v18  ;;  %v639_v38 = vadd.f32 %v621_v28, %v3969_v4  ;;  %v3971_v4 = vld [vmem:[#allocation83_spill] sm:$0xff] }
 0x1af   :  { %v2323_v5 = vpop.eup %2322  ;;  %v837_v40 = vadd.f32 %v2317_v50, %v819_v3  ;;  %v1130_v35 = vmul.f32 %v2321_v13, %v801_v26  ;;  %2338 = vpow2.f32 %v1059_v59  ;;  %v950_v34 = vmul.f32 %v3945_v58, %v3623_v49 }
 0x1b0   :  { %v2325_v42 = vpop.eup %2324  ;;  %v1184_v7 = vmul.f32 3.0, %v2323_v5  ;;  %2340 = vpow2.f32 %v1113_v57  ;;  %v1424_v0 = vmul.f32 1.442695, %v1395_v30  ;;  %v1478_v12 = vmul.f32 1.442695, %v1449_v48  ;;  %658 = vst [vmem:[#allocation5 + $0xb0] sm:$0xff] %v639_v38 }
 0x1b1   :  { %v2327_v11 = vpop.eup %2326  ;;  %v1148_v33 = vadd.f32 %v2323_v5, %v1130_v35  ;;  %v1166_v46 = vmul.f32 %v2321_v13, %v837_v40  ;;  %v1760_v54 = vsub.f32 %v1377_v56, %v1742_v60  ;;  %v1814_v63 = vsub.f32 %v1705_v61, %v1742_v60  ;;  %v350_v5 = vpop.f32.mrf.mxu1 }
 0x1b2   :  { %v1549_v6 = vmul.f32 4.0, %v2327_v11  ;;  %2342 = vpow2.f32 %v1424_v0  ;;  %v676_v62 = vmax.f32 %v491_v18, %v639_v38  ;;  %v968_v2 = vadd.f32 %v950_v34, %v3970_v36 }
 0x1b3   :  { %v1202_v23 = vadd.f32 %v1184_v7, %v1166_v46  ;;  %v1495_v44 = vmul.f32 %v2325_v42, %v1148_v33  ;;  %2344 = vpow2.f32 %v1478_v12  ;;  %v1789_v29 = vmul.f32 1.442695, %v1760_v54 }
 0x1b4   :  { %v2329_v52 = vpop.eup %2328  ;;  %v1843_v51 = vmul.f32 1.442695, %v1814_v63  ;;  %v694_v50 = vsub.f32 %v491_v18, %v676_v62  ;;  %v748_v53 = vsub.f32 %v639_v38, %v676_v62  ;;  %987 = vst [vmem:[#allocation5 + $0x140] sm:$0xff] %v968_v2  ;;  %v1005_v20 = vmax.f32 %v676_v62, %v968_v2 }
 0x1b5   :  { %v2331_v22 = vpop.eup %2330  ;;  %v1513_v27 = vadd.f32 %v2327_v11, %v1495_v44  ;;  %v1531_v21 = vmul.f32 %v2325_v42, %v1202_v23  ;;  %2346 = vpow2.f32 %v1789_v29  ;;  %v1315_v61 = vmul.f32 %v3948_v45, %v3623_v49  ;;  %v3972_v44 = vld [vmem:[#allocation84_spill] sm:$0xff] }
 0x1b6   :  { %v2333_v56 = vpop.eup %2332  ;;  %v1914_v28 = vmul.f32 5.0, %v2331_v22  ;;  %2348 = vpow2.f32 %v1843_v51  ;;  %v716_v26 = vmul.f32 1.442695, %v694_v50  ;;  %v770_v3 = vmul.f32 1.442695, %v748_v53 }
 0x1b7   :  { %v2335_v59 = vpop.eup %2334  ;;  %v1567_v57 = vadd.f32 %v1549_v6, %v1531_v21  ;;  %v1860_v13 = vmul.f32 %v2329_v52, %v1513_v27  ;;  %v1023_v30 = vsub.f32 %v676_v62, %v1005_v20  ;;  %v1077_v18 = vsub.f32 %v968_v2, %v1005_v20 }
 0x1b8   :  { %v809_v48 = vadd.f32 %v2335_v59, %v2333_v56  ;;  %v827_v60 = vmul.f32 2.0, %v2335_v59  ;;  %2350 = vpow2.f32 %v716_v26  ;;  %v1333_v38 = vadd.f32 %v1315_v61, %v3971_v4 }
 0x1b9   :  { %v2337_v40 = vpop.eup %2336  ;;  %v1878_v35 = vadd.f32 %v2331_v22, %v1860_v13  ;;  %v1896_v34 = vmul.f32 %v2329_v52, %v1567_v57  ;;  %2352 = vpow2.f32 %v770_v3  ;;  %v1045_v42 = vmul.f32 1.442695, %v1023_v30 }
 0x1ba   :  { %v1967_v7 = vmul.f32 %v2337_v40, %v3635_v43  ;;  %v845_v0 = vadd.f32 %v2333_v56, %v827_v60  ;;  %v1099_v12 = vmul.f32 1.442695, %v1077_v18  ;;  %1352 = vst [vmem:[#allocation5 + $0x1d0] sm:$0xff] %v1333_v38  ;;  %v1370_v11 = vmax.f32 %v1005_v20, %v1333_v38 }
 0x1bb   :  { %v3648_v33 = vadd.f32 %v1914_v28, %v1896_v34  ;;  %2354 = vrcp.f32 %v1878_v35  ;;  %v1680_v46 = vmul.f32 %v3949_v55, %v3623_v49  ;;  %v477_v54 = vmul.f32 %v3942_v17, %v350_v5 }
 0x1bc   :  { %v2339_v63 = vpop.eup %2338  ;;  %1985 = vst [vmem:[#allocation6 + $0x10] sm:$0xff] %v1967_v7  ;;  %2356 = vpow2.f32 %v1045_v42  ;;  %v1388_v6 = vsub.f32 %v1005_v20, %v1370_v11  ;;  %v1442_v62 = vsub.f32 %v1333_v38, %v1370_v11  ;;  %v625_v36 = vmul.f32 %v3943_v9, %v350_v5 }
 0x1bd   :  { %v2341_v43 = vpop.eup %2340  ;;  %v1138_v2 = vmul.f32 %v2339_v63, %v809_v48  ;;  %v1174_v23 = vmul.f32 %v2339_v63, %v845_v0  ;;  %2358 = vpow2.f32 %v1099_v12  ;;  %v1698_v29 = vadd.f32 %v1680_v46, %v3972_v44 }
 0x1be   :  { %v1192_v52 = vmul.f32 3.0, %v2341_v43  ;;  %v1410_v51 = vmul.f32 1.442695, %v1388_v6  ;;  %v1464_v50 = vmul.f32 1.442695, %v1442_v62  ;;  %v495_v49 = vadd.f32 %v477_v54, %v3409_v24 }
 0x1bf   :  { %v2343_v53 = vpop.eup %2342  ;;  %v1156_v22 = vadd.f32 %v2341_v43, %v1138_v2  ;;  %1717 = vst [vmem:[#allocation5 + $0x260] sm:$0xff] %v1698_v29  ;;  %v1735_v27 = vmax.f32 %v1370_v11, %v1698_v29  ;;  %v643_v20 = vadd.f32 %v625_v36, %v3424_v1  ;;  %v954_v21 = vmul.f32 %v3945_v58, %v350_v5 }
 0x1c0   :  { %v2345_v61 = vpop.eup %2344  ;;  %v1210_v56 = vadd.f32 %v1192_v52, %v1174_v23  ;;  %2360 = vpow2.f32 %v1410_v51  ;;  %513 = vst [vmem:[#allocation5 + $0x40] sm:$0xff] %v495_v49  ;;  %v1319_v28 = vmul.f32 %v3948_v45, %v350_v5  ;;  %v1684_v26 = vmul.f32 %v3949_v55, %v350_v5  ;;  %v3665_v5 = vpop.f32.mrf.mxu0 }
 0x1c1   :  { %v1503_v3 = vmul.f32 %v2343_v53, %v1156_v22  ;;  %v1557_v59 = vmul.f32 4.0, %v2345_v61  ;;  %2362 = vpow2.f32 %v1464_v50  ;;  %v1753_v24 = vsub.f32 %v1370_v11, %v1735_v27  ;;  %662 = vst [vmem:[#allocation5 + $0xd0] sm:$0xff] %v643_v20 }
 0x1c2   :  { %v2347_v57 = vpop.eup %2346  ;;  %v1539_v13 = vmul.f32 %v2343_v53, %v1210_v56  ;;  %v1807_v30 = vsub.f32 %v1698_v29, %v1735_v27  ;;  %v680_v18 = vmax.f32 %v495_v49, %v643_v20  ;;  %v972_v1 = vadd.f32 %v954_v21, %v3428_v41 }
 0x1c3   :  { %v2349_v48 = vpop.eup %2348  ;;  %v1521_v60 = vadd.f32 %v2345_v61, %v1503_v3  ;;  %v1775_v4 = vmul.f32 1.442695, %v1753_v24  ;;  %v1337_v38 = vadd.f32 %v1319_v28, %v3431_v8  ;;  %v3663_v40 = vadd.f32 %v1684_v26, %v3434_v32  ;;  %v3973_v3 = vld [vmem:[#allocation86_spill] sm:$0xff] }
 0x1c4   :  { %v1575_v35 = vadd.f32 %v1557_v59, %v1539_v13  ;;  %v1922_v34 = vmul.f32 5.0, %v2349_v48  ;;  %v1829_v42 = vmul.f32 1.442695, %v1807_v30  ;;  %v698_v7 = vsub.f32 %v495_v49, %v680_v18  ;;  %991 = vst [vmem:[#allocation5 + $0x160] sm:$0xff] %v972_v1 }
 0x1c5   :  { %v2351_v0 = vpop.eup %2350  ;;  %v1868_v12 = vmul.f32 %v2347_v57, %v1521_v60  ;;  %2364 = vpow2.f32 %v1775_v4  ;;  %v752_v11 = vsub.f32 %v643_v20, %v680_v18  ;;  %v1009_v41 = vmax.f32 %v680_v18, %v972_v1  ;;  %1356 = vst [vmem:[#allocation5 + $0x1f0] sm:$0xff] %v1337_v38  ;;  %1721 = vst [vmem:[#allocation5 + $0x280] sm:$0xff] %v3663_v40 }
 0x1c6   :  { %v2353_v46 = vpop.eup %2352  ;;  %v1904_v8 = vmul.f32 %v2347_v57, %v1575_v35  ;;  %2366 = vpow2.f32 %v1829_v42  ;;  %v724_v32 = vmul.f32 1.442695, %v698_v7  ;;  %v475_v54 = vmul.f32 %v3942_v17, %v3665_v5 }
 0x1c7   :  { %v1886_v63 = vadd.f32 %v2349_v48, %v1868_v12  ;;  %v802_v6 = vadd.f32 %v2353_v46, %v2351_v0  ;;  %v820_v62 = vmul.f32 2.0, %v2353_v46  ;;  %v778_v36 = vmul.f32 1.442695, %v752_v11  ;;  %v3974_v11 = vld [vmem:[#allocation87_spill] sm:$0xff] }
 0x1c8   :  { %v2355_v43 = vpop.eup %2354  ;;  %v3670_v2 = vadd.f32 %v1922_v34, %v1904_v8  ;;  %2368 = vpow2.f32 %v724_v32  ;;  %v1027_v23 = vsub.f32 %v680_v18, %v1009_v41  ;;  %v1081_v44 = vsub.f32 %v972_v1, %v1009_v41  ;;  %v3680_v34 = vpop.f32.mrf.mxu1 }
 0x1c9   :  { %v2357_v29 = vpop.eup %2356  ;;  %v1968_v52 = vmul.f32 %v2355_v43, %v3648_v33  ;;  %2370 = vrcp.f32 %v1886_v63  ;;  %v838_v51 = vadd.f32 %v2351_v0, %v820_v62  ;;  %v1374_v50 = vmax.f32 %v1009_v41, %v1337_v38 }
 0x1ca   :  { %v2359_v49 = vpop.eup %2358  ;;  %v1131_v53 = vmul.f32 %v2357_v29, %v802_v6  ;;  %2372 = vpow2.f32 %v778_v36  ;;  %v1053_v22 = vmul.f32 1.442695, %v1027_v23  ;;  %v1107_v27 = vmul.f32 1.442695, %v1081_v44 }
 0x1cb   :  { %1986 = vst [vmem:[#allocation6 + $0x18] sm:$0xff] %v1968_v52  ;;  %v1167_v20 = vmul.f32 %v2357_v29, %v838_v51  ;;  %v1185_v21 = vmul.f32 3.0, %v2359_v49  ;;  %v1392_v61 = vsub.f32 %v1009_v41, %v1374_v50  ;;  %v1446_v56 = vsub.f32 %v1337_v38, %v1374_v50  ;;  %v3976_v29 = vld [vmem:[#allocation89_spill] sm:$0xff]  ;;  %v3977_v51 = vld [vmem:[#allocation90_spill] sm:$0xff] }
 0x1cc   :  { %v1149_v28 = vadd.f32 %v2359_v49, %v1131_v53  ;;  %2374 = vpow2.f32 %v1053_v22  ;;  %v1739_v26 = vmax.f32 %v1374_v50, %v3663_v40  ;;  %v493_v59 = vadd.f32 %v475_v54, %v3973_v3 }
 0x1cd   :  { %v2361_v33 = vpop.eup %2360  ;;  %v1203_v24 = vadd.f32 %v1185_v21, %v1167_v20  ;;  %2376 = vpow2.f32 %v1107_v27  ;;  %v1418_v57 = vmul.f32 1.442695, %v1392_v61  ;;  %v1472_v13 = vmul.f32 1.442695, %v1446_v56 }
 0x1ce   :  { %v2363_v30 = vpop.eup %2362  ;;  %v1496_v18 = vmul.f32 %v2361_v33, %v1149_v28  ;;  %v1757_v1 = vsub.f32 %v1374_v50, %v1739_v26  ;;  %v1811_v48 = vsub.f32 %v3663_v40, %v1739_v26  ;;  %511 = vst [vmem:[#allocation5 + $0x30] sm:$0xff] %v493_v59  ;;  %v623_v60 = vmul.f32 %v3943_v9, %v3665_v5  ;;  %v3975_v40 = vld [vmem:[#allocation88_spill] sm:$0xff] }
 0x1cf   :  { %v1532_v4 = vmul.f32 %v2361_v33, %v1203_v24  ;;  %v1550_v38 = vmul.f32 4.0, %v2363_v30  ;;  %2378 = vpow2.f32 %v1418_v57  ;;  %v952_v35 = vmul.f32 %v3945_v58, %v3665_v5 }
 0x1d0   :  { %v1514_v42 = vadd.f32 %v2363_v30, %v1496_v18  ;;  %2380 = vpow2.f32 %v1472_v13  ;;  %v1783_v7 = vmul.f32 1.442695, %v1757_v1  ;;  %v1837_v0 = vmul.f32 1.442695, %v1811_v48 }
 0x1d1   :  { %v1568_v12 = vadd.f32 %v1550_v38, %v1532_v4  ;;  %v641_v41 = vadd.f32 %v623_v60, %v3974_v11  ;;  %v970_v46 = vadd.f32 %v952_v35, %v3975_v40  ;;  %v1317_v8 = vmul.f32 %v3948_v45, %v3665_v5 }
 0x1d2   :  { %v2365_v32 = vpop.eup %2364  ;;  %2382 = vpow2.f32 %v1783_v7  ;;  %v1682_v54 = vmul.f32 %v3949_v55, %v3665_v5  ;;  %v486_v63 = vmul.f32 %v3680_v34, %v3942_v17  ;;  %v634_v6 = vmul.f32 %v3680_v34, %v3943_v9 }
 0x1d3   :  { %v2367_v62 = vpop.eup %2366  ;;  %v1861_v36 = vmul.f32 %v2365_v32, %v1514_v42  ;;  %v1897_v43 = vmul.f32 %v2365_v32, %v1568_v12  ;;  %2384 = vpow2.f32 %v1837_v0  ;;  %660 = vst [vmem:[#allocation5 + $0xc0] sm:$0xff] %v641_v41  ;;  %v678_v23 = vmax.f32 %v493_v59, %v641_v41  ;;  %989 = vst [vmem:[#allocation5 + $0x150] sm:$0xff] %v970_v46 }
 0x1d4   :  { %v1915_v44 = vmul.f32 5.0, %v2367_v62  ;;  %v1335_v52 = vadd.f32 %v1317_v8, %v3976_v29  ;;  %v3694_v50 = vadd.f32 %v1682_v54, %v3977_v51  ;;  %v504_v5 = vadd.f32 %v486_v63, %v3470_v37 }
 0x1d5   :  { %v2369_v49 = vpop.eup %2368  ;;  %v1879_v53 = vadd.f32 %v2367_v62, %v1861_v36  ;;  %v696_v22 = vsub.f32 %v493_v59, %v678_v23  ;;  %v750_v27 = vsub.f32 %v641_v41, %v678_v23  ;;  %v1007_v20 = vmax.f32 %v678_v23, %v970_v46 }
 0x1d6   :  { %v2371_v21 = vpop.eup %2370  ;;  %v3697_v61 = vadd.f32 %v1915_v44, %v1897_v43  ;;  %1354 = vst [vmem:[#allocation5 + $0x1e0] sm:$0xff] %v1335_v52  ;;  %1719 = vst [vmem:[#allocation5 + $0x270] sm:$0xff] %v3694_v50  ;;  %v652_v56 = vadd.f32 %v634_v6, %v3473_v16  ;;  %v963_v28 = vmul.f32 %v3680_v34, %v3945_v58 }
 0x1d7   :  { %522 = vst [vmem:[#allocation5 + $0x88] sm:$0xff] %v504_v5  ;;  %v1328_v37 = vmul.f32 %v3680_v34, %v3948_v45  ;;  %v2373_v26 = vpop.eup %2372  ;;  %v1976_v3 = vmul.f32 %v2371_v21, %v3670_v2  ;;  %2386 = vrcp.f32 %v1879_v53  ;;  %v720_v59 = vmul.f32 1.442695, %v696_v22 }
 0x1d8   :  { %v774_v33 = vmul.f32 1.442695, %v750_v27  ;;  %v806_v24 = vadd.f32 %v2373_v26, %v2369_v49  ;;  %v824_v57 = vmul.f32 2.0, %v2373_v26  ;;  %v1025_v13 = vsub.f32 %v678_v23, %v1007_v20  ;;  %671 = vst [vmem:[#allocation5 + $0x118] sm:$0xff] %v652_v56  ;;  %v3978_v26 = vld [vmem:[#allocation11_spill] sm:$0xff] }
 0x1d9   :  { %v1079_v30 = vsub.f32 %v970_v46, %v1007_v20  ;;  %v2375_v18 = vpop.eup %2374  ;;  %1994 = vst [vmem:[#allocation6 + $0x58] sm:$0xff] %v1976_v3  ;;  %2388 = vpow2.f32 %v720_v59  ;;  %v1372_v16 = vmax.f32 %v1007_v20, %v1335_v52  ;;  %v689_v1 = vmax.f32 %v504_v5, %v652_v56  ;;  %v3979_v3 = vld [vmem:[#allocation91_spill] sm:$0xff] }
 0x1da   :  { %v3707_v48 = vadd.f32 %v963_v28, %v3480_v25  ;;  %v2377_v60 = vpop.eup %2376  ;;  %v842_v4 = vadd.f32 %v2369_v49, %v824_v57  ;;  %v1135_v38 = vmul.f32 %v2375_v18, %v806_v24  ;;  %2390 = vpow2.f32 %v774_v33 }
 0x1db   :  { %v1049_v2 = vmul.f32 1.442695, %v1025_v13  ;;  %v1189_v35 = vmul.f32 3.0, %v2377_v60  ;;  %v1103_v42 = vmul.f32 1.442695, %v1079_v30  ;;  %v1390_v7 = vsub.f32 %v1007_v20, %v1372_v16 }
 0x1dc   :  { %v1444_v0 = vsub.f32 %v1335_v52, %v1372_v16  ;;  %1000 = vst [vmem:[#allocation5 + $0x1a8] sm:$0xff] %v3707_v48  ;;  %v2379_v12 = vpop.eup %2378  ;;  %v1153_v11 = vadd.f32 %v2377_v60, %v1135_v38  ;;  %v1171_v41 = vmul.f32 %v2375_v18, %v842_v4  ;;  %v1737_v40 = vmax.f32 %v1372_v16, %v3694_v50 }
 0x1dd   :  { %2392 = vpow2.f32 %v1049_v2  ;;  %v2381_v46 = vpop.eup %2380  ;;  %v1414_v25 = vmul.f32 1.442695, %v1390_v7  ;;  %v707_v32 = vsub.f32 %v504_v5, %v689_v1  ;;  %v761_v44 = vsub.f32 %v652_v56, %v689_v1  ;;  %v3716_v56 = vpop.f32.mrf.mxu0 }
 0x1de   :  { %2394 = vpow2.f32 %v1103_v42  ;;  %v1468_v8 = vmul.f32 1.442695, %v1444_v0  ;;  %v1207_v54 = vadd.f32 %v1189_v35, %v1171_v41  ;;  %v1500_v63 = vmul.f32 %v2379_v12, %v1153_v11 }
 0x1df   :  { %v1554_v6 = vmul.f32 4.0, %v2381_v46  ;;  %v1755_v62 = vsub.f32 %v1372_v16, %v1737_v40  ;;  %v2383_v36 = vpop.eup %2382  ;;  %2396 = vpow2.f32 %v1414_v25  ;;  %v1809_v43 = vsub.f32 %v3694_v50, %v1737_v40 }
 0x1e0   :  { %v742_v23 = vmul.f32 1.442695, %v707_v32  ;;  %v2385_v29 = vpop.eup %2384  ;;  %v1518_v52 = vadd.f32 %v2381_v46, %v1500_v63  ;;  %v1536_v51 = vmul.f32 %v2379_v12, %v1207_v54  ;;  %2398 = vpow2.f32 %v1468_v8  ;;  %v3980_v8 = vld [vmem:[#allocation19_spill] sm:$0xff]  ;;  %v3981_v32 = vld [vmem:[#allocation92_spill] sm:$0xff] }
 0x1e1   :  { %v1779_v49 = vmul.f32 1.442695, %v1755_v62  ;;  %v1919_v53 = vmul.f32 5.0, %v2385_v29  ;;  %v1833_v22 = vmul.f32 1.442695, %v1809_v43  ;;  %v1018_v21 = vmax.f32 %v689_v1, %v3707_v48 }
 0x1e2   :  { %2400 = vpow2.f32 %v742_v23  ;;  %v796_v27 = vmul.f32 1.442695, %v761_v44  ;;  %v1572_v5 = vadd.f32 %v1554_v6, %v1536_v51  ;;  %v1865_v20 = vmul.f32 %v2383_v36, %v1518_v52  ;;  %v3982_v51 = vld [vmem:[#allocation28_spill] sm:$0xff] }
 0x1e3   :  { %2402 = vpow2.f32 %v1779_v49  ;;  %v1346_v28 = vadd.f32 %v1328_v37, %v3483_v47  ;;  %v1693_v50 = vmul.f32 %v3680_v34, %v3949_v55  ;;  %v456_v59 = vadd.f32 %v3979_v3, %v3978_v26  ;;  %v3983_v49 = vld [vmem:[#allocation93_spill] sm:$0xff] }
 0x1e4   :  { %2404 = vpow2.f32 %v1833_v22  ;;  %v2387_v33 = vpop.eup %2386  ;;  %v1883_v24 = vadd.f32 %v2385_v29, %v1865_v20  ;;  %v1901_v57 = vmul.f32 %v2383_v36, %v1572_v5  ;;  %v1036_v13 = vsub.f32 %v689_v1, %v1018_v21  ;;  %v3984_v3 = vld [vmem:[#allocation37_spill] sm:$0xff] }
 0x1e5   :  { %2406 = vpow2.f32 %v796_v27  ;;  %v1969_v30 = vmul.f32 %v2387_v33, %v3697_v61  ;;  %v1090_v18 = vsub.f32 %v3707_v48, %v1018_v21  ;;  %1365 = vst [vmem:[#allocation5 + $0x238] sm:$0xff] %v1346_v28  ;;  %v1383_v16 = vmax.f32 %v1018_v21, %v1346_v28 }
 0x1e6   :  { %v1711_v47 = vadd.f32 %v1693_v50, %v3493_v14  ;;  %v2389_v37 = vpop.eup %2388  ;;  %v3723_v34 = vadd.f32 %v1919_v53, %v1901_v57  ;;  %2408 = vrcp.f32 %v1883_v24  ;;  %v1071_v60 = vmul.f32 1.442695, %v1036_v13 }
 0x1e7   :  { %v476_v4 = vmul.f32 %v3942_v17, %v3716_v56  ;;  %v2391_v38 = vpop.eup %2390  ;;  %1987 = vst [vmem:[#allocation6 + $0x20] sm:$0xff] %v1969_v30  ;;  %v1125_v2 = vmul.f32 1.442695, %v1090_v18  ;;  %v1401_v1 = vsub.f32 %v1018_v21, %v1383_v16  ;;  %v1455_v35 = vsub.f32 %v1346_v28, %v1383_v16  ;;  %v3986_v18 = vld [vmem:[#allocation85_spill] sm:$0xff] }
 0x1e8   :  { %1730 = vst [vmem:[#allocation5 + $0x2c8] sm:$0xff] %v1711_v47  ;;  %v1748_v61 = vmax.f32 %v1383_v16, %v1711_v47  ;;  %v804_v48 = vadd.f32 %v2391_v38, %v2389_v37  ;;  %v822_v42 = vmul.f32 2.0, %v2391_v38  ;;  %2410 = vpow2.f32 %v1071_v60 }
 0x1e9   :  { %v494_v7 = vadd.f32 %v476_v4, %v456_v59  ;;  %2412 = vpow2.f32 %v1125_v2  ;;  %v1436_v0 = vmul.f32 1.442695, %v1401_v1  ;;  %v1490_v12 = vmul.f32 1.442695, %v1455_v35  ;;  %v3985_v59 = vld [vmem:[#allocation94_spill] sm:$0xff] }
 0x1ea   :  { %v2393_v14 = vpop.eup %2392  ;;  %v1766_v11 = vsub.f32 %v1383_v16, %v1748_v61  ;;  %v840_v40 = vadd.f32 %v2389_v37, %v822_v42  ;;  %v1820_v25 = vsub.f32 %v1711_v47, %v1748_v61  ;;  %v604_v54 = vadd.f32 %v3981_v32, %v3980_v8  ;;  %v3987_v16 = vld [vmem:[#allocation95_spill] sm:$0xff] }
 0x1eb   :  { %v2395_v41 = vpop.eup %2394  ;;  %v1133_v46 = vmul.f32 %v2393_v14, %v804_v48  ;;  %512 = vst [vmem:[#allocation5 + $0x38] sm:$0xff] %v494_v7  ;;  %2414 = vpow2.f32 %v1436_v0  ;;  %v624_v62 = vmul.f32 %v3943_v9, %v3716_v56  ;;  %v933_v53 = vadd.f32 %v3983_v49, %v3982_v51  ;;  %v3988_v51 = vld [vmem:[#allocation18_spill] sm:$0xff] }
 0x1ec   :  { %v1187_v63 = vmul.f32 3.0, %v2395_v41  ;;  %v1801_v6 = vmul.f32 1.442695, %v1766_v11  ;;  %v2397_v36 = vpop.eup %2396  ;;  %v1169_v23 = vmul.f32 %v2393_v14, %v840_v40  ;;  %2416 = vpow2.f32 %v1490_v12 }
 0x1ed   :  { %v1151_v43 = vadd.f32 %v2395_v41, %v1133_v46  ;;  %v1855_v44 = vmul.f32 1.442695, %v1820_v25  ;;  %v2399_v29 = vpop.eup %2398  ;;  %v642_v52 = vadd.f32 %v624_v62, %v604_v54  ;;  %v953_v22 = vmul.f32 %v3945_v58, %v3716_v56 }
 0x1ee   :  { %2418 = vpow2.f32 %v1801_v6  ;;  %v1205_v5 = vadd.f32 %v1187_v63, %v1169_v23  ;;  %v1552_v21 = vmul.f32 4.0, %v2399_v29  ;;  %v1298_v33 = vadd.f32 %v3985_v59, %v3984_v3  ;;  %v3744_v63 = vpop.f32.mrf.mxu1 }
 0x1ef   :  { %v2401_v27 = vpop.eup %2400  ;;  %v1498_v20 = vmul.f32 %v2397_v36, %v1151_v43  ;;  %2420 = vpow2.f32 %v1855_v44  ;;  %661 = vst [vmem:[#allocation5 + $0xc8] sm:$0xff] %v642_v52  ;;  %v679_v50 = vmax.f32 %v494_v7, %v642_v52  ;;  %v971_v26 = vadd.f32 %v953_v22, %v933_v53 }
 0x1f0   :  { %v2403_v28 = vpop.eup %2402  ;;  %v1318_v24 = vmul.f32 %v3948_v45, %v3716_v56  ;;  %v1534_v30 = vmul.f32 %v2397_v36, %v1205_v5  ;;  %v1663_v47 = vadd.f32 %v3987_v16, %v3986_v18  ;;  %v1683_v37 = vmul.f32 %v3949_v55, %v3716_v56  ;;  %v3989_v18 = vld [vmem:[#allocation22_spill] sm:$0xff] }
 0x1f1   :  { %v2405_v57 = vpop.eup %2404  ;;  %v1516_v13 = vadd.f32 %v2399_v29, %v1498_v20  ;;  %v697_v38 = vsub.f32 %v494_v7, %v679_v50  ;;  %v751_v2 = vsub.f32 %v642_v52, %v679_v50  ;;  %990 = vst [vmem:[#allocation5 + $0x158] sm:$0xff] %v971_v26  ;;  %v1008_v1 = vmax.f32 %v679_v50, %v971_v26 }
 0x1f2   :  { %v2407_v60 = vpop.eup %2406  ;;  %v1917_v4 = vmul.f32 5.0, %v2405_v57  ;;  %v1570_v35 = vadd.f32 %v1552_v21, %v1534_v30  ;;  %v1336_v54 = vadd.f32 %v1318_v24, %v1298_v33  ;;  %v1701_v44 = vadd.f32 %v1683_v37, %v1663_v47 }
 0x1f3   :  { %v1863_v61 = vmul.f32 %v2403_v28, %v1516_v13  ;;  %v815_v48 = vadd.f32 %v2407_v60, %v2401_v27  ;;  %v833_v42 = vmul.f32 2.0, %v2407_v60  ;;  %v2409_v14 = vpop.eup %2408  ;;  %v722_v0 = vmul.f32 1.442695, %v697_v38 }
 0x1f4   :  { %v776_v12 = vmul.f32 1.442695, %v751_v2  ;;  %v1026_v11 = vsub.f32 %v679_v50, %v1008_v1  ;;  %v1080_v41 = vsub.f32 %v971_v26, %v1008_v1  ;;  %v1973_v40 = vmul.f32 %v2409_v14, %v3723_v34  ;;  %1355 = vst [vmem:[#allocation5 + $0x1e8] sm:$0xff] %v1336_v54  ;;  %1720 = vst [vmem:[#allocation5 + $0x278] sm:$0xff] %v1701_v44 }
 0x1f5   :  { %v1881_v46 = vadd.f32 %v2405_v57, %v1863_v61  ;;  %v1899_v25 = vmul.f32 %v2403_v28, %v1570_v35  ;;  %v851_v56 = vadd.f32 %v2401_v27, %v833_v42  ;;  %v2411_v8 = vpop.eup %2410  ;;  %2422 = vpow2.f32 %v722_v0  ;;  %v3992_v42 = vld [vmem:[#allocation58_spill] sm:$0xff] }
 0x1f6   :  { %v1051_v7 = vmul.f32 1.442695, %v1026_v11  ;;  %v1105_v32 = vmul.f32 1.442695, %v1080_v41  ;;  %v2413_v6 = vpop.eup %2412  ;;  %1991 = vst [vmem:[#allocation6 + $0x40] sm:$0xff] %v1973_v40  ;;  %v1144_v36 = vmul.f32 %v2411_v8, %v815_v48  ;;  %v1373_v34 = vmax.f32 %v1008_v1, %v1336_v54 }
 0x1f7   :  { %v3746_v62 = vadd.f32 %v1917_v4, %v1899_v25  ;;  %2424 = vrcp.f32 %v1881_v46  ;;  %v1180_v43 = vmul.f32 %v2411_v8, %v851_v56  ;;  %v1198_v23 = vmul.f32 3.0, %v2413_v6 }
 0x1f8   :  { %2426 = vpow2.f32 %v776_v12  ;;  %v2415_v29 = vpop.eup %2414  ;;  %v1162_v52 = vadd.f32 %v2413_v6, %v1144_v36  ;;  %v463_v49 = vadd.f32 %v3516_v15, %v3988_v51  ;;  %v483_v53 = vmul.f32 %v3942_v17, %v3744_v63 }
 0x1f9   :  { %2428 = vpow2.f32 %v1051_v7  ;;  %v2417_v22 = vpop.eup %2416  ;;  %v1216_v27 = vadd.f32 %v1198_v23, %v1180_v43  ;;  %v1391_v5 = vsub.f32 %v1008_v1, %v1373_v34  ;;  %v1445_v20 = vsub.f32 %v1336_v54, %v1373_v34  ;;  %v3990_v1 = vld [vmem:[#allocation31_spill] sm:$0xff] }
 0x1fa   :  { %2430 = vpow2.f32 %v1105_v32  ;;  %v1652_v28 = vmul.f32 %v2977_v39, %v3502_v19  ;;  %v1509_v50 = vmul.f32 %v2415_v29, %v1162_v52  ;;  %v1738_v26 = vmax.f32 %v1373_v34, %v1701_v44 }
 0x1fb   :  { %v2419_v21 = vpop.eup %2418  ;;  %v501_v3 = vadd.f32 %v483_v53, %v463_v49  ;;  %v1545_v33 = vmul.f32 %v2415_v29, %v1216_v27  ;;  %v1563_v24 = vmul.f32 4.0, %v2417_v22  ;;  %v1416_v15 = vmul.f32 1.442695, %v1391_v5 }
 0x1fc   :  { %v2421_v59 = vpop.eup %2420  ;;  %v1470_v57 = vmul.f32 1.442695, %v1445_v20  ;;  %v1527_v13 = vadd.f32 %v2417_v22, %v1509_v50  ;;  %v1756_v17 = vsub.f32 %v1373_v34, %v1738_v26  ;;  %v1810_v30 = vsub.f32 %v1701_v44, %v1738_v26 }
 0x1fd   :  { %519 = vst [vmem:[#allocation5 + $0x70] sm:$0xff] %v501_v3  ;;  %v611_v16 = vadd.f32 %v3522_v10, %v3989_v18  ;;  %v1581_v47 = vadd.f32 %v1563_v24, %v1545_v33  ;;  %v1928_v37 = vmul.f32 5.0, %v2421_v59  ;;  %2432 = vpow2.f32 %v1416_v15  ;;  %v3991_v10 = vld [vmem:[#allocation41_spill] sm:$0xff] }
 0x1fe   :  { %v631_v39 = vmul.f32 %v3943_v9, %v3744_v63  ;;  %v1874_v19 = vmul.f32 %v2419_v21, %v1527_v13  ;;  %2434 = vpow2.f32 %v1470_v57  ;;  %v1781_v60 = vmul.f32 1.442695, %v1756_v17 }
 0x1ff   :  { %v1835_v4 = vmul.f32 1.442695, %v1810_v30  ;;  %v1910_v38 = vmul.f32 %v2419_v21, %v1581_v47  ;;  %v940_v35 = vadd.f32 %v3527_v31, %v3990_v1  ;;  %v960_v61 = vmul.f32 %v3945_v58, %v3744_v63  ;;  %v3993_v58 = vld [vmem:[#allocation64_spill] sm:$0xff] }
 0x200   :  { %v649_v2 = vadd.f32 %v631_v39, %v611_v16  ;;  %v1892_v48 = vadd.f32 %v2421_v59, %v1874_v19  ;;  %2436 = vpow2.f32 %v1781_v60  ;;  %v1305_v14 = vadd.f32 %v3992_v42, %v3991_v10 }
 0x201   :  { %v1325_v9 = vmul.f32 %v3948_v45, %v3744_v63  ;;  %v3766_v0 = vadd.f32 %v1928_v37, %v1910_v38  ;;  %2438 = vpow2.f32 %v1835_v4  ;;  %v978_v11 = vadd.f32 %v960_v61, %v940_v35 }
 0x202   :  { %668 = vst [vmem:[#allocation5 + $0x100] sm:$0xff] %v649_v2  ;;  %v686_v12 = vmax.f32 %v501_v3, %v649_v2  ;;  %v2423_v31 = vpop.eup %2422  ;;  %2440 = vrcp.f32 %v1892_v48  ;;  %v1670_v40 = vadd.f32 %v1652_v28, %v3993_v58  ;;  %v1690_v46 = vmul.f32 %v3949_v55, %v3744_v63 }
 0x203   :  { %v1343_v41 = vadd.f32 %v1325_v9, %v1305_v14  ;;  %997 = vst [vmem:[#allocation5 + $0x190] sm:$0xff] %v978_v11 }
 0x204   :  { %v2425_v25 = vpop.eup %2424  ;;  %v704_v56 = vsub.f32 %v501_v3, %v686_v12  ;;  %v758_v8 = vsub.f32 %v649_v2, %v686_v12  ;;  %v1015_v45 = vmax.f32 %v686_v12, %v978_v11  ;;  %v1708_v54 = vadd.f32 %v1690_v46, %v1670_v40 }
 0x205   :  { %v2427_v7 = vpop.eup %2426  ;;  %v1971_v32 = vmul.f32 %v2425_v25, %v3746_v62  ;;  %1362 = vst [vmem:[#allocation5 + $0x220] sm:$0xff] %v1343_v41 }
 0x206   :  { %v2429_v6 = vpop.eup %2428  ;;  %v805_v36 = vadd.f32 %v2427_v7, %v2423_v31  ;;  %v823_v43 = vmul.f32 2.0, %v2427_v7  ;;  %v736_v23 = vmul.f32 1.442695, %v704_v56  ;;  %v790_v34 = vmul.f32 1.442695, %v758_v8  ;;  %1727 = vst [vmem:[#allocation5 + $0x2b0] sm:$0xff] %v1708_v54 }
 0x207   :  { %v2431_v44 = vpop.eup %2430  ;;  %1989 = vst [vmem:[#allocation6 + $0x30] sm:$0xff] %v1971_v32  ;;  %v1033_v29 = vsub.f32 %v686_v12, %v1015_v45  ;;  %v1087_v55 = vsub.f32 %v978_v11, %v1015_v45  ;;  %v1380_v63 = vmax.f32 %v1015_v45, %v1343_v41 }
 0x208   :  { %v841_v52 = vadd.f32 %v2423_v31, %v823_v43  ;;  %v1134_v51 = vmul.f32 %v2429_v6, %v805_v36  ;;  %v1188_v49 = vmul.f32 3.0, %v2431_v44  ;;  %2442 = vpow2.f32 %v736_v23 }
 0x209   :  { %2485 = shalt.err (!%p2482_p9)
}
 0x20a   :  { %s2528_s25 = smov 384   ;;  %s2529_s26 = smov 24   ;;  %2444 = vpow2.f32 %v790_v34  ;;  %v1065_v62 = vmul.f32 1.442695, %v1033_v29  ;;  %v1119_v53 = vmul.f32 1.442695, %v1087_v55  ;;  %v1398_v22 = vsub.f32 %v1015_v45, %v1380_v63  ;;  %v2433_v28 = vpop.eup %2432 }
 0x20b   :  { %2012 = dma.vmem_to_hbm [thread:$0]  %s2007_s23, 11520, %s3790_s5, [#allocation3], %s2528_s25, %s2528_s25, %s2529_s26   ;;  %v1152_v27 = vadd.f32 %v2431_v44, %v1134_v51  ;;  %v1170_v5 = vmul.f32 %v2429_v6, %v841_v52  ;;  %v1452_v20 = vsub.f32 %v1343_v41, %v1380_v63  ;;  %v1745_v21 = vmax.f32 %v1380_v63, %v1708_v54  ;;  %v2435_v26 = vpop.eup %2434 }
 0x20c   :  { %2446 = vpow2.f32 %v1065_v62  ;;  %v1430_v50 = vmul.f32 1.442695, %v1398_v22  ;;  %v1553_v30 = vmul.f32 4.0, %v2435_v26  ;;  %s2530_s5 = smov [#allocation6]  }
 0x20d   :  { %v1206_v3 = vadd.f32 %v1188_v49, %v1170_v5  ;;  %v1499_v59 = vmul.f32 %v2433_v28, %v1152_v27  ;;  %2448 = vpow2.f32 %v1119_v53  ;;  %v1484_v33 = vmul.f32 1.442695, %v1452_v20  ;;  %v2437_v57 = vpop.eup %2436  ;;  %s2018_s29 = sshll.u32 %s2530_s5, 4  ;;  %s2019_s29 = int_to_ptr.vmem [resolvable:$true] %s2018_s29 }
 0x20e   :  { %v1763_v24 = vsub.f32 %v1380_v63, %v1745_v21  ;;  %v1817_v15 = vsub.f32 %v1708_v54, %v1745_v21  ;;  %2450 = vpow2.f32 %v1430_v50  ;;  %v2439_v18 = vpop.eup %2438  ;;  %s2494_s0 = scalar_lea.vmem %s2019_s29, 2304  ;;  %p2499_p11 = scmp.lt.s32.totalorder %s2019_s29, %s2019_s29 }
 0x20f   :  { %v1517_v13 = vadd.f32 %v2435_v26, %v1499_v59  ;;  %v1535_v17 = vmul.f32 %v2433_v28, %v1206_v3  ;;  %2452 = vpow2.f32 %v1484_v33  ;;  %v2441_v37 = vpop.eup %2440  ;;  %v1918_v2 = vmul.f32 5.0, %v2439_v18  ;;  %p2495_p10 = scmp.ne.s32.totalorder %s2019_s29, %s2494_s0  ;;  %p2500_p12 = scmp.lt.s32.totalorder %s2494_s0, %s2494_s0 }
 0x210   :  { %v1795_v16 = vmul.f32 1.442695, %v1763_v24  ;;  %v1849_v47 = vmul.f32 1.442695, %v1817_v15  ;;  %v1982_v60 = vmul.f32 %v2441_v37, %v3766_v0 }
 0x211   :  { %v1571_v39 = vadd.f32 %v1553_v30, %v1535_v17  ;;  %v1864_v19 = vmul.f32 %v2437_v57, %v1517_v13  ;;  %p2501_p13 = por %p2500_p12, %p2499_p11 }
 0x212   :  { %2454 = vpow2.f32 %v1795_v16  ;;  %2000 = vst [vmem:[#allocation6 + $0x88] sm:$0xff] %v1982_v60 }
 0x213   :  { %v1882_v4 = vadd.f32 %v2439_v18, %v1864_v19  ;;  %v1900_v38 = vmul.f32 %v2437_v57, %v1571_v39  ;;  %2456 = vpow2.f32 %v1849_v47  ;;  %p2502_p0 = pnand %p2501_p13, %p2495_p10 }
 0x215   :  { %v1936_v1 = vadd.f32 %v1918_v2, %v1900_v38  ;;  %2458 = vrcp.f32 %v1882_v4  ;;  %v2443_v35 = vpop.eup %2442 }
 0x217   :  { %v2445_v61 = vpop.eup %2444 }
 0x218   :  { %v812_v48 = vadd.f32 %v2445_v61, %v2443_v35  ;;  %v830_v10 = vmul.f32 2.0, %v2445_v61 }
 0x219   :  { %v2447_v42 = vpop.eup %2446 }
 0x21a   :  { %v2449_v14 = vpop.eup %2448  ;;  %v848_v9 = vadd.f32 %v2443_v35, %v830_v10  ;;  %v1141_v12 = vmul.f32 %v2447_v42, %v812_v48 }
 0x21b   :  { %v2451_v11 = vpop.eup %2450  ;;  %v1195_v0 = vmul.f32 3.0, %v2449_v14 }
 0x21c   :  { %v1159_v31 = vadd.f32 %v2449_v14, %v1141_v12  ;;  %v1177_v41 = vmul.f32 %v2447_v42, %v848_v9  ;;  %v2453_v58 = vpop.eup %2452 }
 0x21d   :  { %v1560_v45 = vmul.f32 4.0, %v2453_v58 }
 0x21e   :  { %v1213_v40 = vadd.f32 %v1195_v0, %v1177_v41  ;;  %v1506_v46 = vmul.f32 %v2451_v11, %v1159_v31 }
 0x21f   :  { %v2455_v25 = vpop.eup %2454 }
 0x220   :  { %v1524_v56 = vadd.f32 %v2453_v58, %v1506_v46  ;;  %v1542_v8 = vmul.f32 %v2451_v11, %v1213_v40  ;;  %v2457_v7 = vpop.eup %2456 }
 0x221   :  { %v1925_v34 = vmul.f32 5.0, %v2457_v7 }
 0x222   :  { %v2459_v32 = vpop.eup %2458  ;;  %v1578_v54 = vadd.f32 %v1560_v45, %v1542_v8  ;;  %v1871_v6 = vmul.f32 %v2455_v25, %v1524_v56 }
 0x223   :  { %v1972_v36 = vmul.f32 %v2459_v32, %v1936_v1 }
 0x224   :  { %v1889_v43 = vadd.f32 %v2457_v7, %v1871_v6  ;;  %v1907_v23 = vmul.f32 %v2455_v25, %v1578_v54 }
 0x225   :  { %1990 = vst [vmem:[#allocation6 + $0x38] sm:$0xff] %v1972_v36 }
 0x226   :  { %v1943_v44 = vadd.f32 %v1925_v34, %v1907_v23  ;;  %2460 = vrcp.f32 %v1889_v43 }
 0x233   :  { %v2461_v29 = vpop.eup %2460 }
 0x234   :  { %v1979_v55 = vmul.f32 %v2461_v29, %v1943_v44 }
 0x236   :  { %1997 = vst [vmem:[#allocation6 + $0x70] sm:$0xff] %v1979_v55 }
 0x237   :  { %2505 = shalt.err (!%p2502_p0)
}
 0x238   :  { %2024 = dma.vmem_to_hbm [thread:$0]  %s2019_s29, 2304, %s3791_s6, [#allocation7], %s2528_s25, %s2528_s25, %s2529_s26  }
 0x239   :  { %2516 = dma.done.wait [#allocation3], 11520  }
 0x23a   :  { %2517 = vsyncadd [#allocation3], 4294955776 }
 0x23b   :  { %2518 = dma.done.wait [#allocation7], 2304  }
 0x23c   :  { %2519 = vsyncadd [#allocation7], 4294964992 }
 0x23d   :  { %2031 = vsyncpa [#allocation3], 1 }
 0x23e   :  { %2032 = vsyncpa [#allocation7], 1 }
 0x23f   :  { %2033 = vsyncpa [#allocation4], 1 }

</bundles_post_ra>
